<compile_context>
chip_gen: v5e
topology: v5e:2x2
jax: 0.10.0
libtpu: 0.0.40
codegen_flags: <defaults>
</compile_context>

<pallas_src>
import functools

import jax
import jax.numpy as jnp
from jax import lax
from jax.experimental import pallas as pl
from jax.experimental.pallas import tpu as pltpu


# --------------------------------------------------------------------------------------
# Tiling helpers (padding-safe)
# --------------------------------------------------------------------------------------
def _round_up(x, m):
    return ((x + m - 1) // m) * m


def _plan_rows(n, cap=256):
    """(padded_n, tile) for a sublane (second-to-last) axis."""
    cap = max(8, (cap // 8) * 8)
    if n <= cap:
        p = _round_up(n, 8)
        return p, p
    for t in (512, 256, 128, cap):
        if t <= cap and n % t == 0:
            return n, t
    t = min(cap, 128)
    return _round_up(n, t), t


def _plan_lanes(n, cap=512):
    """(padded_n, tile) for a lane (last) axis."""
    if n <= cap:
        return n, n                      # full-dim block: always legal
    for t in (512, 256, 128):
        if t <= cap and n % t == 0:
            return n, t
    return _round_up(n, 128), 128


def _pad2d(x, rows, cols):
    r, c = x.shape
    if (r, c) == (rows, cols):
        return x
    return jnp.pad(x, ((0, rows - r), (0, cols - c)))


# --------------------------------------------------------------------------------------
# Fused linear kernel: y = x @ w + b   (w laid out (K, N) == PyTorch weight.T)
# bf16 MXU operands, f32 accumulator, fused bias, configurable output dtype.
# --------------------------------------------------------------------------------------
def _linear_kernel(x_ref, w_ref, b_ref, o_ref, acc_ref):
    @pl.when(pl.program_id(2) == 0)
    def _():
        acc_ref[...] = jnp.zeros_like(acc_ref)

    acc_ref[...] += jnp.dot(x_ref[...].astype(jnp.bfloat16),
                            w_ref[...].astype(jnp.bfloat16),
                            preferred_element_type=jnp.float32)

    @pl.when(pl.program_id(2) == pl.num_programs(2) - 1)
    def _():
        acc = acc_ref[...] + b_ref[...].astype(jnp.float32)
        o_ref[...] = acc.astype(o_ref.dtype)


def linear(x, w, b, out_dtype=None):
    M, K = x.shape
    K2, N = w.shape
    assert K == K2 and b.shape == (N,)
    out_dtype = out_dtype or x.dtype
    Mp, tm = _plan_rows(M, 256)
    Kp, tk = _plan_lanes(K, 512)
    Np, tn = _plan_lanes(N, 512)
    xp = _pad2d(x, Mp, Kp)
    wp = _pad2d(w, Kp, Np)
    bp = _pad2d(b.reshape(1, N), 1, Np)
    out = pl.pallas_call(
        _linear_kernel,
        out_shape=jax.ShapeDtypeStruct((Mp, Np), out_dtype),
        grid=(Mp // tm, Np // tn, Kp // tk),
        in_specs=[
            pl.BlockSpec((tm, tk), lambda i, j, k: (i, k)),
            pl.BlockSpec((tk, tn), lambda i, j, k: (k, j)),
            pl.BlockSpec((1, tn), lambda i, j, k: (0, j)),
        ],
        out_specs=pl.BlockSpec((tm, tn), lambda i, j, k: (i, j)),
        scratch_shapes=[pltpu.VMEM((tm, tn), jnp.float32)],
        compiler_params=pltpu.CompilerParams(
            dimension_semantics=("parallel", "parallel", "arbitrary")),
    )(xp, wp, bp)
    if (Mp, Np) != (M, N):
        out = out[:M, :N]
    return out


# --------------------------------------------------------------------------------------
# Fused linear + LayerNorm (LN over the full output channel dim, done in the epilogue).
# Used for the sr_ratio>1 spatial-reduction conv (expressed as patchify + matmul).
# --------------------------------------------------------------------------------------
def _linear_ln_kernel(x_ref, w_ref, b_ref, g_ref, bb_ref, o_ref, acc_ref, *, eps):
    @pl.when(pl.program_id(1) == 0)
    def _():
        acc_ref[...] = jnp.zeros_like(acc_ref)

    acc_ref[...] += jnp.dot(x_ref[...].astype(jnp.bfloat16),
                            w_ref[...].astype(jnp.bfloat16),
                            preferred_element_type=jnp.float32)

    @pl.when(pl.program_id(1) == pl.num_programs(1) - 1)
    def _():
        y = acc_ref[...] + b_ref[...].astype(jnp.float32)
        mu = jnp.mean(y, axis=-1, keepdims=True)
        yc = y - mu
        var = jnp.mean(yc * yc, axis=-1, keepdims=True)
        y = yc * lax.rsqrt(var + eps) * g_ref[...].astype(jnp.float32) \
            + bb_ref[...].astype(jnp.float32)
        o_ref[...] = y.astype(o_ref.dtype)


def linear_layernorm(x, w, b, gamma, beta, *, eps=1e-5, out_dtype=None):
    M, K = x.shape
    K2, N = w.shape
    assert K == K2
    out_dtype = out_dtype or x.dtype
    Mp, tm = _plan_rows(M, 256)
    Kp, tk = _plan_lanes(K, 512)
    xp = _pad2d(x, Mp, Kp)
    wp = _pad2d(w, Kp, N)
    out = pl.pallas_call(
        functools.partial(_linear_ln_kernel, eps=eps),
        out_shape=jax.ShapeDtypeStruct((Mp, N), out_dtype),
        grid=(Mp // tm, Kp // tk),
        in_specs=[
            pl.BlockSpec((tm, tk), lambda i, k: (i, k)),
            pl.BlockSpec((tk, N), lambda i, k: (k, 0)),
            pl.BlockSpec((1, N), lambda i, k: (0, 0)),
            pl.BlockSpec((1, N), lambda i, k: (0, 0)),
            pl.BlockSpec((1, N), lambda i, k: (0, 0)),
        ],
        out_specs=pl.BlockSpec((tm, N), lambda i, k: (i, 0)),
        scratch_shapes=[pltpu.VMEM((tm, N), jnp.float32)],
        compiler_params=pltpu.CompilerParams(
            dimension_semantics=("parallel", "arbitrary")),
    )(xp, wp, b.reshape(1, N), gamma.reshape(1, N), beta.reshape(1, N))
    if Mp != M:
        out = out[:M]
    return out


# --------------------------------------------------------------------------------------
# Attention core.  Heads are selected by BlockSpec index_maps on the channel axis of
# (B,N,C)/(B,Nk,C) tensors; `hpb` heads are processed per grid step and the output is
# written as one lane-dense (tq, hpb*d) block directly in (B,N,C) layout.
# --------------------------------------------------------------------------------------
def _heads_per_block(num_heads, d):
    for hpb in range(1, num_heads + 1):
        if num_heads % hpb == 0 and (hpb * d) % 128 == 0:
            return hpb
    return num_heads                      # hpb*d == C (full last dim) -> always legal


def _attn_single_kernel(q_ref, k_ref, v_ref, o_ref, *, scale, hpb, d):
    # Full K/V in one block -> single-pass softmax (no online rescale, no m/l scratch).
    qb = (q_ref[0].astype(jnp.float32) * scale).astype(jnp.bfloat16)   # scale folded into q
    kb = k_ref[0].astype(jnp.bfloat16)
    vb = v_ref[0].astype(jnp.bfloat16)
    outs = []
    for hh in range(hpb):                                              # static unroll
        sl = slice(hh * d, (hh + 1) * d)
        s = lax.dot_general(qb[:, sl], kb[:, sl], (((1,), (1,)), ((), ())),
                            preferred_element_type=jnp.float32)        # (tq, Nk)
        m = s.max(axis=-1, keepdims=True)
        p = jnp.exp(s - m)
        l = p.sum(axis=-1, keepdims=True)
        o = jnp.dot(p.astype(jnp.bfloat16), vb[:, sl],
                    preferred_element_type=jnp.float32)                # (tq, d)
        outs.append(o * pl.reciprocal(l, approx=True))
    o_ref[0] = jnp.concatenate(outs, axis=-1).astype(o_ref.dtype)      # lane-dense store


def _attn_flash_kernel(q_ref, k_ref, v_ref, o_ref, m_sc, l_sc, acc_sc, *,
                       scale, hpb, d, kv_len, kv_tile, need_mask):
    ki = pl.program_id(3)

    @pl.when(ki == 0)
    def _():
        m_sc[...] = jnp.full_like(m_sc, -jnp.inf)
        l_sc[...] = jnp.zeros_like(l_sc)
        acc_sc[...] = jnp.zeros_like(acc_sc)

    qb = (q_ref[0].astype(jnp.float32) * scale).astype(jnp.bfloat16)
    kb = k_ref[0].astype(jnp.bfloat16)
    vb = v_ref[0].astype(jnp.bfloat16)

    if need_mask:
        kv_idx = ki * kv_tile + lax.broadcasted_iota(jnp.int32, (1, kv_tile), 1)
        valid = kv_idx < kv_len

    for hh in range(hpb):
        sl = slice(hh * d, (hh + 1) * d)
        s = lax.dot_general(qb[:, sl], kb[:, sl], (((1,), (1,)), ((), ())),
                            preferred_element_type=jnp.float32)        # (tq, tkv)
        if need_mask:
            s = jnp.where(valid, s, -1e30)
        m_prev = m_sc[:, hh:hh + 1]
        m_new = jnp.maximum(m_prev, s.max(axis=-1, keepdims=True))
        alpha = jnp.exp(m_prev - m_new)
        p = jnp.exp(s - m_new)
        l_sc[:, hh:hh + 1] = alpha * l_sc[:, hh:hh + 1] + p.sum(axis=-1, keepdims=True)
        acc_sc[:, sl] = alpha * acc_sc[:, sl] + jnp.dot(
            p.astype(jnp.bfloat16), vb[:, sl], preferred_element_type=jnp.float32)
        m_sc[:, hh:hh + 1] = m_new

    @pl.when(ki == pl.num_programs(3) - 1)
    def _():
        outs = []
        for hh in range(hpb):
            sl = slice(hh * d, (hh + 1) * d)
            outs.append(acc_sc[:, sl] * pl.reciprocal(l_sc[:, hh:hh + 1], approx=True))
        o_ref[0] = jnp.concatenate(outs, axis=-1).astype(o_ref.dtype)


def attention_core(q, k, v, *, num_heads, scale, out_dtype=None,
                   force_flash=False, kv_tile_cap=512):
    """q: (B, Nq, C); k, v: (B, Nk, C)  ->  (B, Nq, C) in (b, n, head*d) layout."""
    B, Nq, C = q.shape
    _, Nk, _ = k.shape
    assert C % num_heads == 0
    d = C // num_heads
    hpb = _heads_per_block(num_heads, d)
    nhb = num_heads // hpb
    w = hpb * d
    out_dtype = out_dtype or q.dtype

    Nqp, tq = _plan_rows(Nq, 256)
    if Nqp != Nq:
        q = jnp.pad(q, ((0, 0), (0, Nqp - Nq), (0, 0)))

    # Single-pass softmax whenever the full K/V blocks (double-buffered) stay small.
    kv_block_bytes = 2 * 2 * Nk * w * k.dtype.itemsize
    use_flash = force_flash or kv_block_bytes > (8 << 20)

    if not use_flash:
        out = pl.pallas_call(
            functools.partial(_attn_single_kernel, scale=scale, hpb=hpb, d=d),
            out_shape=jax.ShapeDtypeStruct((B, Nqp, C), out_dtype),
            grid=(B, nhb, Nqp // tq),
            in_specs=[
                pl.BlockSpec((1, tq, w), lambda b, h, qi: (b, qi, h)),
                pl.BlockSpec((1, Nk, w), lambda b, h, qi: (b, 0, h)),
                pl.BlockSpec((1, Nk, w), lambda b, h, qi: (b, 0, h)),
            ],
            out_specs=pl.BlockSpec((1, tq, w), lambda b, h, qi: (b, qi, h)),
            compiler_params=pltpu.CompilerParams(
                dimension_semantics=("parallel", "parallel", "parallel")),
        )(q, k, v)
    else:
        Nkp, tkv = _plan_rows(Nk, kv_tile_cap)
        if Nkp != Nk:
            k = jnp.pad(k, ((0, 0), (0, Nkp - Nk), (0, 0)))
            v = jnp.pad(v, ((0, 0), (0, Nkp - Nk), (0, 0)))
        out = pl.pallas_call(
            functools.partial(_attn_flash_kernel, scale=scale, hpb=hpb, d=d,
                              kv_len=Nk, kv_tile=tkv, need_mask=(Nkp != Nk)),
            out_shape=jax.ShapeDtypeStruct((B, Nqp, C), out_dtype),
            grid=(B, nhb, Nqp // tq, Nkp // tkv),
            in_specs=[
                pl.BlockSpec((1, tq, w), lambda b, h, qi, ki: (b, qi, h)),
                pl.BlockSpec((1, tkv, w), lambda b, h, qi, ki: (b, ki, h)),
                pl.BlockSpec((1, tkv, w), lambda b, h, qi, ki: (b, ki, h)),
            ],
            out_specs=pl.BlockSpec((1, tq, w), lambda b, h, qi, ki: (b, qi, h)),
            scratch_shapes=[
                pltpu.VMEM((tq, hpb), jnp.float32),
                pltpu.VMEM((tq, hpb), jnp.float32),
                pltpu.VMEM((tq, w), jnp.float32),
            ],
            compiler_params=pltpu.CompilerParams(
                dimension_semantics=("parallel", "parallel", "parallel", "arbitrary")),
        )(q, k, v)

    if Nqp != Nq:
        out = out[:, :Nq, :]
    return out


# --------------------------------------------------------------------------------------
# Full module forward
# --------------------------------------------------------------------------------------
def attention_forward(x, params, *, H, W, num_heads, sr_ratio=1):
    B, N, C = x.shape
    assert N == H * W and C % num_heads == 0
    d = C // num_heads
    scale = d ** (-0.5)
    compute_dtype = jnp.bfloat16          # intermediates in bf16 (half HBM traffic)

    x2 = x.reshape(B * N, C)
    q = linear(x2, params["q_w"], params["q_b"], out_dtype=compute_dtype)
    q = q.reshape(B, N, C)                # no head transpose: heads picked by BlockSpec

    if sr_ratio > 1:
        s = sr_ratio
        Hs, Ws = H // s, W // s
        # Conv2d(C, C, k=s, stride=s) == patchify + matmul; LayerNorm fused into epilogue.
        xp = x.reshape(B, Hs, s, Ws, s, C).transpose(0, 1, 3, 2, 4, 5)
        xp = xp.reshape(B * Hs * Ws, s * s * C)
        kv_in = linear_layernorm(xp, params["sr_w"], params["sr_b"],
                                 params["ln_g"], params["ln_b"],
                                 out_dtype=compute_dtype)
        Nk = Hs * Ws
    else:
        kv_in, Nk = x2, N

    # kv Linear split into k / v Linears (weight column slices) so k and v are separately
    # addressable with head-indexed BlockSpecs -- no (B,Nk,2C) split pass over HBM.
    k = linear(kv_in, params["kv_w"][:, :C], params["kv_b"][:C], out_dtype=compute_dtype)
    v = linear(kv_in, params["kv_w"][:, C:], params["kv_b"][C:], out_dtype=compute_dtype)
    k = k.reshape(B, Nk, C)
    v = v.reshape(B, Nk, C)

    o = attention_core(q, k, v, num_heads=num_heads, scale=scale,
                       out_dtype=compute_dtype)                 # (B, N, C)
    out = linear(o.reshape(B * N, C), params["proj_w"], params["proj_b"],
                 out_dtype=x.dtype)
    # attn_drop / proj_drop: p=0.0 / eval mode -> identity (omitted).
    return out.reshape(B, N, C)


# --------------------------------------------------------------------------------------
# Pure-JAX references (f32, HIGHEST precision)
# --------------------------------------------------------------------------------------
def _reference(x, params, *, H, W, num_heads, sr_ratio=1):
    hp = lax.Precision.HIGHEST
    B, N, C = x.shape
    d = C // num_heads
    scale = d ** (-0.5)

    q = jnp.einsum("bnc,ck->bnk", x, params["q_w"], precision=hp) + params["q_b"]
    q = q.reshape(B, N, num_heads, d).transpose(0, 2, 1, 3)

    if sr_ratio > 1:
        s = sr_ratio
        Hs, Ws = H // s, W // s
        x_nchw = jnp.transpose(x.reshape(B, H, W, C), (0, 3, 1, 2))
        w_oihw = jnp.transpose(params["sr_w"].reshape(s, s, C, C), (3, 2, 0, 1))
        xr = lax.conv_general_dilated(
            x_nchw, w_oihw, window_strides=(s, s), padding="VALID",
            dimension_numbers=("NCHW", "OIHW", "NCHW"), precision=hp)
        xr = xr + params["sr_b"][None, :, None, None]
        xr = jnp.transpose(xr, (0, 2, 3, 1)).reshape(B, Hs * Ws, C)
        mu = xr.mean(-1, keepdims=True)
        var = ((xr - mu) ** 2).mean(-1, keepdims=True)
        xr = (xr - mu) / jnp.sqrt(var + 1e-5) * params["ln_g"] + params["ln_b"]
        kv_in = xr
    else:
        kv_in = x

    kv = jnp.einsum("bnc,ck->bnk", kv_in, params["kv_w"], precision=hp) + params["kv_b"]
    Nk = kv.shape[1]
    kv = kv.reshape(B, Nk, 2, num_heads, d)
    k = kv[:, :, 0].transpose(0, 2, 1, 3)
    v = kv[:, :, 1].transpose(0, 2, 1, 3)

    attn = jnp.einsum("bhnd,bhmd->bhnm", q, k, precision=hp) * scale
    attn = jax.nn.softmax(attn, axis=-1)
    o = jnp.einsum("bhnm,bhmd->bhnd", attn, v, precision=hp)
    o = o.transpose(0, 2, 1, 3).reshape(B, N, C)
    return jnp.einsum("bnc,ck->bnk", o, params["proj_w"], precision=hp) + params["proj_b"]


def _attn_ref(q, k, v, num_heads, scale):
    hp = lax.Precision.HIGHEST
    B, Nq, C = q.shape
    d = C // num_heads
    qh = q.reshape(B, Nq, num_heads, d).transpose(0, 2, 1, 3)
    kh = k.reshape(B, -1, num_heads, d).transpose(0, 2, 1, 3)
    vh = v.reshape(B, -1, num_heads, d).transpose(0, 2, 1, 3)
    s = jnp.einsum("bhqd,bhkd->bhqk", qh, kh, precision=hp) * scale
    p = jax.nn.softmax(s, axis=-1)
    o = jnp.einsum("bhqk,bhkd->bhqd", p, vh, precision=hp)
    return o.transpose(0, 2, 1, 3).reshape(B, Nq, C)


if __name__ == "__main__":
    B, H, W = 2, 8, 8
    dim, num_heads = 32, 8
    N = H * W
    key = jax.random.PRNGKey(0)
    ks = jax.random.split(key, 16)

    x = jax.random.normal(ks[0], (B, N, dim), dtype=jnp.float32)
    # Weights stored as (in, out) == PyTorch weight.T; qkv_bias=True variant exercised.
    params = {
        "q_w": jax.random.normal(ks[1], (dim, dim), jnp.float32) * 0.05,
        "q_b": jax.random.normal(ks[2], (dim,), jnp.float32) * 0.05,
        "kv_w": jax.random.normal(ks[3], (dim, 2 * dim), jnp.float32) * 0.05,
        "kv_b": jax.random.normal(ks[4], (2 * dim,), jnp.float32) * 0.05,
        "proj_w": jax.random.normal(ks[5], (dim, dim), jnp.float32) * 0.05,
        "proj_b": jax.random.normal(ks[6], (dim,), jnp.float32) * 0.05,
        # sr_ratio=2 path: Conv2d weight as patchify matrix (kh, kw, cin, cout) -> (s*s*C, C).
        "sr_w": jax.random.normal(ks[7], (2 * 2 * dim, dim), jnp.float32) * 0.05,
        "sr_b": jax.random.normal(ks[8], (dim,), jnp.float32) * 0.05,
        "ln_g": 1.0 + jax.random.normal(ks[9], (dim,), jnp.float32) * 0.02,
        "ln_b": jax.random.normal(ks[10], (dim,), jnp.float32) * 0.02,
    }

    # bf16 MXU operands + bf16 intermediates vs an f32/HIGHEST reference -> loose tolerance.
    tol = dict(atol=2e-2, rtol=2e-2)

    # sr_ratio = 1 (module default)
    fn1 = jax.jit(functools.partial(attention_forward, H=H, W=W,
                                    num_heads=num_heads, sr_ratio=1))
    out1 = jax.block_until_ready(fn1(x, params))
    ref1 = _reference(x, params, H=H, W=W, num_heads=num_heads, sr_ratio=1)
    assert out1.shape == (B, N, dim)
    assert jnp.allclose(out1, ref1, **tol), "mismatch (sr_ratio=1)"

    # sr_ratio = 2 (spatial-reduction conv fused with LayerNorm)
    fn2 = jax.jit(functools.partial(attention_forward, H=H, W=W,
                                    num_heads=num_heads, sr_ratio=2))
    out2 = jax.block_until_ready(fn2(x, params))
    ref2 = _reference(x, params, H=H, W=W, num_heads=num_heads, sr_ratio=2)
    assert out2.shape == (B, N, dim)
    assert jnp.allclose(out2, ref2, **tol), "mismatch (sr_ratio=2)"

    # Flash / online-softmax fallback path exercised directly (multiple kv steps).
    d = dim // num_heads
    qd = jax.random.normal(ks[11], (B, N, dim), jnp.float32) * 0.3
    kd = jax.random.normal(ks[12], (B, N, dim), jnp.float32) * 0.3
    vd = jax.random.normal(ks[13], (B, N, dim), jnp.float32) * 0.3
    out3 = jax.block_until_ready(
        attention_core(qd, kd, vd, num_heads=num_heads, scale=d ** (-0.5),
                       out_dtype=jnp.float32, force_flash=True, kv_tile_cap=32))
    ref3 = _attn_ref(qd, kd, vd, num_heads, d ** (-0.5))
    assert jnp.allclose(out3, ref3, **tol), "mismatch (flash fallback)"

    print("KERNEL_OK")
</pallas_src>

<mosaic_0001>
module attributes {stable_mosaic.version = 11 : i64} {
  func.func @_linear_kernel(%arg0: i32, %arg1: i32, %arg2: i32, %arg3: memref<128x32xf32, #tpu.memory_space<vmem>>, %arg4: memref<32x32xf32, #tpu.memory_space<vmem>>, %arg5: memref<1x32xf32, #tpu.memory_space<vmem>>, %arg6: memref<128x32xbf16, #tpu.memory_space<vmem>>, %arg7: memref<128x32xf32, #tpu.memory_space<vmem>>) attributes {dimension_semantics = [#tpu.dimension_semantics<parallel>, #tpu.dimension_semantics<parallel>, #tpu.dimension_semantics<arbitrary>], iteration_bounds = array<i64: 1, 1, 1>, scalar_prefetch = 0 : i64, scratch_operands = 1 : i64, tpu.core_type = #tpu.core_type<tc>, window_params = [{transform_indices = @transform_0, window_bounds = array<i64: 128, 32>}, {transform_indices = @transform_1, window_bounds = array<i64: 32, 32>}, {transform_indices = @transform_2, window_bounds = array<i64: 1, 32>}, {transform_indices = @transform_3, window_bounds = array<i64: 128, 32>}]} {
    %c0_i32 = arith.constant 0 : i32
    %0 = arith.cmpi eq, %arg2, %c0_i32 : i32
    %1 = arith.extui %0 : i1 to i32
    %c0_i32_0 = arith.constant 0 : i32
    %2 = arith.cmpi ne, %1, %c0_i32_0 : i32
    scf.if %2 {
      %cst_10 = arith.constant 0.000000e+00 : f32
      %14 = vector.broadcast %cst_10 : f32 to vector<128x32xf32>
      %c0_11 = arith.constant 0 : index
      %c0_12 = arith.constant 0 : index
      %15 = vector.load %arg7[%c0_11, %c0_12] : memref<128x32xf32, #tpu.memory_space<vmem>>, vector<128x32xf32>
      tpu.vector_store %arg7[%c0_11, %c0_12], %14 {strides = array<i32>} : memref<128x32xf32, #tpu.memory_space<vmem>>, vector<128x32xf32>,
    } else {
    }
    %c0 = arith.constant 0 : index
    %c0_1 = arith.constant 0 : index
    %3 = vector.load %arg7[%c0, %c0_1] : memref<128x32xf32, #tpu.memory_space<vmem>>, vector<128x32xf32>
    %c0_2 = arith.constant 0 : index
    %c0_3 = arith.constant 0 : index
    %4 = vector.load %arg3[%c0_2, %c0_3] : memref<128x32xf32, #tpu.memory_space<vmem>>, vector<128x32xf32>
    %5 = arith.truncf %4 : vector<128x32xf32> to vector<128x32xbf16>
    %c0_4 = arith.constant 0 : index
    %c0_5 = arith.constant 0 : index
    %6 = vector.load %arg4[%c0_4, %c0_5] : memref<32x32xf32, #tpu.memory_space<vmem>>, vector<32x32xf32>
    %7 = arith.truncf %6 : vector<32x32xf32> to vector<32x32xbf16>
    %cst = arith.constant dense<0.000000e+00> : vector<128x32xf32>
    %8 = tpu.matmul %5, %7, %cst {dimension_numbers = #tpu.dot_dimension_numbers<[1], [0], [0], [1], [0, 0, 1, 1], [], []>} : vector<128x32xbf16>, vector<32x32xbf16>, vector<128x32xf32> -> vector<128x32xf32>
    %9 = arith.addf %3, %8 : vector<128x32xf32>
    %c0_6 = arith.constant 0 : index
    %c0_7 = arith.constant 0 : index
    %10 = vector.load %arg7[%c0_6, %c0_7] : memref<128x32xf32, #tpu.memory_space<vmem>>, vector<128x32xf32>
    tpu.vector_store %arg7[%c0_6, %c0_7], %9 {strides = array<i32>} : memref<128x32xf32, #tpu.memory_space<vmem>>, vector<128x32xf32>,
    %c0_i32_8 = arith.constant 0 : i32
    %11 = arith.cmpi eq, %arg2, %c0_i32_8 : i32
    %12 = arith.extui %11 : i1 to i32
    %c0_i32_9 = arith.constant 0 : i32
    %13 = arith.cmpi ne, %12, %c0_i32_9 : i32
    scf.if %13 {
      %c0_10 = arith.constant 0 : index
      %c0_11 = arith.constant 0 : index
      %14 = vector.load %arg7[%c0_10, %c0_11] : memref<128x32xf32, #tpu.memory_space<vmem>>, vector<128x32xf32>
      %c0_12 = arith.constant 0 : index
      %c0_13 = arith.constant 0 : index
      %15 = vector.load %arg5[%c0_12, %c0_13] : memref<1x32xf32, #tpu.memory_space<vmem>>, vector<1x32xf32>
      %16 = vector.broadcast %15 : vector<1x32xf32> to vector<128x32xf32>
      %17 = arith.addf %14, %16 : vector<128x32xf32>
      %18 = arith.truncf %17 : vector<128x32xf32> to vector<128x32xbf16>
      %c0_14 = arith.constant 0 : index
      %c0_15 = arith.constant 0 : index
      %19 = vector.load %arg6[%c0_14, %c0_15] : memref<128x32xbf16, #tpu.memory_space<vmem>>, vector<128x32xbf16>
      tpu.vector_store %arg6[%c0_14, %c0_15], %18 {strides = array<i32>} : memref<128x32xbf16, #tpu.memory_space<vmem>>, vector<128x32xbf16>,
    } else {
    }
    return
  }
  func.func @transform_0(%arg0: i32, %arg1: i32, %arg2: i32) -> (i32, i32) {
    %c0_i32 = arith.constant 0 : i32
    return %arg0, %arg2 : i32, i32
  }
  func.func @transform_1(%arg0: i32, %arg1: i32, %arg2: i32) -> (i32, i32) {
    %c0_i32 = arith.constant 0 : i32
    return %arg2, %arg1 : i32, i32
  }
  func.func @transform_2(%arg0: i32, %arg1: i32, %arg2: i32) -> (i32, i32) {
    %c0_i32 = arith.constant 0 : i32
    %c0_i32_0 = arith.constant 0 : i32
    return %c0_i32, %arg1 : i32, i32
  }
  func.func @transform_3(%arg0: i32, %arg1: i32, %arg2: i32) -> (i32, i32) {
    %c0_i32 = arith.constant 0 : i32
    return %arg0, %arg1 : i32, i32
  }
}

module attributes {stable_mosaic.version = 11 : i64} {
  func.func @_linear_kernel(%arg0: i32, %arg1: i32, %arg2: i32, %arg3: memref<128x32xbf16, #tpu.memory_space<vmem>>, %arg4: memref<32x32xf32, #tpu.memory_space<vmem>>, %arg5: memref<1x32xf32, #tpu.memory_space<vmem>>, %arg6: memref<128x32xf32, #tpu.memory_space<vmem>>, %arg7: memref<128x32xf32, #tpu.memory_space<vmem>>) attributes {dimension_semantics = [#tpu.dimension_semantics<parallel>, #tpu.dimension_semantics<parallel>, #tpu.dimension_semantics<arbitrary>], iteration_bounds = array<i64: 1, 1, 1>, scalar_prefetch = 0 : i64, scratch_operands = 1 : i64, tpu.core_type = #tpu.core_type<tc>, window_params = [{transform_indices = @transform_0, window_bounds = array<i64: 128, 32>}, {transform_indices = @transform_1, window_bounds = array<i64: 32, 32>}, {transform_indices = @transform_2, window_bounds = array<i64: 1, 32>}, {transform_indices = @transform_3, window_bounds = array<i64: 128, 32>}]} {
    %c0_i32 = arith.constant 0 : i32
    %0 = arith.cmpi eq, %arg2, %c0_i32 : i32
    %1 = arith.extui %0 : i1 to i32
    %c0_i32_0 = arith.constant 0 : i32
    %2 = arith.cmpi ne, %1, %c0_i32_0 : i32
    scf.if %2 {
      %cst_10 = arith.constant 0.000000e+00 : f32
      %13 = vector.broadcast %cst_10 : f32 to vector<128x32xf32>
      %c0_11 = arith.constant 0 : index
      %c0_12 = arith.constant 0 : index
      %14 = vector.load %arg7[%c0_11, %c0_12] : memref<128x32xf32, #tpu.memory_space<vmem>>, vector<128x32xf32>
      tpu.vector_store %arg7[%c0_11, %c0_12], %13 {strides = array<i32>} : memref<128x32xf32, #tpu.memory_space<vmem>>, vector<128x32xf32>,
    } else {
    }
    %c0 = arith.constant 0 : index
    %c0_1 = arith.constant 0 : index
    %3 = vector.load %arg7[%c0, %c0_1] : memref<128x32xf32, #tpu.memory_space<vmem>>, vector<128x32xf32>
    %c0_2 = arith.constant 0 : index
    %c0_3 = arith.constant 0 : index
    %4 = vector.load %arg3[%c0_2, %c0_3] : memref<128x32xbf16, #tpu.memory_space<vmem>>, vector<128x32xbf16>
    %c0_4 = arith.constant 0 : index
    %c0_5 = arith.constant 0 : index
    %5 = vector.load %arg4[%c0_4, %c0_5] : memref<32x32xf32, #tpu.memory_space<vmem>>, vector<32x32xf32>
    %6 = arith.truncf %5 : vector<32x32xf32> to vector<32x32xbf16>
    %cst = arith.constant dense<0.000000e+00> : vector<128x32xf32>
    %7 = tpu.matmul %4, %6, %cst {dimension_numbers = #tpu.dot_dimension_numbers<[1], [0], [0], [1], [0, 0, 1, 1], [], []>} : vector<128x32xbf16>, vector<32x32xbf16>, vector<128x32xf32> -> vector<128x32xf32>
    %8 = arith.addf %3, %7 : vector<128x32xf32>
    %c0_6 = arith.constant 0 : index
    %c0_7 = arith.constant 0 : index
    %9 = vector.load %arg7[%c0_6, %c0_7] : memref<128x32xf32, #tpu.memory_space<vmem>>, vector<128x32xf32>
    tpu.vector_store %arg7[%c0_6, %c0_7], %8 {strides = array<i32>} : memref<128x32xf32, #tpu.memory_space<vmem>>, vector<128x32xf32>,
    %c0_i32_8 = arith.constant 0 : i32
    %10 = arith.cmpi eq, %arg2, %c0_i32_8 : i32
    %11 = arith.extui %10 : i1 to i32
    %c0_i32_9 = arith.constant 0 : i32
    %12 = arith.cmpi ne, %11, %c0_i32_9 : i32
    scf.if %12 {
      %c0_10 = arith.constant 0 : index
      %c0_11 = arith.constant 0 : index
      %13 = vector.load %arg7[%c0_10, %c0_11] : memref<128x32xf32, #tpu.memory_space<vmem>>, vector<128x32xf32>
      %c0_12 = arith.constant 0 : index
      %c0_13 = arith.constant 0 : index
      %14 = vector.load %arg5[%c0_12, %c0_13] : memref<1x32xf32, #tpu.memory_space<vmem>>, vector<1x32xf32>
      %15 = vector.broadcast %14 : vector<1x32xf32> to vector<128x32xf32>
      %16 = arith.addf %13, %15 : vector<128x32xf32>
      %c0_14 = arith.constant 0 : index
      %c0_15 = arith.constant 0 : index
      %17 = vector.load %arg6[%c0_14, %c0_15] : memref<128x32xf32, #tpu.memory_space<vmem>>, vector<128x32xf32>
      tpu.vector_store %arg6[%c0_14, %c0_15], %16 {strides = array<i32>} : memref<128x32xf32, #tpu.memory_space<vmem>>, vector<128x32xf32>,
    } else {
    }
    return
  }
  func.func @transform_0(%arg0: i32, %arg1: i32, %arg2: i32) -> (i32, i32) {
    %c0_i32 = arith.constant 0 : i32
    return %arg0, %arg2 : i32, i32
  }
  func.func @transform_1(%arg0: i32, %arg1: i32, %arg2: i32) -> (i32, i32) {
    %c0_i32 = arith.constant 0 : i32
    return %arg2, %arg1 : i32, i32
  }
  func.func @transform_2(%arg0: i32, %arg1: i32, %arg2: i32) -> (i32, i32) {
    %c0_i32 = arith.constant 0 : i32
    %c0_i32_0 = arith.constant 0 : i32
    return %c0_i32, %arg1 : i32, i32
  }
  func.func @transform_3(%arg0: i32, %arg1: i32, %arg2: i32) -> (i32, i32) {
    %c0_i32 = arith.constant 0 : i32
    return %arg0, %arg1 : i32, i32
  }
}

module attributes {stable_mosaic.version = 11 : i64} {
  func.func @_attn_single_kernel(%arg0: i32, %arg1: i32, %arg2: i32, %arg3: memref<1x64x32xbf16, #tpu.memory_space<vmem>>, %arg4: memref<1x64x32xbf16, #tpu.memory_space<vmem>>, %arg5: memref<1x64x32xbf16, #tpu.memory_space<vmem>>, %arg6: memref<1x64x32xbf16, #tpu.memory_space<vmem>>) attributes {dimension_semantics = [#tpu.dimension_semantics<parallel>, #tpu.dimension_semantics<parallel>, #tpu.dimension_semantics<parallel>], iteration_bounds = array<i64: 2, 1, 1>, scalar_prefetch = 0 : i64, scratch_operands = 0 : i64, tpu.core_type = #tpu.core_type<tc>, window_params = [{transform_indices = @transform_0, window_bounds = array<i64: 1, 64, 32>}, {transform_indices = @transform_1, window_bounds = array<i64: 1, 64, 32>}, {transform_indices = @transform_2, window_bounds = array<i64: 1, 64, 32>}, {transform_indices = @transform_3, window_bounds = array<i64: 1, 64, 32>}]} {
    %c0 = arith.constant 0 : index
    %c0_0 = arith.constant 0 : index
    %c0_1 = arith.constant 0 : index
    %0 = vector.load %arg3[%c0, %c0_0, %c0_1] : memref<1x64x32xbf16, #tpu.memory_space<vmem>>, vector<1x64x32xbf16>
    %1 = vector.shape_cast %0 : vector<1x64x32xbf16> to vector<64x32xbf16>
    %2 = arith.extf %1 : vector<64x32xbf16> to vector<64x32xf32>
    %cst = arith.constant 5.000000e-01 : f32
    %3 = vector.broadcast %cst : f32 to vector<64x32xf32>
    %4 = arith.mulf %2, %3 : vector<64x32xf32>
    %5 = arith.truncf %4 : vector<64x32xf32> to vector<64x32xbf16>
    %c0_2 = arith.constant 0 : index
    %c0_3 = arith.constant 0 : index
    %c0_4 = arith.constant 0 : index
    %6 = vector.load %arg4[%c0_2, %c0_3, %c0_4] : memref<1x64x32xbf16, #tpu.memory_space<vmem>>, vector<1x64x32xbf16>
    %7 = vector.shape_cast %6 : vector<1x64x32xbf16> to vector<64x32xbf16>
    %c0_5 = arith.constant 0 : index
    %c0_6 = arith.constant 0 : index
    %c0_7 = arith.constant 0 : index
    %8 = vector.load %arg5[%c0_5, %c0_6, %c0_7] : memref<1x64x32xbf16, #tpu.memory_space<vmem>>, vector<1x64x32xbf16>
    %9 = vector.shape_cast %8 : vector<1x64x32xbf16> to vector<64x32xbf16>
    %10 = vector.extract_strided_slice %5 {offsets = [0, 0], sizes = [64, 4], strides = [1, 1]} : vector<64x32xbf16> to vector<64x4xbf16>
    %11 = vector.extract_strided_slice %7 {offsets = [0, 0], sizes = [64, 4], strides = [1, 1]} : vector<64x32xbf16> to vector<64x4xbf16>
    %cst_8 = arith.constant dense<0.000000e+00> : vector<64x64xf32>
    %12 = tpu.matmul %10, %11, %cst_8 {dimension_numbers = #tpu.dot_dimension_numbers<[1], [1], [0], [0], [0, 0, 1, 0], [], []>} : vector<64x4xbf16>, vector<64x4xbf16>, vector<64x64xf32> -> vector<64x64xf32>
    %cst_9 = arith.constant dense<0xFF800000> : vector<64xf32>
    %13 = vector.multi_reduction <maximumf>, %12, %cst_9 [1] : vector<64x64xf32> to vector<64xf32>
    %14 = vector.shape_cast %13 : vector<64xf32> to vector<64x1xf32>
    %15 = vector.broadcast %14 : vector<64x1xf32> to vector<64x64xf32>
    %16 = arith.subf %12, %15 : vector<64x64xf32>
    %17 = math.exp %16 : vector<64x64xf32>
    %cst_10 = arith.constant dense<0.000000e+00> : vector<64xf32>
    %18 = vector.multi_reduction <add>, %17, %cst_10 [1] : vector<64x64xf32> to vector<64xf32>
    %19 = vector.shape_cast %18 : vector<64xf32> to vector<64x1xf32>
    %20 = arith.truncf %17 : vector<64x64xf32> to vector<64x64xbf16>
    %21 = vector.extract_strided_slice %9 {offsets = [0, 0], sizes = [64, 4], strides = [1, 1]} : vector<64x32xbf16> to vector<64x4xbf16>
    %cst_11 = arith.constant dense<0.000000e+00> : vector<64x4xf32>
    %22 = tpu.matmul %20, %21, %cst_11 {dimension_numbers = #tpu.dot_dimension_numbers<[1], [0], [0], [1], [0, 0, 1, 1], [], []>} : vector<64x64xbf16>, vector<64x4xbf16>, vector<64x4xf32> -> vector<64x4xf32>
    %23 = tpu.reciprocal %19 {approx = true} : vector<64x1xf32> -> vector<64x1xf32>
    %24 = vector.broadcast %23 : vector<64x1xf32> to vector<64x4xf32>
    %25 = arith.mulf %22, %24 : vector<64x4xf32>
    %26 = vector.extract_strided_slice %5 {offsets = [0, 4], sizes = [64, 4], strides = [1, 1]} : vector<64x32xbf16> to vector<64x4xbf16>
    %27 = vector.extract_strided_slice %7 {offsets = [0, 4], sizes = [64, 4], strides = [1, 1]} : vector<64x32xbf16> to vector<64x4xbf16>
    %cst_12 = arith.constant dense<0.000000e+00> : vector<64x64xf32>
    %28 = tpu.matmul %26, %27, %cst_12 {dimension_numbers = #tpu.dot_dimension_numbers<[1], [1], [0], [0], [0, 0, 1, 0], [], []>} : vector<64x4xbf16>, vector<64x4xbf16>, vector<64x64xf32> -> vector<64x64xf32>
    %cst_13 = arith.constant dense<0xFF800000> : vector<64xf32>
    %29 = vector.multi_reduction <maximumf>, %28, %cst_13 [1] : vector<64x64xf32> to vector<64xf32>
    %30 = vector.shape_cast %29 : vector<64xf32> to vector<64x1xf32>
    %31 = vector.broadcast %30 : vector<64x1xf32> to vector<64x64xf32>
    %32 = arith.subf %28, %31 : vector<64x64xf32>
    %33 = math.exp %32 : vector<64x64xf32>
    %cst_14 = arith.constant dense<0.000000e+00> : vector<64xf32>
    %34 = vector.multi_reduction <add>, %33, %cst_14 [1] : vector<64x64xf32> to vector<64xf32>
    %35 = vector.shape_cast %34 : vector<64xf32> to vector<64x1xf32>
    %36 = arith.truncf %33 : vector<64x64xf32> to vector<64x64xbf16>
    %37 = vector.extract_strided_slice %9 {offsets = [0, 4], sizes = [64, 4], strides = [1, 1]} : vector<64x32xbf16> to vector<64x4xbf16>
    %cst_15 = arith.constant dense<0.000000e+00> : vector<64x4xf32>
    %38 = tpu.matmul %36, %37, %cst_15 {dimension_numbers = #tpu.dot_dimension_numbers<[1], [0], [0], [1], [0, 0, 1, 1], [], []>} : vector<64x64xbf16>, vector<64x4xbf16>, vector<64x4xf32> -> vector<64x4xf32>
    %39 = tpu.reciprocal %35 {approx = true} : vector<64x1xf32> -> vector<64x1xf32>
    %40 = vector.broadcast %39 : vector<64x1xf32> to vector<64x4xf32>
    %41 = arith.mulf %38, %40 : vector<64x4xf32>
    %42 = vector.extract_strided_slice %5 {offsets = [0, 8], sizes = [64, 4], strides = [1, 1]} : vector<64x32xbf16> to vector<64x4xbf16>
    %43 = vector.extract_strided_slice %7 {offsets = [0, 8], sizes = [64, 4], strides = [1, 1]} : vector<64x32xbf16> to vector<64x4xbf16>
    %cst_16 = arith.constant dense<0.000000e+00> : vector<64x64xf32>
    %44 = tpu.matmul %42, %43, %cst_16 {dimension_numbers = #tpu.dot_dimension_numbers<[1], [1], [0], [0], [0, 0, 1, 0], [], []>} : vector<64x4xbf16>, vector<64x4xbf16>, vector<64x64xf32> -> vector<64x64xf32>
    %cst_17 = arith.constant dense<0xFF800000> : vector<64xf32>
    %45 = vector.multi_reduction <maximumf>, %44, %cst_17 [1] : vector<64x64xf32> to vector<64xf32>
    %46 = vector.shape_cast %45 : vector<64xf32> to vector<64x1xf32>
    %47 = vector.broadcast %46 : vector<64x1xf32> to vector<64x64xf32>
    %48 = arith.subf %44, %47 : vector<64x64xf32>
    %49 = math.exp %48 : vector<64x64xf32>
    %cst_18 = arith.constant dense<0.000000e+00> : vector<64xf32>
    %50 = vector.multi_reduction <add>, %49, %cst_18 [1] : vector<64x64xf32> to vector<64xf32>
    %51 = vector.shape_cast %50 : vector<64xf32> to vector<64x1xf32>
    %52 = arith.truncf %49 : vector<64x64xf32> to vector<64x64xbf16>
    %53 = vector.extract_strided_slice %9 {offsets = [0, 8], sizes = [64, 4], strides = [1, 1]} : vector<64x32xbf16> to vector<64x4xbf16>
    %cst_19 = arith.constant dense<0.000000e+00> : vector<64x4xf32>
    %54 = tpu.matmul %52, %53, %cst_19 {dimension_numbers = #tpu.dot_dimension_numbers<[1], [0], [0], [1], [0, 0, 1, 1], [], []>} : vector<64x64xbf16>, vector<64x4xbf16>, vector<64x4xf32> -> vector<64x4xf32>
    %55 = tpu.reciprocal %51 {approx = true} : vector<64x1xf32> -> vector<64x1xf32>
    %56 = vector.broadcast %55 : vector<64x1xf32> to vector<64x4xf32>
    %57 = arith.mulf %54, %56 : vector<64x4xf32>
    %58 = vector.extract_strided_slice %5 {offsets = [0, 12], sizes = [64, 4], strides = [1, 1]} : vector<64x32xbf16> to vector<64x4xbf16>
    %59 = vector.extract_strided_slice %7 {offsets = [0, 12], sizes = [64, 4], strides = [1, 1]} : vector<64x32xbf16> to vector<64x4xbf16>
    %cst_20 = arith.constant dense<0.000000e+00> : vector<64x64xf32>
    %60 = tpu.matmul %58, %59, %cst_20 {dimension_numbers = #tpu.dot_dimension_numbers<[1], [1], [0], [0], [0, 0, 1, 0], [], []>} : vector<64x4xbf16>, vector<64x4xbf16>, vector<64x64xf32> -> vector<64x64xf32>
    %cst_21 = arith.constant dense<0xFF800000> : vector<64xf32>
    %61 = vector.multi_reduction <maximumf>, %60, %cst_21 [1] : vector<64x64xf32> to vector<64xf32>
    %62 = vector.shape_cast %61 : vector<64xf32> to vector<64x1xf32>
    %63 = vector.broadcast %62 : vector<64x1xf32> to vector<64x64xf32>
    %64 = arith.subf %60, %63 : vector<64x64xf32>
    %65 = math.exp %64 : vector<64x64xf32>
    %cst_22 = arith.constant dense<0.000000e+00> : vector<64xf32>
    %66 = vector.multi_reduction <add>, %65, %cst_22 [1] : vector<64x64xf32> to vector<64xf32>
    %67 = vector.shape_cast %66 : vector<64xf32> to vector<64x1xf32>
    %68 = arith.truncf %65 : vector<64x64xf32> to vector<64x64xbf16>
    %69 = vector.extract_strided_slice %9 {offsets = [0, 12], sizes = [64, 4], strides = [1, 1]} : vector<64x32xbf16> to vector<64x4xbf16>
    %cst_23 = arith.constant dense<0.000000e+00> : vector<64x4xf32>
    %70 = tpu.matmul %68, %69, %cst_23 {dimension_numbers = #tpu.dot_dimension_numbers<[1], [0], [0], [1], [0, 0, 1, 1], [], []>} : vector<64x64xbf16>, vector<64x4xbf16>, vector<64x4xf32> -> vector<64x4xf32>
    %71 = tpu.reciprocal %67 {approx = true} : vector<64x1xf32> -> vector<64x1xf32>
    %72 = vector.broadcast %71 : vector<64x1xf32> to vector<64x4xf32>
    %73 = arith.mulf %70, %72 : vector<64x4xf32>
    %74 = vector.extract_strided_slice %5 {offsets = [0, 16], sizes = [64, 4], strides = [1, 1]} : vector<64x32xbf16> to vector<64x4xbf16>
    %75 = vector.extract_strided_slice %7 {offsets = [0, 16], sizes = [64, 4], strides = [1, 1]} : vector<64x32xbf16> to vector<64x4xbf16>
    %cst_24 = arith.constant dense<0.000000e+00> : vector<64x64xf32>
    %76 = tpu.matmul %74, %75, %cst_24 {dimension_numbers = #tpu.dot_dimension_numbers<[1], [1], [0], [0], [0, 0, 1, 0], [], []>} : vector<64x4xbf16>, vector<64x4xbf16>, vector<64x64xf32> -> vector<64x64xf32>
    %cst_25 = arith.constant dense<0xFF800000> : vector<64xf32>
    %77 = vector.multi_reduction <maximumf>, %76, %cst_25 [1] : vector<64x64xf32> to vector<64xf32>
    %78 = vector.shape_cast %77 : vector<64xf32> to vector<64x1xf32>
    %79 = vector.broadcast %78 : vector<64x1xf32> to vector<64x64xf32>
    %80 = arith.subf %76, %79 : vector<64x64xf32>
    %81 = math.exp %80 : vector<64x64xf32>
    %cst_26 = arith.constant dense<0.000000e+00> : vector<64xf32>
    %82 = vector.multi_reduction <add>, %81, %cst_26 [1] : vector<64x64xf32> to vector<64xf32>
    %83 = vector.shape_cast %82 : vector<64xf32> to vector<64x1xf32>
    %84 = arith.truncf %81 : vector<64x64xf32> to vector<64x64xbf16>
    %85 = vector.extract_strided_slice %9 {offsets = [0, 16], sizes = [64, 4], strides = [1, 1]} : vector<64x32xbf16> to vector<64x4xbf16>
    %cst_27 = arith.constant dense<0.000000e+00> : vector<64x4xf32>
    %86 = tpu.matmul %84, %85, %cst_27 {dimension_numbers = #tpu.dot_dimension_numbers<[1], [0], [0], [1], [0, 0, 1, 1], [], []>} : vector<64x64xbf16>, vector<64x4xbf16>, vector<64x4xf32> -> vector<64x4xf32>
    %87 = tpu.reciprocal %83 {approx = true} : vector<64x1xf32> -> vector<64x1xf32>
    %88 = vector.broadcast %87 : vector<64x1xf32> to vector<64x4xf32>
    %89 = arith.mulf %86, %88 : vector<64x4xf32>
    %90 = vector.extract_strided_slice %5 {offsets = [0, 20], sizes = [64, 4], strides = [1, 1]} : vector<64x32xbf16> to vector<64x4xbf16>
    %91 = vector.extract_strided_slice %7 {offsets = [0, 20], sizes = [64, 4], strides = [1, 1]} : vector<64x32xbf16> to vector<64x4xbf16>
    %cst_28 = arith.constant dense<0.000000e+00> : vector<64x64xf32>
    %92 = tpu.matmul %90, %91, %cst_28 {dimension_numbers = #tpu.dot_dimension_numbers<[1], [1], [0], [0], [0, 0, 1, 0], [], []>} : vector<64x4xbf16>, vector<64x4xbf16>, vector<64x64xf32> -> vector<64x64xf32>
    %cst_29 = arith.constant dense<0xFF800000> : vector<64xf32>
    %93 = vector.multi_reduction <maximumf>, %92, %cst_29 [1] : vector<64x64xf32> to vector<64xf32>
    %94 = vector.shape_cast %93 : vector<64xf32> to vector<64x1xf32>
    %95 = vector.broadcast %94 : vector<64x1xf32> to vector<64x64xf32>
    %96 = arith.subf %92, %95 : vector<64x64xf32>
    %97 = math.exp %96 : vector<64x64xf32>
    %cst_30 = arith.constant dense<0.000000e+00> : vector<64xf32>
    %98 = vector.multi_reduction <add>, %97, %cst_30 [1] : vector<64x64xf32> to vector<64xf32>
    %99 = vector.shape_cast %98 : vector<64xf32> to vector<64x1xf32>
    %100 = arith.truncf %97 : vector<64x64xf32> to vector<64x64xbf16>
    %101 = vector.extract_strided_slice %9 {offsets = [0, 20], sizes = [64, 4], strides = [1, 1]} : vector<64x32xbf16> to vector<64x4xbf16>
    %cst_31 = arith.constant dense<0.000000e+00> : vector<64x4xf32>
    %102 = tpu.matmul %100, %101, %cst_31 {dimension_numbers = #tpu.dot_dimension_numbers<[1], [0], [0], [1], [0, 0, 1, 1], [], []>} : vector<64x64xbf16>, vector<64x4xbf16>, vector<64x4xf32> -> vector<64x4xf32>
    %103 = tpu.reciprocal %99 {approx = true} : vector<64x1xf32> -> vector<64x1xf32>
    %104 = vector.broadcast %103 : vector<64x1xf32> to vector<64x4xf32>
    %105 = arith.mulf %102, %104 : vector<64x4xf32>
    %106 = vector.extract_strided_slice %5 {offsets = [0, 24], sizes = [64, 4], strides = [1, 1]} : vector<64x32xbf16> to vector<64x4xbf16>
    %107 = vector.extract_strided_slice %7 {offsets = [0, 24], sizes = [64, 4], strides = [1, 1]} : vector<64x32xbf16> to vector<64x4xbf16>
    %cst_32 = arith.constant dense<0.000000e+00> : vector<64x64xf32>
    %108 = tpu.matmul %106, %107, %cst_32 {dimension_numbers = #tpu.dot_dimension_numbers<[1], [1], [0], [0], [0, 0, 1, 0], [], []>} : vector<64x4xbf16>, vector<64x4xbf16>, vector<64x64xf32> -> vector<64x64xf32>
    %cst_33 = arith.constant dense<0xFF800000> : vector<64xf32>
    %109 = vector.multi_reduction <maximumf>, %108, %cst_33 [1] : vector<64x64xf32> to vector<64xf32>
    %110 = vector.shape_cast %109 : vector<64xf32> to vector<64x1xf32>
    %111 = vector.broadcast %110 : vector<64x1xf32> to vector<64x64xf32>
    %112 = arith.subf %108, %111 : vector<64x64xf32>
    %113 = math.exp %112 : vector<64x64xf32>
    %cst_34 = arith.constant dense<0.000000e+00> : vector<64xf32>
    %114 = vector.multi_reduction <add>, %113, %cst_34 [1] : vector<64x64xf32> to vector<64xf32>
    %115 = vector.shape_cast %114 : vector<64xf32> to vector<64x1xf32>
    %116 = arith.truncf %113 : vector<64x64xf32> to vector<64x64xbf16>
    %117 = vector.extract_strided_slice %9 {offsets = [0, 24], sizes = [64, 4], strides = [1, 1]} : vector<64x32xbf16> to vector<64x4xbf16>
    %cst_35 = arith.constant dense<0.000000e+00> : vector<64x4xf32>
    %118 = tpu.matmul %116, %117, %cst_35 {dimension_numbers = #tpu.dot_dimension_numbers<[1], [0], [0], [1], [0, 0, 1, 1], [], []>} : vector<64x64xbf16>, vector<64x4xbf16>, vector<64x4xf32> -> vector<64x4xf32>
    %119 = tpu.reciprocal %115 {approx = true} : vector<64x1xf32> -> vector<64x1xf32>
    %120 = vector.broadcast %119 : vector<64x1xf32> to vector<64x4xf32>
    %121 = arith.mulf %118, %120 : vector<64x4xf32>
    %122 = vector.extract_strided_slice %5 {offsets = [0, 28], sizes = [64, 4], strides = [1, 1]} : vector<64x32xbf16> to vector<64x4xbf16>
    %123 = vector.extract_strided_slice %7 {offsets = [0, 28], sizes = [64, 4], strides = [1, 1]} : vector<64x32xbf16> to vector<64x4xbf16>
    %cst_36 = arith.constant dense<0.000000e+00> : vector<64x64xf32>
    %124 = tpu.matmul %122, %123, %cst_36 {dimension_numbers = #tpu.dot_dimension_numbers<[1], [1], [0], [0], [0, 0, 1, 0], [], []>} : vector<64x4xbf16>, vector<64x4xbf16>, vector<64x64xf32> -> vector<64x64xf32>
    %cst_37 = arith.constant dense<0xFF800000> : vector<64xf32>
    %125 = vector.multi_reduction <maximumf>, %124, %cst_37 [1] : vector<64x64xf32> to vector<64xf32>
    %126 = vector.shape_cast %125 : vector<64xf32> to vector<64x1xf32>
    %127 = vector.broadcast %126 : vector<64x1xf32> to vector<64x64xf32>
    %128 = arith.subf %124, %127 : vector<64x64xf32>
    %129 = math.exp %128 : vector<64x64xf32>
    %cst_38 = arith.constant dense<0.000000e+00> : vector<64xf32>
    %130 = vector.multi_reduction <add>, %129, %cst_38 [1] : vector<64x64xf32> to vector<64xf32>
    %131 = vector.shape_cast %130 : vector<64xf32> to vector<64x1xf32>
    %132 = arith.truncf %129 : vector<64x64xf32> to vector<64x64xbf16>
    %133 = vector.extract_strided_slice %9 {offsets = [0, 28], sizes = [64, 4], strides = [1, 1]} : vector<64x32xbf16> to vector<64x4xbf16>
    %cst_39 = arith.constant dense<0.000000e+00> : vector<64x4xf32>
    %134 = tpu.matmul %132, %133, %cst_39 {dimension_numbers = #tpu.dot_dimension_numbers<[1], [0], [0], [1], [0, 0, 1, 1], [], []>} : vector<64x64xbf16>, vector<64x4xbf16>, vector<64x4xf32> -> vector<64x4xf32>
    %135 = tpu.reciprocal %131 {approx = true} : vector<64x1xf32> -> vector<64x1xf32>
    %136 = vector.broadcast %135 : vector<64x1xf32> to vector<64x4xf32>
    %137 = arith.mulf %134, %136 : vector<64x4xf32>
    %138 = tpu.concatenate %25, %41, %57, %73, %89, %105, %121, %137 in 1 : vector<64x4xf32>, vector<64x4xf32>, vector<64x4xf32>, vector<64x4xf32>, vector<64x4xf32>, vector<64x4xf32>, vector<64x4xf32>, vector<64x4xf32> -> vector<64x32xf32>
    %139 = arith.truncf %138 : vector<64x32xf32> to vector<64x32xbf16>
    %c0_40 = arith.constant 0 : index
    %c0_41 = arith.constant 0 : index
    %c0_42 = arith.constant 0 : index
    %140 = vector.load %arg6[%c0_40, %c0_41, %c0_42] : memref<1x64x32xbf16, #tpu.memory_space<vmem>>, vector<1x64x32xbf16>
    %141 = vector.shape_cast %140 : vector<1x64x32xbf16> to vector<64x32xbf16>
    %142 = vector.shape_cast %139 : vector<64x32xbf16> to vector<1x64x32xbf16>
    tpu.vector_store %arg6[%c0_40, %c0_41, %c0_42], %142 {strides = array<i32>} : memref<1x64x32xbf16, #tpu.memory_space<vmem>>, vector<1x64x32xbf16>,
    return
  }
  func.func @transform_0(%arg0: i32, %arg1: i32, %arg2: i32) -> (i32, i32, i32) {
    %c0_i32 = arith.constant 0 : i32
    return %arg0, %arg2, %arg1 : i32, i32, i32
  }
  func.func @transform_1(%arg0: i32, %arg1: i32, %arg2: i32) -> (i32, i32, i32) {
    %c0_i32 = arith.constant 0 : i32
    %c0_i32_0 = arith.constant 0 : i32
    return %arg0, %c0_i32, %arg1 : i32, i32, i32
  }
  func.func @transform_2(%arg0: i32, %arg1: i32, %arg2: i32) -> (i32, i32, i32) {
    %c0_i32 = arith.constant 0 : i32
    %c0_i32_0 = arith.constant 0 : i32
    return %arg0, %c0_i32, %arg1 : i32, i32, i32
  }
  func.func @transform_3(%arg0: i32, %arg1: i32, %arg2: i32) -> (i32, i32, i32) {
    %c0_i32 = arith.constant 0 : i32
    return %arg0, %arg2, %arg1 : i32, i32, i32
  }
}

</mosaic_0001>

<bundles_post_ra>
// kernel: attention_forward.9
= control target key start
LH: loop header
LB: loop body
LE: loop exit
PB: predicated region body
PF: predicated region fallthrough
CT: control target
= control target key end

     0   :  { %vm19_vm0 = vcmask 261120   ;;  %v335_v3 = vmov 0.0   ;;  %s517_s1 = inlined_call_operand.vmem [shape: f32[32,32], index: 1, kind: input, shape index: {}]   ;;  %s518_s0 = inlined_call_operand.vmem [shape: bf16[128,32], index: 0, kind: input, shape index: {}]   ;;  %s519_s2 = inlined_call_operand.vmem [shape: f32[1,32], index: 2, kind: input, shape index: {}]   ;;  %s520_s3 = inlined_call_operand.vmem [shape: f32[128,32], index: 3, kind: output, shape index: {}]  }
   0x1   :  { %v70_v0 = vld [vmem:[%s517_s1 + $0x10] sm:$0xff]  ;;  %v71_v1 = vld [vmem:[%s517_s1 + $0x18] sm:$0xff]  ;;  %v68_v2 = vld [vmem:[%s517_s1] sm:$0xff]  ;;  %20 = vst.msk [vmem:[#allocation2] sm:$0xff] %vm19_vm0, %v335_v3 }
   0x2   :  { %v73_v4 = vpack.c.bf16 %v71_v1, %v70_v0  ;;  %v69_v5 = vld [vmem:[%s517_s1 + $0x8] sm:$0xff]  ;;  %21 = vst.msk [vmem:[#allocation2 + $0x8] sm:$0xff] %vm19_vm0, %v335_v3  ;;  %v319_v7 = vld [vmem:[%s518_s0] sm:$0xff]  ;;  %v321_v8 = vld [vmem:[%s518_s0 + $0x10] sm:$0xff] }
   0x3   :  { %22 = vst.msk [vmem:[#allocation2 + $0x10] sm:$0xff] %vm19_vm0, %v335_v3  ;;  %v72_v6 = vpack.c.bf16 %v69_v5, %v68_v2  ;;  %v323_v9 = vld [vmem:[%s518_s0 + $0x20] sm:$0xff]  ;;  %v325_v10 = vld [vmem:[%s518_s0 + $0x30] sm:$0xff]  ;;  %v320_v11 = vld [vmem:[%s518_s0 + $0x8] sm:$0xff] }
   0x4   :  { %145 = vmatpush.bf16.msra.mxu0 %v73_v4  ;;  %327 = vmatpush.bf16.msra.mxu1 %v73_v4  ;;  %23 = vst.msk [vmem:[#allocation2 + $0x18] sm:$0xff] %vm19_vm0, %v335_v3  ;;  %v322_v12 = vld [vmem:[%s518_s0 + $0x18] sm:$0xff]  ;;  %v324_v13 = vld [vmem:[%s518_s0 + $0x28] sm:$0xff]  ;;  %v421_v24 = vld [vmem:[%s519_s2] ss:$0 sm:$0xff] }
   0x5   :  { %328 = vmatpush.bf16.msra.mxu2 %v73_v4  ;;  %329 = vmatpush.bf16.msra.mxu3 %v73_v4  ;;  %24 = vst.msk [vmem:[#allocation2 + $0x20] sm:$0xff] %vm19_vm0, %v335_v3  ;;  %v326_v14 = vld [vmem:[%s518_s0 + $0x38] sm:$0xff] }
   0x6   :  { %25 = vst.msk [vmem:[#allocation2 + $0x28] sm:$0xff] %vm19_vm0, %v335_v3 }
   0x7   :  { %26 = vst.msk [vmem:[#allocation2 + $0x30] sm:$0xff] %vm19_vm0, %v335_v3 }
   0x8   :  { %146 = vmatpush.bf16.msra.mxu0 %v72_v6  ;;  %330 = vmatpush.bf16.msra.mxu1 %v72_v6  ;;  %27 = vst.msk [vmem:[#allocation2 + $0x38] sm:$0xff] %vm19_vm0, %v335_v3  ;;  %v36_v15 = vld [vmem:[#allocation2] sm:$0xff] }
   0x9   :  { %331 = vmatpush.bf16.msra.mxu2 %v72_v6  ;;  %332 = vmatpush.bf16.msra.mxu3 %v72_v6  ;;  %28 = vst.msk [vmem:[#allocation2 + $0x40] sm:$0xff] %vm19_vm0, %v335_v3  ;;  %v37_v23 = vld [vmem:[#allocation2 + $0x8] sm:$0xff] }
   0xa   :  { %29 = vst.msk [vmem:[#allocation2 + $0x48] sm:$0xff] %vm19_vm0, %v335_v3  ;;  %v38_v44 = vld [vmem:[#allocation2 + $0x10] sm:$0xff] }
   0xb   :  { %311 = vmatmul.msk.bf16.vlgmr.msra.gmra.mxu0 %vm19_vm0, %v319_v7  ;;  %313 = vmatmul.msk.bf16.vlgmr.msra.gmra.mxu1 %vm19_vm0, %v321_v8  ;;  %30 = vst.msk [vmem:[#allocation2 + $0x50] sm:$0xff] %vm19_vm0, %v335_v3  ;;  %v39_v62 = vld [vmem:[#allocation2 + $0x18] sm:$0xff] }
   0xc   :  { %315 = vmatmul.msk.bf16.vlgmr.msra.gmra.mxu2 %vm19_vm0, %v323_v9  ;;  %317 = vmatmul.msk.bf16.vlgmr.msra.gmra.mxu3 %vm19_vm0, %v325_v10  ;;  %31 = vst.msk [vmem:[#allocation2 + $0x58] sm:$0xff] %vm19_vm0, %v335_v3  ;;  %v40_v16 = vld [vmem:[#allocation2 + $0x20] sm:$0xff] }
   0xd   :  { %32 = vst.msk [vmem:[#allocation2 + $0x60] sm:$0xff] %vm19_vm0, %v335_v3  ;;  %v41_v30 = vld [vmem:[#allocation2 + $0x28] sm:$0xff] }
   0xe   :  { %33 = vst.msk [vmem:[#allocation2 + $0x68] sm:$0xff] %vm19_vm0, %v335_v3  ;;  %v42_v48 = vld [vmem:[#allocation2 + $0x30] sm:$0xff] }
   0xf   :  { %34 = vst.msk [vmem:[#allocation2 + $0x70] sm:$0xff] %vm19_vm0, %v335_v3  ;;  %v43_v2 = vld [vmem:[#allocation2 + $0x38] sm:$0xff] }
  0x10   :  { %35 = vst.msk [vmem:[#allocation2 + $0x78] sm:$0xff] %vm19_vm0, %v335_v3  ;;  %v44_v21 = vld [vmem:[#allocation2 + $0x40] sm:$0xff] }
  0x11   :  { %v45_v38 = vld [vmem:[#allocation2 + $0x48] sm:$0xff] }
  0x12   :  { %v46_v56 = vld [vmem:[#allocation2 + $0x50] sm:$0xff] }
  0x13   :  { %v47_v10 = vld [vmem:[#allocation2 + $0x58] sm:$0xff] }
  0x14   :  { %v48_v22 = vld [vmem:[#allocation2 + $0x60] sm:$0xff] }
  0x15   :  { %v49_v39 = vld [vmem:[#allocation2 + $0x68] sm:$0xff] }
  0x16   :  { %v50_v57 = vld [vmem:[#allocation2 + $0x70] sm:$0xff] }
  0x1b   :  { %312 = vmatmul.msk.bf16.gmra.mxu0 %vm19_vm0, %v320_v11  ;;  %314 = vmatmul.msk.bf16.gmra.mxu1 %vm19_vm0, %v322_v12 }
  0x1c   :  { %316 = vmatmul.msk.bf16.gmra.mxu2 %vm19_vm0, %v324_v13  ;;  %318 = vmatmul.msk.bf16.gmra.mxu3 %vm19_vm0, %v326_v14 }
  0x88   :  { %v148_v17 = vpop.f32.mrf.mxu0  ;;  %v158_v18 = vpop.f32.mrf.mxu1 }
  0x89   :  { %v188_v19 = vadd.f32 %v148_v17, %v36_v15  ;;  %v192_v20 = vadd.f32 %v158_v18, %v40_v16  ;;  %v51_v15 = vld [vmem:[#allocation2 + $0x78] sm:$0xff] }
  0x8b   :  { %204 = vst.msk [vmem:[#allocation2] sm:$0xff] %vm19_vm0, %v188_v19 }
  0x8c   :  { %208 = vst.msk [vmem:[#allocation2 + $0x20] sm:$0xff] %vm19_vm0, %v192_v20 }
  0x8f   :  { %v168_v25 = vpop.f32.mrf.mxu2  ;;  %v178_v26 = vpop.f32.mrf.mxu3 }
  0x90   :  { %v196_v27 = vadd.f32 %v168_v25, %v44_v21  ;;  %v200_v28 = vadd.f32 %v178_v26, %v48_v22  ;;  %v150_v29 = vpop.f32.mrf.mxu0  ;;  %v160_v31 = vpop.f32.mrf.mxu1 }
  0x91   :  { %v189_v32 = vadd.f32 %v150_v29, %v37_v23  ;;  %v193_v36 = vadd.f32 %v160_v31, %v41_v30 }
  0x92   :  { %v223_v33 = vld [vmem:[#allocation2] sm:$0xff]  ;;  %212 = vst.msk [vmem:[#allocation2 + $0x40] sm:$0xff] %vm19_vm0, %v196_v27 }
  0x93   :  { %v243_v34 = vadd.f32 %v421_v24, %v223_v33  ;;  %v227_v35 = vld [vmem:[#allocation2 + $0x20] sm:$0xff]  ;;  %216 = vst.msk [vmem:[#allocation2 + $0x60] sm:$0xff] %vm19_vm0, %v200_v28 }
  0x94   :  { %v247_v37 = vadd.f32 %v421_v24, %v227_v35  ;;  %205 = vst.msk [vmem:[#allocation2 + $0x8] sm:$0xff] %vm19_vm0, %v189_v32 }
  0x95   :  { %259 = vst.msk [vmem:[%s520_s3] sm:$0xff] %vm19_vm0, %v243_v34 }
  0x96   :  { %263 = vst.msk [vmem:[%s520_s3 + $0x20] sm:$0xff] %vm19_vm0, %v247_v37 }
  0x97   :  { %209 = vst.msk [vmem:[#allocation2 + $0x28] sm:$0xff] %vm19_vm0, %v193_v36  ;;  %v170_v40 = vpop.f32.mrf.mxu2  ;;  %v180_v41 = vpop.f32.mrf.mxu3 }
  0x98   :  { %v197_v42 = vadd.f32 %v170_v40, %v45_v38  ;;  %v201_v43 = vadd.f32 %v180_v41, %v49_v39  ;;  %v153_v45 = vpop.f32.mrf.mxu0  ;;  %v163_v46 = vpop.f32.mrf.mxu1 }
  0x99   :  { %v231_v47 = vld [vmem:[#allocation2 + $0x40] sm:$0xff]  ;;  %v190_v53 = vadd.f32 %v153_v45, %v38_v44  ;;  %v194_v55 = vadd.f32 %v163_v46, %v42_v48 }
  0x9a   :  { %v251_v49 = vadd.f32 %v421_v24, %v231_v47  ;;  %v235_v50 = vld [vmem:[#allocation2 + $0x60] sm:$0xff]  ;;  %213 = vst.msk [vmem:[#allocation2 + $0x48] sm:$0xff] %vm19_vm0, %v197_v42 }
  0x9b   :  { %v255_v51 = vadd.f32 %v421_v24, %v235_v50  ;;  %v224_v52 = vld [vmem:[#allocation2 + $0x8] sm:$0xff]  ;;  %217 = vst.msk [vmem:[#allocation2 + $0x68] sm:$0xff] %vm19_vm0, %v201_v43 }
  0x9c   :  { %267 = vst.msk [vmem:[%s520_s3 + $0x40] sm:$0xff] %vm19_vm0, %v251_v49  ;;  %v244_v54 = vadd.f32 %v421_v24, %v224_v52 }
  0x9d   :  { %271 = vst.msk [vmem:[%s520_s3 + $0x60] sm:$0xff] %vm19_vm0, %v255_v51 }
  0x9e   :  { %260 = vst.msk [vmem:[%s520_s3 + $0x8] sm:$0xff] %vm19_vm0, %v244_v54  ;;  %v228_v58 = vld [vmem:[#allocation2 + $0x28] sm:$0xff] }
  0x9f   :  { %v248_v59 = vadd.f32 %v421_v24, %v228_v58  ;;  %206 = vst.msk [vmem:[#allocation2 + $0x10] sm:$0xff] %vm19_vm0, %v190_v53  ;;  %v173_v60 = vpop.f32.mrf.mxu2  ;;  %v183_v61 = vpop.f32.mrf.mxu3 }
  0xa0   :  { %210 = vst.msk [vmem:[#allocation2 + $0x30] sm:$0xff] %vm19_vm0, %v194_v55  ;;  %v198_v63 = vadd.f32 %v173_v60, %v46_v56  ;;  %v202_v0 = vadd.f32 %v183_v61, %v50_v57  ;;  %v155_v1 = vpop.f32.mrf.mxu0  ;;  %v165_v3 = vpop.f32.mrf.mxu1 }
  0xa1   :  { %264 = vst.msk [vmem:[%s520_s3 + $0x28] sm:$0xff] %vm19_vm0, %v248_v59  ;;  %v232_v4 = vld [vmem:[#allocation2 + $0x48] sm:$0xff]  ;;  %v191_v7 = vadd.f32 %v155_v1, %v39_v62  ;;  %v195_v9 = vadd.f32 %v165_v3, %v43_v2 }
  0xa2   :  { %v252_v5 = vadd.f32 %v421_v24, %v232_v4  ;;  %v236_v6 = vld [vmem:[#allocation2 + $0x68] sm:$0xff]  ;;  %214 = vst.msk [vmem:[#allocation2 + $0x50] sm:$0xff] %vm19_vm0, %v198_v63 }
  0xa3   :  { %v256_v8 = vadd.f32 %v421_v24, %v236_v6  ;;  %218 = vst.msk [vmem:[#allocation2 + $0x70] sm:$0xff] %vm19_vm0, %v202_v0 }
  0xa4   :  { %268 = vst.msk [vmem:[%s520_s3 + $0x48] sm:$0xff] %vm19_vm0, %v252_v5 }
  0xa5   :  { %272 = vst.msk [vmem:[%s520_s3 + $0x68] sm:$0xff] %vm19_vm0, %v256_v8 }
  0xa6   :  { %v225_v11 = vld [vmem:[#allocation2 + $0x10] sm:$0xff]  ;;  %207 = vst.msk [vmem:[#allocation2 + $0x18] sm:$0xff] %vm19_vm0, %v191_v7 }
  0xa7   :  { %v245_v12 = vadd.f32 %v421_v24, %v225_v11  ;;  %v229_v13 = vld [vmem:[#allocation2 + $0x30] sm:$0xff]  ;;  %211 = vst.msk [vmem:[#allocation2 + $0x38] sm:$0xff] %vm19_vm0, %v195_v9  ;;  %v175_v14 = vpop.f32.mrf.mxu2  ;;  %v185_v16 = vpop.f32.mrf.mxu3 }
  0xa8   :  { %v249_v17 = vadd.f32 %v421_v24, %v229_v13  ;;  %v199_v18 = vadd.f32 %v175_v14, %v47_v10  ;;  %v203_v22 = vadd.f32 %v185_v16, %v51_v15 }
  0xa9   :  { %261 = vst.msk [vmem:[%s520_s3 + $0x10] sm:$0xff] %vm19_vm0, %v245_v12  ;;  %v233_v19 = vld [vmem:[#allocation2 + $0x50] sm:$0xff] }
  0xaa   :  { %265 = vst.msk [vmem:[%s520_s3 + $0x30] sm:$0xff] %vm19_vm0, %v249_v17  ;;  %v253_v20 = vadd.f32 %v421_v24, %v233_v19  ;;  %v237_v21 = vld [vmem:[#allocation2 + $0x70] sm:$0xff] }
  0xab   :  { %v257_v23 = vadd.f32 %v421_v24, %v237_v21  ;;  %215 = vst.msk [vmem:[#allocation2 + $0x58] sm:$0xff] %vm19_vm0, %v199_v18 }
  0xac   :  { %269 = vst.msk [vmem:[%s520_s3 + $0x50] sm:$0xff] %vm19_vm0, %v253_v20 }
  0xad   :  { %273 = vst.msk [vmem:[%s520_s3 + $0x70] sm:$0xff] %vm19_vm0, %v257_v23  ;;  %v226_v25 = vld [vmem:[#allocation2 + $0x18] sm:$0xff] }
  0xae   :  { %v246_v26 = vadd.f32 %v421_v24, %v226_v25  ;;  %v230_v27 = vld [vmem:[#allocation2 + $0x38] sm:$0xff]  ;;  %219 = vst.msk [vmem:[#allocation2 + $0x78] sm:$0xff] %vm19_vm0, %v203_v22 }
  0xaf   :  { %v250_v28 = vadd.f32 %v421_v24, %v230_v27 }
  0xb0   :  { %262 = vst.msk [vmem:[%s520_s3 + $0x18] sm:$0xff] %vm19_vm0, %v246_v26 }
  0xb1   :  { %266 = vst.msk [vmem:[%s520_s3 + $0x38] sm:$0xff] %vm19_vm0, %v250_v28 }
  0xb2   :  { %v234_v29 = vld [vmem:[#allocation2 + $0x58] sm:$0xff] }
  0xb3   :  { %v254_v30 = vadd.f32 %v421_v24, %v234_v29 }
  0xb5   :  { %270 = vst.msk [vmem:[%s520_s3 + $0x58] sm:$0xff] %vm19_vm0, %v254_v30  ;;  %v238_v31 = vld [vmem:[#allocation2 + $0x78] sm:$0xff] }
  0xb6   :  { %v258_v32 = vadd.f32 %v421_v24, %v238_v31 }
  0xb8   :  { %274 = vst.msk [vmem:[%s520_s3 + $0x78] sm:$0xff] %vm19_vm0, %v258_v32 }

// kernel: attention_forward.7
= control target key start
LH: loop header
LB: loop body
LE: loop exit
PB: predicated region body
PF: predicated region fallthrough
CT: control target
= control target key end

     0   :  { %vm19_vm0 = vcmask 261120   ;;  %v280_v3 = vmov 0.0   ;;  %vm243_vm1 = vcmask 257024   ;;  %s486_s1 = inlined_call_operand.vmem [shape: f32[32,32], index: 1, kind: input, shape index: {}]   ;;  %s487_s0 = inlined_call_operand.vmem [shape: f32[128,32], index: 0, kind: input, shape index: {}]   ;;  %s488_s2 = inlined_call_operand.vmem [shape: f32[1,32], index: 2, kind: input, shape index: {}]   ;;  %s489_s3 = inlined_call_operand.vmem [shape: bf16[128,32], index: 3, kind: output, shape index: {}]  }
   0x1   :  { %v78_v0 = vld [vmem:[%s486_s1 + $0x10] sm:$0xff]  ;;  %v79_v1 = vld [vmem:[%s486_s1 + $0x18] sm:$0xff]  ;;  %v76_v2 = vld [vmem:[%s486_s1] sm:$0xff]  ;;  %20 = vst.msk [vmem:[#allocation2] sm:$0xff] %vm19_vm0, %v280_v3 }
   0x2   :  { %v81_v4 = vpack.c.bf16 %v79_v1, %v78_v0  ;;  %v77_v5 = vld [vmem:[%s486_s1 + $0x8] sm:$0xff]  ;;  %21 = vst.msk [vmem:[#allocation2 + $0x8] sm:$0xff] %vm19_vm0, %v280_v3  ;;  %v52_v6 = vld [vmem:[%s487_s0] sm:$0xff]  ;;  %v54_v19 = vld [vmem:[%s487_s0 + $0x10] sm:$0xff] }
   0x3   :  { %v53_v7 = vld [vmem:[%s487_s0 + $0x8] sm:$0xff]  ;;  %22 = vst.msk [vmem:[#allocation2 + $0x10] sm:$0xff] %vm19_vm0, %v280_v3  ;;  %v80_v8 = vpack.c.bf16 %v77_v5, %v76_v2  ;;  %v56_v9 = vld [vmem:[%s487_s0 + $0x20] sm:$0xff]  ;;  %v55_v20 = vld [vmem:[%s487_s0 + $0x18] sm:$0xff] }
   0x4   :  { %113 = vmatpush.bf16.msra.mxu0 %v81_v4  ;;  %272 = vmatpush.bf16.msra.mxu1 %v81_v4  ;;  %v57_v10 = vld [vmem:[%s487_s0 + $0x28] sm:$0xff]  ;;  %v60_v11 = vld [vmem:[%s487_s0 + $0x40] sm:$0xff]  ;;  %23 = vst.msk [vmem:[#allocation2 + $0x18] sm:$0xff] %vm19_vm0, %v280_v3  ;;  %v68_v15 = vpack.c.bf16 %v53_v7, %v52_v6  ;;  %v58_v21 = vld [vmem:[%s487_s0 + $0x30] sm:$0xff]  ;;  %v69_v27 = vpack.c.bf16 %v55_v20, %v54_v19 }
   0x5   :  { %273 = vmatpush.bf16.msra.mxu2 %v81_v4  ;;  %274 = vmatpush.bf16.msra.mxu3 %v81_v4  ;;  %v61_v12 = vld [vmem:[%s487_s0 + $0x48] sm:$0xff]  ;;  %v64_v13 = vld [vmem:[%s487_s0 + $0x60] sm:$0xff]  ;;  %24 = vst.msk [vmem:[#allocation2 + $0x20] sm:$0xff] %vm19_vm0, %v280_v3  ;;  %v70_v16 = vpack.c.bf16 %v57_v10, %v56_v9  ;;  %v59_v22 = vld [vmem:[%s487_s0 + $0x38] sm:$0xff] }
   0x6   :  { %v65_v14 = vld [vmem:[%s487_s0 + $0x68] sm:$0xff]  ;;  %25 = vst.msk [vmem:[#allocation2 + $0x28] sm:$0xff] %vm19_vm0, %v280_v3  ;;  %v72_v17 = vpack.c.bf16 %v61_v12, %v60_v11  ;;  %v62_v23 = vld [vmem:[%s487_s0 + $0x50] sm:$0xff]  ;;  %v63_v24 = vld [vmem:[%s487_s0 + $0x58] sm:$0xff]  ;;  %v71_v28 = vpack.c.bf16 %v59_v22, %v58_v21 }
   0x7   :  { %26 = vst.msk [vmem:[#allocation2 + $0x30] sm:$0xff] %vm19_vm0, %v280_v3  ;;  %v74_v18 = vpack.c.bf16 %v65_v14, %v64_v13  ;;  %v66_v25 = vld [vmem:[%s487_s0 + $0x70] sm:$0xff]  ;;  %v67_v26 = vld [vmem:[%s487_s0 + $0x78] sm:$0xff]  ;;  %v73_v29 = vpack.c.bf16 %v63_v24, %v62_v23  ;;  %v390_v41 = vld [vmem:[%s488_s2] ss:$0 sm:$0xff] }
   0x8   :  { %114 = vmatpush.bf16.msra.mxu0 %v80_v8  ;;  %275 = vmatpush.bf16.msra.mxu1 %v80_v8  ;;  %27 = vst.msk [vmem:[#allocation2 + $0x38] sm:$0xff] %vm19_vm0, %v280_v3  ;;  %v75_v30 = vpack.c.bf16 %v67_v26, %v66_v25  ;;  %v36_v31 = vld [vmem:[#allocation2] sm:$0xff] }
   0x9   :  { %276 = vmatpush.bf16.msra.mxu2 %v80_v8  ;;  %277 = vmatpush.bf16.msra.mxu3 %v80_v8  ;;  %28 = vst.msk [vmem:[#allocation2 + $0x40] sm:$0xff] %vm19_vm0, %v280_v3  ;;  %v37_v39 = vld [vmem:[#allocation2 + $0x8] sm:$0xff] }
   0xa   :  { %29 = vst.msk [vmem:[#allocation2 + $0x48] sm:$0xff] %vm19_vm0, %v280_v3  ;;  %v38_v58 = vld [vmem:[#allocation2 + $0x10] sm:$0xff] }
   0xb   :  { %264 = vmatmul.msk.bf16.vlgmr.msra.gmra.mxu0 %vm19_vm0, %v68_v15  ;;  %266 = vmatmul.msk.bf16.vlgmr.msra.gmra.mxu1 %vm19_vm0, %v70_v16  ;;  %30 = vst.msk [vmem:[#allocation2 + $0x50] sm:$0xff] %vm19_vm0, %v280_v3 }
   0xc   :  { %268 = vmatmul.msk.bf16.vlgmr.msra.gmra.mxu2 %vm19_vm0, %v72_v17  ;;  %270 = vmatmul.msk.bf16.vlgmr.msra.gmra.mxu3 %vm19_vm0, %v74_v18  ;;  %31 = vst.msk [vmem:[#allocation2 + $0x58] sm:$0xff] %vm19_vm0, %v280_v3  ;;  %v40_v32 = vld [vmem:[#allocation2 + $0x20] sm:$0xff]  ;;  %v39_v17 = vld [vmem:[#allocation2 + $0x18] sm:$0xff] }
   0xd   :  { %32 = vst.msk [vmem:[#allocation2 + $0x60] sm:$0xff] %vm19_vm0, %v280_v3  ;;  %v41_v40 = vld [vmem:[#allocation2 + $0x28] sm:$0xff] }
   0xe   :  { %33 = vst.msk [vmem:[#allocation2 + $0x68] sm:$0xff] %vm19_vm0, %v280_v3  ;;  %v42_v59 = vld [vmem:[#allocation2 + $0x30] sm:$0xff] }
   0xf   :  { %34 = vst.msk [vmem:[#allocation2 + $0x70] sm:$0xff] %vm19_vm0, %v280_v3  ;;  %v43_v18 = vld [vmem:[#allocation2 + $0x38] sm:$0xff] }
  0x10   :  { %35 = vst.msk [vmem:[#allocation2 + $0x78] sm:$0xff] %vm19_vm0, %v280_v3  ;;  %v44_v37 = vld [vmem:[#allocation2 + $0x40] sm:$0xff] }
  0x11   :  { %v45_v55 = vld [vmem:[#allocation2 + $0x48] sm:$0xff] }
  0x12   :  { %v46_v14 = vld [vmem:[#allocation2 + $0x50] sm:$0xff] }
  0x14   :  { %v48_v38 = vld [vmem:[#allocation2 + $0x60] sm:$0xff] }
  0x15   :  { %v49_v56 = vld [vmem:[#allocation2 + $0x68] sm:$0xff] }
  0x16   :  { %v50_v15 = vld [vmem:[#allocation2 + $0x70] sm:$0xff] }
  0x1b   :  { %265 = vmatmul.msk.bf16.gmra.mxu0 %vm19_vm0, %v69_v27  ;;  %267 = vmatmul.msk.bf16.gmra.mxu1 %vm19_vm0, %v71_v28 }
  0x1c   :  { %269 = vmatmul.msk.bf16.gmra.mxu2 %vm19_vm0, %v73_v29  ;;  %271 = vmatmul.msk.bf16.gmra.mxu3 %vm19_vm0, %v75_v30 }
  0x88   :  { %v116_v33 = vpop.f32.mrf.mxu0  ;;  %v126_v34 = vpop.f32.mrf.mxu1 }
  0x89   :  { %v156_v35 = vadd.f32 %v116_v33, %v36_v31  ;;  %v160_v36 = vadd.f32 %v126_v34, %v40_v32 }
  0x8b   :  { %172 = vst.msk [vmem:[#allocation2] sm:$0xff] %vm19_vm0, %v156_v35 }
  0x8c   :  { %176 = vst.msk [vmem:[#allocation2 + $0x20] sm:$0xff] %vm19_vm0, %v160_v36 }
  0x8f   :  { %v136_v42 = vpop.f32.mrf.mxu2  ;;  %v146_v43 = vpop.f32.mrf.mxu3 }
  0x90   :  { %v164_v44 = vadd.f32 %v136_v42, %v44_v37  ;;  %v168_v45 = vadd.f32 %v146_v43, %v48_v38  ;;  %v118_v46 = vpop.f32.mrf.mxu0  ;;  %v128_v47 = vpop.f32.mrf.mxu1  ;;  %v47_v38 = vld [vmem:[#allocation2 + $0x58] sm:$0xff] }
  0x91   :  { %v157_v48 = vadd.f32 %v118_v46, %v37_v39  ;;  %v161_v49 = vadd.f32 %v128_v47, %v41_v40  ;;  %v51_v39 = vld [vmem:[#allocation2 + $0x78] sm:$0xff] }
  0x92   :  { %v191_v50 = vld [vmem:[#allocation2] sm:$0xff]  ;;  %180 = vst.msk [vmem:[#allocation2 + $0x40] sm:$0xff] %vm19_vm0, %v164_v44 }
  0x93   :  { %v211_v51 = vadd.f32 %v390_v41, %v191_v50  ;;  %v195_v52 = vld [vmem:[#allocation2 + $0x20] sm:$0xff]  ;;  %184 = vst.msk [vmem:[#allocation2 + $0x60] sm:$0xff] %vm19_vm0, %v168_v45 }
  0x94   :  { %v215_v53 = vadd.f32 %v390_v41, %v195_v52  ;;  %173 = vst.msk [vmem:[#allocation2 + $0x8] sm:$0xff] %vm19_vm0, %v157_v48 }
  0x95   :  { %v227_v54 = vpack.c.bf16 %v211_v51, %v211_v51  ;;  %177 = vst.msk [vmem:[#allocation2 + $0x28] sm:$0xff] %vm19_vm0, %v161_v49 }
  0x96   :  { %v231_v57 = vpack.c.bf16 %v215_v53, %v215_v53 }
  0x97   :  { %244 = vst.msk [vmem:[%s489_s3] sm:$0xf] %vm243_vm1, %v227_v54  ;;  %v138_v60 = vpop.f32.mrf.mxu2  ;;  %v148_v61 = vpop.f32.mrf.mxu3 }
  0x98   :  { %248 = vst.msk [vmem:[%s489_s3 + $0x10] sm:$0xf] %vm243_vm1, %v231_v57  ;;  %v165_v62 = vadd.f32 %v138_v60, %v45_v55  ;;  %v169_v63 = vadd.f32 %v148_v61, %v49_v56  ;;  %v121_v0 = vpop.f32.mrf.mxu0  ;;  %v131_v1 = vpop.f32.mrf.mxu1 }
  0x99   :  { %v199_v2 = vld [vmem:[#allocation2 + $0x40] sm:$0xff]  ;;  %v158_v3 = vadd.f32 %v121_v0, %v38_v58  ;;  %v162_v4 = vadd.f32 %v131_v1, %v42_v59 }
  0x9a   :  { %v219_v5 = vadd.f32 %v390_v41, %v199_v2  ;;  %v203_v6 = vld [vmem:[#allocation2 + $0x60] sm:$0xff]  ;;  %181 = vst.msk [vmem:[#allocation2 + $0x48] sm:$0xff] %vm19_vm0, %v165_v62 }
  0x9b   :  { %v223_v7 = vadd.f32 %v390_v41, %v203_v6  ;;  %v192_v8 = vld [vmem:[#allocation2 + $0x8] sm:$0xff]  ;;  %185 = vst.msk [vmem:[#allocation2 + $0x68] sm:$0xff] %vm19_vm0, %v169_v63 }
  0x9c   :  { %v235_v9 = vpack.c.bf16 %v219_v5, %v219_v5  ;;  %v212_v10 = vadd.f32 %v390_v41, %v192_v8  ;;  %v196_v11 = vld [vmem:[#allocation2 + $0x28] sm:$0xff]  ;;  %174 = vst.msk [vmem:[#allocation2 + $0x10] sm:$0xff] %vm19_vm0, %v158_v3 }
  0x9d   :  { %v239_v12 = vpack.c.bf16 %v223_v7, %v223_v7  ;;  %v216_v13 = vadd.f32 %v390_v41, %v196_v11  ;;  %178 = vst.msk [vmem:[#allocation2 + $0x30] sm:$0xff] %vm19_vm0, %v162_v4 }
  0x9e   :  { %252 = vst.msk [vmem:[%s489_s3 + $0x20] sm:$0xf] %vm243_vm1, %v235_v9  ;;  %v228_v16 = vpack.c.bf16 %v212_v10, %v212_v10 }
  0x9f   :  { %256 = vst.msk [vmem:[%s489_s3 + $0x30] sm:$0xf] %vm243_vm1, %v239_v12  ;;  %v232_v19 = vpack.c.bf16 %v216_v13, %v216_v13  ;;  %v141_v20 = vpop.f32.mrf.mxu2  ;;  %v151_v21 = vpop.f32.mrf.mxu3 }
  0xa0   :  { %245 = vst.msk [vmem:[%s489_s3 + $0x4] sm:$0xf] %vm243_vm1, %v228_v16  ;;  %v166_v22 = vadd.f32 %v141_v20, %v46_v14  ;;  %v170_v23 = vadd.f32 %v151_v21, %v50_v15  ;;  %v123_v24 = vpop.f32.mrf.mxu0  ;;  %v133_v25 = vpop.f32.mrf.mxu1 }
  0xa1   :  { %249 = vst.msk [vmem:[%s489_s3 + $0x14] sm:$0xf] %vm243_vm1, %v232_v19  ;;  %v200_v26 = vld [vmem:[#allocation2 + $0x48] sm:$0xff]  ;;  %v159_v27 = vadd.f32 %v123_v24, %v39_v17  ;;  %v163_v28 = vadd.f32 %v133_v25, %v43_v18 }
  0xa2   :  { %v220_v29 = vadd.f32 %v390_v41, %v200_v26  ;;  %v204_v30 = vld [vmem:[#allocation2 + $0x68] sm:$0xff]  ;;  %182 = vst.msk [vmem:[#allocation2 + $0x50] sm:$0xff] %vm19_vm0, %v166_v22 }
  0xa3   :  { %v224_v31 = vadd.f32 %v390_v41, %v204_v30  ;;  %v193_v32 = vld [vmem:[#allocation2 + $0x10] sm:$0xff]  ;;  %186 = vst.msk [vmem:[#allocation2 + $0x70] sm:$0xff] %vm19_vm0, %v170_v23 }
  0xa4   :  { %v236_v33 = vpack.c.bf16 %v220_v29, %v220_v29  ;;  %v213_v34 = vadd.f32 %v390_v41, %v193_v32  ;;  %v197_v35 = vld [vmem:[#allocation2 + $0x30] sm:$0xff]  ;;  %175 = vst.msk [vmem:[#allocation2 + $0x18] sm:$0xff] %vm19_vm0, %v159_v27 }
  0xa5   :  { %v240_v36 = vpack.c.bf16 %v224_v31, %v224_v31  ;;  %v217_v37 = vadd.f32 %v390_v41, %v197_v35  ;;  %179 = vst.msk [vmem:[#allocation2 + $0x38] sm:$0xff] %vm19_vm0, %v163_v28 }
  0xa6   :  { %253 = vst.msk [vmem:[%s489_s3 + $0x24] sm:$0xf] %vm243_vm1, %v236_v33  ;;  %v229_v40 = vpack.c.bf16 %v213_v34, %v213_v34 }
  0xa7   :  { %257 = vst.msk [vmem:[%s489_s3 + $0x34] sm:$0xf] %vm243_vm1, %v240_v36  ;;  %v233_v42 = vpack.c.bf16 %v217_v37, %v217_v37  ;;  %v143_v43 = vpop.f32.mrf.mxu2  ;;  %v153_v44 = vpop.f32.mrf.mxu3 }
  0xa8   :  { %246 = vst.msk [vmem:[%s489_s3 + $0x8] sm:$0xf] %vm243_vm1, %v229_v40  ;;  %v167_v45 = vadd.f32 %v143_v43, %v47_v38  ;;  %v171_v46 = vadd.f32 %v153_v44, %v51_v39 }
  0xa9   :  { %250 = vst.msk [vmem:[%s489_s3 + $0x18] sm:$0xf] %vm243_vm1, %v233_v42  ;;  %v201_v47 = vld [vmem:[#allocation2 + $0x50] sm:$0xff] }
  0xaa   :  { %v221_v48 = vadd.f32 %v390_v41, %v201_v47  ;;  %v205_v49 = vld [vmem:[#allocation2 + $0x70] sm:$0xff]  ;;  %183 = vst.msk [vmem:[#allocation2 + $0x58] sm:$0xff] %vm19_vm0, %v167_v45 }
  0xab   :  { %v225_v50 = vadd.f32 %v390_v41, %v205_v49  ;;  %v194_v51 = vld [vmem:[#allocation2 + $0x18] sm:$0xff]  ;;  %187 = vst.msk [vmem:[#allocation2 + $0x78] sm:$0xff] %vm19_vm0, %v171_v46 }
  0xac   :  { %v237_v52 = vpack.c.bf16 %v221_v48, %v221_v48  ;;  %v214_v53 = vadd.f32 %v390_v41, %v194_v51  ;;  %v198_v54 = vld [vmem:[#allocation2 + $0x38] sm:$0xff] }
  0xad   :  { %v241_v55 = vpack.c.bf16 %v225_v50, %v225_v50  ;;  %v218_v56 = vadd.f32 %v390_v41, %v198_v54 }
  0xae   :  { %254 = vst.msk [vmem:[%s489_s3 + $0x28] sm:$0xf] %vm243_vm1, %v237_v52  ;;  %v230_v57 = vpack.c.bf16 %v214_v53, %v214_v53 }
  0xaf   :  { %258 = vst.msk [vmem:[%s489_s3 + $0x38] sm:$0xf] %vm243_vm1, %v241_v55  ;;  %v234_v58 = vpack.c.bf16 %v218_v56, %v218_v56 }
  0xb0   :  { %247 = vst.msk [vmem:[%s489_s3 + $0xc] sm:$0xf] %vm243_vm1, %v230_v57 }
  0xb1   :  { %251 = vst.msk [vmem:[%s489_s3 + $0x1c] sm:$0xf] %vm243_vm1, %v234_v58  ;;  %v202_v59 = vld [vmem:[#allocation2 + $0x58] sm:$0xff] }
  0xb2   :  { %v222_v60 = vadd.f32 %v390_v41, %v202_v59  ;;  %v206_v61 = vld [vmem:[#allocation2 + $0x78] sm:$0xff] }
  0xb3   :  { %v226_v62 = vadd.f32 %v390_v41, %v206_v61 }
  0xb4   :  { %v238_v63 = vpack.c.bf16 %v222_v60, %v222_v60 }
  0xb5   :  { %v242_v0 = vpack.c.bf16 %v226_v62, %v226_v62 }
  0xb6   :  { %255 = vst.msk [vmem:[%s489_s3 + $0x2c] sm:$0xf] %vm243_vm1, %v238_v63 }
  0xb7   :  { %259 = vst.msk [vmem:[%s489_s3 + $0x3c] sm:$0xf] %vm243_vm1, %v242_v0 }

// kernel: attention_forward.8
= control target key start
LH: loop header
LB: loop body
LE: loop exit
PB: predicated region body
PF: predicated region fallthrough
CT: control target
= control target key end

     0   :  { %s3177_s12 = smov 0   ;;  %s3179_s13 = smov 0   ;;  %s4415_s0 = inlined_call_operand.vmem [shape: bf16[2,64,32], index: 0, kind: input, shape index: {}]   ;;  %s4416_s1 = inlined_call_operand.vmem [shape: bf16[2,64,32], index: 1, kind: input, shape index: {}]   ;;  %s4417_s2 = inlined_call_operand.vmem [shape: bf16[2,64,32], index: 2, kind: input, shape index: {}]   ;;  %s4418_s3 = inlined_call_operand.vmem [shape: bf16[2,64,32], index: 3, kind: output, shape index: {}]  }
   0x1   :  { %s3181_s14 = smov 0  }
   0x2 LB: > { %s32_s15 = sadd.s32 1, %s3137_s13  ;;  %p2543_p0 = scmp.ge.s32.totalorder %s3141_s14, 1  ;;  %s3141_s14 = sphi %s3181_s14, %s13_s14   ;;  %s3137_s13 = sphi %s3179_s13, %s4470_s13   ;;  %s3133_s12 = sphi %s3177_s12, %s4469_s12  }
   0x3   : > { %p34_p1 = scmp.ge.s32.totalorder %s32_s15, 2  ;;  %p202_p2 = scmp.lt.s32.totalorder %s3141_s14, 3 }
   0x5   : > { %s4472_s15 = smov (%p34_p1, %s32_s15), 0  ;;  %p203_p3 = pnand %p2543_p0, %p202_p2 }
   0x7   : > { %206 = sbr.rel (%p203_p3) target bundleno = 1553 (0x611), region = 32 }
   0xc   : > { %p257_p4 = scmp.lt.s32.totalorder %s3133_s12, 1  ;;  %vm387_vm0 = vcmask 31744   ;;  %s3143_s26 = smov 124   ;;  %vm441_vm1 = vcmask 523264   ;;  %vm2329_vm2 = vcmask 64512   ;;  %vm2338_vm3 = vcmask 97280  }
   0xd   : > { %s3144_s27 = smov 120   ;;  %s3145_s28 = smov 116   ;;  %vm2347_vm4 = vcmask 130048   ;;  %vm2356_vm5 = vcmask 162816   ;;  %vm2365_vm6 = vcmask 195584   ;;  %vm2374_vm7 = vcmask 228352  }
   0xe   : > { %s4474_s12 = smov (!%p257_p4, %s3133_s12), 1  ;;  %s3146_s29 = smov 112   ;;  %vm2391_vm8 = vcmask 257024  }
   0xf   : > { %s3195_s16 = sshll.u32 %s4474_s12, 5  ;;  %s3147_s30 = smov 108  }
  0x10   : > { %s3201_s19 = scalar_lea.vmem %s4416_s1, %s3195_s16  ;;  %s267_s22 = scalar_lea.vmem %s4415_s0, %s3195_s16 }
  0x11   : > { %v3208_v0 = vld [vmem:[%s3201_s19 + $0x18] sm:$0xff]  ;;  %v2679_v1 = vld [vmem:[%s267_s22 + $0x10] sm:$0xff]   ;;  %v2663_v2 = vld [vmem:[%s267_s22] sm:$0xff]   ;;  %s3227_s25 = scalar_lea.vmem %s4417_s2, %s3195_s16  ;;  %s3148_s4 = smov 104  }
  0x12   : > { %v2672_v3 = vunpack.c.l.bf16 %v2679_v1  ;;  %v2673_v4 = vunpack.c.h.bf16 %v2679_v1  ;;  %v2664_v5 = vunpack.c.l.bf16 %v2663_v2  ;;  %v2665_v6 = vunpack.c.h.bf16 %v2663_v2  ;;  %v2678_v7 = vld [vmem:[%s267_s22 + $0x8] sm:$0xff]   ;;  %v2680_v15 = vld [vmem:[%s267_s22 + $0x18] sm:$0xff]   ;;  %v3213_v22 = vld [vmem:[%s3201_s19 + $0x10] sm:$0xff]  ;;  %s3149_s5 = smov 100   ;;  %s3150_s6 = smov 4  }
  0x13   : > { %v410_v8 = vsel %vm387_vm0, %v3208_v0, 0  ;;  %v2668_v9 = vunpack.c.l.bf16 %v2678_v7  ;;  %v2669_v10 = vunpack.c.h.bf16 %v2678_v7  ;;  %v2676_v25 = vunpack.c.l.bf16 %v2680_v15  ;;  %v2661_v41 = vld [vmem:[%s3227_s25 + $0x18] sm:$0xff]  ;;  %v3237_v44 = vld [vmem:[%s3201_s19 + $0x8] sm:$0xff]  ;;  %v3240_v45 = vld [vmem:[%s3201_s19] sm:$0xff]  ;;  %s3151_s7 = smov 8   ;;  %s3152_s8 = smov 12  }
  0x14   : > { %416 = vmatpush.bf16.xpose.msra.mxu0 %v410_v8  ;;  %v319_v11 = vmul.f32 0.5, %v2672_v3  ;;  %v320_v12 = vmul.f32 0.5, %v2673_v4  ;;  %v315_v13 = vmul.f32 0.5, %v2664_v5  ;;  %v316_v14 = vmul.f32 0.5, %v2665_v6  ;;  %558 = vmatpush.bf16.msra.mxu1 %v2661_v41  ;;  %v2660_v46 = vld [vmem:[%s3227_s25 + $0x10] sm:$0xff]  ;;  %v2659_v49 = vld [vmem:[%s3227_s25 + $0x8] sm:$0xff]  ;;  %s4362_s19 = scalar_lea.vmem %s4418_s3, %s3195_s16 }
  0x15   : > { %v317_v16 = vmul.f32 0.5, %v2668_v9  ;;  %v318_v17 = vmul.f32 0.5, %v2669_v10  ;;  %v2677_v26 = vunpack.c.h.bf16 %v2680_v15  ;;  %v321_v33 = vmul.f32 0.5, %v2676_v25  ;;  %v2658_v50 = vld [vmem:[%s3227_s25] sm:$0xff]  ;;  %s3153_s9 = smov 16   ;;  %s3154_s10 = smov 20  }
  0x16   : > { %v327_v18 = vpack.c.bf16 %v319_v11, %v319_v11  ;;  %v328_v19 = vpack.c.bf16 %v320_v12, %v320_v12  ;;  %v323_v20 = vpack.c.bf16 %v315_v13, %v315_v13  ;;  %v324_v21 = vpack.c.bf16 %v316_v14, %v316_v14  ;;  %s3155_s11 = smov 24   ;;  %s3156_s12 = smov 28  }
  0x17   : > { %v325_v23 = vpack.c.bf16 %v317_v16, %v317_v16  ;;  %v326_v24 = vpack.c.bf16 %v318_v17, %v318_v17  ;;  %v322_v34 = vmul.f32 0.5, %v2677_v26  ;;  %v407_v37 = vsel %vm387_vm0, %v3213_v22, 0 }
  0x18   : > { %v359_v27 = vunpack.c.l.b16 %v327_v18  ;;  %v360_v28 = vunpack.c.l.b16 %v328_v19  ;;  %v355_v29 = vunpack.c.l.b16 %v323_v20  ;;  %v356_v30 = vunpack.c.l.b16 %v324_v21  ;;  %559 = vmatpush.bf16.msra.mxu1 %v2660_v46 }
  0x19   : > { %v357_v31 = vunpack.c.l.b16 %v325_v23  ;;  %v358_v32 = vunpack.c.l.b16 %v326_v24  ;;  %v329_v39 = vpack.c.bf16 %v321_v33, %v321_v33  ;;  %v330_v40 = vpack.c.bf16 %v322_v34, %v322_v34 }
  0x1a   : > { %v3215_v35 = vpack.c.b16 %v360_v28, %v359_v27  ;;  %v3217_v36 = vpack.c.b16 %v356_v30, %v355_v29  ;;  %v404_v48 = vsel %vm387_vm0, %v3237_v44, 0  ;;  %v401_v51 = vsel %vm387_vm0, %v3240_v45, 0 }
  0x1b   : > { %v3221_v38 = vpack.c.b16 %v358_v32, %v357_v31  ;;  %v361_v42 = vunpack.c.l.b16 %v329_v39  ;;  %v362_v43 = vunpack.c.l.b16 %v330_v40 }
  0x1c   : > { %603 = vrot.lane.b32.xlu0 %v3215_v35, %s3143_s26  ;;  %599 = vrot.lane.b32.xlu1 %v3217_v36, %s3143_s26 }
  0x1d   : > { %417 = vmatpush.bf16.xpose.msra.mxu0 %v407_v37  ;;  %601 = vrot.lane.b32.xlu2 %v3221_v38, %s3143_s26  ;;  %v3243_v47 = vpack.c.b16 %v362_v43, %v361_v42 }
  0x1e   : > { %560 = vmatpush.bf16.msra.mxu1 %v2659_v49 }
  0x22   : > { %561 = vmatpush.bf16.msra.mxu1 %v2658_v50 }
  0x24   : > { %609 = vrot.lane.b32.xlu0 %v3237_v44, %s3143_s26  ;;  %607 = vrot.lane.b32.xlu1 %v3240_v45, %s3143_s26 }
  0x25   : > { %418 = vmatpush.bf16.xpose.msra.mxu0 %v404_v48  ;;  %605 = vrot.lane.b32.xlu2 %v3243_v47, %s3143_s26 }
  0x2c   : > { %748 = vrot.lane.b32.xlu0 %v2660_v46, %s3143_s26  ;;  %613 = vrot.lane.b32.xlu1 %v3208_v0, %s3143_s26 }
  0x2d   : > { %419 = vmatpush.bf16.xpose.msra.mxu0 %v401_v51  ;;  %611 = vrot.lane.b32.xlu2 %v3213_v22, %s3143_s26 }
  0x34   : > { %813 = vrot.lane.b32.xlu0 %v3217_v36, %s3144_s27  ;;  %746 = vrot.lane.b32.xlu1 %v2659_v49, %s3143_s26 }
  0x35   : > { %2568 = vmatmul.msk.bf16.vlgmr.msra.gmra.mxu0 %vm387_vm0, %v3217_v36  ;;  %744 = vrot.lane.b32.xlu2 %v2658_v50, %s3143_s26 }
  0x3c   : > { %819 = vrot.lane.b32.xlu0 %v3243_v47, %s3144_s27  ;;  %815 = vrot.lane.b32.xlu1 %v3221_v38, %s3144_s27 }
  0x3d   : > { %750 = vrot.lane.b32.xlu2 %v2661_v41, %s3143_s26 }
  0x44   : > { %825 = vrot.lane.b32.xlu0 %v3213_v22, %s3144_s27  ;;  %821 = vrot.lane.b32.xlu1 %v3240_v45, %s3144_s27 }
  0x45   : > { %2569 = vmatmul.msk.bf16.gmra.mxu0 %vm387_vm0, %v3221_v38  ;;  %817 = vrot.lane.b32.xlu2 %v3215_v35, %s3144_s27 }
  0x4c   : > { %958 = vrot.lane.b32.xlu0 %v2658_v50, %s3144_s27  ;;  %827 = vrot.lane.b32.xlu1 %v3208_v0, %s3144_s27 }
  0x4d   : > { %823 = vrot.lane.b32.xlu2 %v3237_v44, %s3144_s27 }
  0x54   : > { %964 = vrot.lane.b32.xlu0 %v2661_v41, %s3144_s27  ;;  %960 = vrot.lane.b32.xlu1 %v2659_v49, %s3144_s27 }
  0x55   : > { %2570 = vmatmul.msk.bf16.gmra.mxu0 %vm387_vm0, %v3215_v35  ;;  %962 = vrot.lane.b32.xlu2 %v2660_v46, %s3144_s27 }
  0x5c   : > { %1029 = vrot.lane.b32.xlu0 %v3221_v38, %s3145_s28  ;;  %1027 = vrot.lane.b32.xlu1 %v3217_v36, %s3145_s28 }
  0x5d   : > { %1031 = vrot.lane.b32.xlu2 %v3215_v35, %s3145_s28 }
  0x64   : > { %1035 = vrot.lane.b32.xlu0 %v3240_v45, %s3145_s28  ;;  %1033 = vrot.lane.b32.xlu1 %v3243_v47, %s3145_s28 }
  0x65   : > { %1037 = vrot.lane.b32.xlu2 %v3237_v44, %s3145_s28  ;;  %2571 = vmatmul.msk.bf16.gmra.mxu0 %vm387_vm0, %v3243_v47 }
  0x6c   : > { %1041 = vrot.lane.b32.xlu0 %v3208_v0, %s3145_s28  ;;  %1039 = vrot.lane.b32.xlu1 %v3213_v22, %s3145_s28 }
  0x6d   : > { %1176 = vrot.lane.b32.xlu2 %v2660_v46, %s3145_s28 }
  0x74   : > { %1174 = vrot.lane.b32.xlu0 %v2659_v49, %s3145_s28  ;;  %1172 = vrot.lane.b32.xlu1 %v2658_v50, %s3145_s28 }
  0x75   : > { %1243 = vrot.lane.b32.xlu2 %v3221_v38, %s3146_s29 }
  0x77   : > { %v3291_v52 = vpop.permute.xlu2 %601 }
  0x7c   : > { %1178 = vrot.lane.b32.xlu0 %v2661_v41, %s3145_s28  ;;  %1241 = vrot.lane.b32.xlu1 %v3217_v36, %s3146_s29 }
  0x7d   : > { %1469 = vrot.lane.b32.xlu2 %v3208_v0, %s3147_s30 }
  0x7f   : > { %v3297_v53 = vpop.permute.xlu2 %605 }
  0x84   : > { %1245 = vrot.lane.b32.xlu0 %v3215_v35, %s3146_s29  ;;  %1255 = vrot.lane.b32.xlu1 %v3208_v0, %s3146_s29 }
  0x85   : > { %1467 = vrot.lane.b32.xlu2 %v3213_v22, %s3147_s30 }
  0x87   : > { %v612_v54 = vpop.permute.xlu2 %611 }
  0x88   : > { %v634_v1 = vsel %vm387_vm0, %v612_v54, 0 }
  0x8c   : > { %1247 = vrot.lane.b32.xlu0 %v3243_v47, %s3146_s29 }
  0x8d   : > { %1249 = vrot.lane.b32.xlu2 %v3240_v45, %s3146_s29 }
  0x8e   : > { %v3309_v55 = vpop.permute.xlu0 %603  ;;  %v600_v56 = vpop.permute.xlu1 %599 }
  0x8f   : > { %v745_v57 = vpop.permute.xlu2 %744 }
  0x95   : > { %1455 = vrot.lane.b32.xlu2 %v3217_v36, %s3147_s30 }
  0x96   : > { %v610_v58 = vpop.permute.xlu0 %609  ;;  %v608_v59 = vpop.permute.xlu1 %607 }
  0x97   : > { %v751_v60 = vpop.permute.xlu2 %750  ;;  %v631_v6 = vsel %vm387_vm0, %v610_v58, 0  ;;  %v628_v12 = vsel %vm387_vm0, %v608_v59, 0 }
  0x98   : > { %772 = vmatpush.bf16.msra.mxu3 %v751_v60 }
  0x9e   : > { %v749_v61 = vpop.permute.xlu0 %748  ;;  %v614_v62 = vpop.permute.xlu1 %613 }
  0x9f   : > { %773 = vmatpush.bf16.msra.mxu3 %v749_v61  ;;  %v637_v63 = vsel %vm387_vm0, %v614_v62, 0  ;;  %v3326_v9 = vpop.permute.xlu2 %817 }
  0xa0   : > { %643 = vmatpush.bf16.xpose.msra.mxu2 %v637_v63 }
  0xa6   : > { %v3315_v2 = vpop.permute.xlu0 %813  ;;  %v747_v3 = vpop.permute.xlu1 %746 }
  0xa7   : > { %774 = vmatpush.bf16.msra.mxu3 %v747_v3  ;;  %v824_v15 = vpop.permute.xlu2 %823 }
  0xa8   : > { %644 = vmatpush.bf16.xpose.msra.mxu2 %v634_v1  ;;  %v845_v28 = vsel %vm387_vm0, %v824_v15, 0 }
  0xab   : > { %775 = vmatpush.bf16.msra.mxu3 %v745_v57 }
  0xae   : > { %v3317_v4 = vpop.permute.xlu0 %819  ;;  %v3319_v5 = vpop.permute.xlu1 %815 }
  0xaf   : > { %v963_v25 = vpop.permute.xlu2 %962 }
  0xb0   : > { %645 = vmatpush.bf16.xpose.msra.mxu2 %v631_v6 }
  0xb2   : > { %v3322_v7 = vpop.f32.mrf.mxu0 }
  0xb3   : > { %v442_v8 = vsel %vm441_vm1, %v3322_v7, -inf }
  0xb6   : > { %v826_v10 = vpop.permute.xlu0 %825  ;;  %v822_v11 = vpop.permute.xlu1 %821  ;;  %443 = vmax.xlane.f32.xlu0 %v442_v8 }
  0xb7   : > { %v848_v24 = vsel %vm387_vm0, %v826_v10, 0  ;;  %v842_v34 = vsel %vm387_vm0, %v822_v11, 0  ;;  %v1032_v42 = vpop.permute.xlu2 %1031 }
  0xb8   : > { %646 = vmatpush.bf16.xpose.msra.mxu2 %v628_v12 }
  0xba   : > { %v3329_v13 = vpop.f32.mrf.mxu0 }
  0xbb   : > { %v445_v14 = vsel %vm441_vm1, %v3329_v13, -inf }
  0xbe   : > { %v959_v16 = vpop.permute.xlu0 %958  ;;  %v828_v17 = vpop.permute.xlu1 %827  ;;  %446 = vmax.xlane.f32.xlu0 %v445_v14 }
  0xbf   : > { %2592 = vmatmul.msk.bf16.vlgmr.msra.gmra.mxu2 %vm387_vm0, %v600_v56  ;;  %v851_v18 = vsel %vm387_vm0, %v828_v17, 0  ;;  %v1038_v50 = vpop.permute.xlu2 %1037 }
  0xc0   : > { %857 = vmatpush.bf16.xpose.msrb.mxu1 %v851_v18  ;;  %v1059_v51 = vsel %vm387_vm0, %v1038_v50, 0 }
  0xc2   : > { %v3335_v19 = vpop.f32.mrf.mxu0 }
  0xc3   : > { %v448_v20 = vsel %vm441_vm1, %v3335_v19, -inf }
  0xc4   : > { %449 = vmax.xlane.f32.xlu1 %v448_v20 }
  0xc6   : > { %v965_v21 = vpop.permute.xlu0 %964  ;;  %v961_v23 = vpop.permute.xlu1 %960 }
  0xc7   : > { %986 = vmatpush.bf16.msrb.mxu3 %v965_v21  ;;  %v1177_v54 = vpop.permute.xlu2 %1176 }
  0xc8   : > { %858 = vmatpush.bf16.xpose.msrb.mxu1 %v848_v24 }
  0xca   : > { %v3340_v26 = vpop.f32.mrf.mxu0 }
  0xcb   : > { %987 = vmatpush.bf16.msrb.mxu3 %v963_v25  ;;  %v451_v27 = vsel %vm441_vm1, %v3340_v26, -inf }
  0xcc   : > { %452 = vmax.xlane.f32.xlu1 %v451_v27 }
  0xce   : > { %v1030_v29 = vpop.permute.xlu0 %1029  ;;  %v1028_v30 = vpop.permute.xlu1 %1027 }
  0xcf   : > { %2593 = vmatmul.msk.bf16.gmra.mxu2 %vm387_vm0, %v3291_v52  ;;  %988 = vmatpush.bf16.msrb.mxu3 %v961_v23  ;;  %v3374_v56 = vpop.permute.xlu2 %1243 }
  0xd0   : > { %859 = vmatpush.bf16.xpose.msrb.mxu1 %v845_v28 }
  0xd2   : > { %v3347_v31 = vpop.f32.mrf.mxu0  ;;  %1251 = vrot.lane.b32.xlu0 %v3237_v44, %s3146_s29 }
  0xd3   : > { %989 = vmatpush.bf16.msrb.mxu3 %v959_v16  ;;  %v454_v32 = vsel %vm441_vm1, %v3347_v31, -inf }
  0xd4   : > { %455 = vmax.xlane.f32.xlu2 %v454_v32 }
  0xd6   : > { %v1036_v33 = vpop.permute.xlu0 %1035  ;;  %v1034_v37 = vpop.permute.xlu1 %1033 }
  0xd7   : > { %v1470_v58 = vpop.permute.xlu2 %1469 }
  0xd8   : > { %860 = vmatpush.bf16.xpose.msrb.mxu1 %v842_v34  ;;  %v1493_v59 = vsel %vm387_vm0, %v1470_v58, 0 }
  0xda   : > { %v3354_v39 = vpop.f32.mrf.mxu0  ;;  %1463 = vrot.lane.b32.xlu0 %v3240_v45, %s3147_s30 }
  0xdb   : > { %v457_v40 = vsel %vm441_vm1, %v3354_v39, -inf }
  0xdc   : > { %458 = vmax.xlane.f32.xlu2 %v457_v40 }
  0xde   : > { %v1042_v41 = vpop.permute.xlu0 %1041  ;;  %v1040_v46 = vpop.permute.xlu1 %1039 }
  0xdf   : > { %2594 = vmatmul.msk.bf16.gmra.mxu2 %vm387_vm0, %v3309_v55  ;;  %v1065_v43 = vsel %vm387_vm0, %v1042_v41, 0  ;;  %v1062_v48 = vsel %vm387_vm0, %v1040_v46, 0  ;;  %v1056_v55 = vsel %vm387_vm0, %v1036_v33, 0  ;;  %v1468_v8 = vpop.permute.xlu2 %1467 }
  0xe0   : > { %1071 = vmatpush.bf16.xpose.msrb.mxu0 %v1065_v43  ;;  %v1490_v16 = vsel %vm387_vm0, %v1468_v8, 0 }
  0xe2   : > { %1457 = vrot.lane.b32.xlu0 %v3221_v38, %s3147_s30 }
  0xe5   : > { %1253 = vrot.lane.b32.xlu1 %v3213_v22, %s3146_s29 }
  0xe6   : > { %v1175_v49 = vpop.permute.xlu0 %1174  ;;  %v1173_v57 = vpop.permute.xlu1 %1172 }
  0xe7   : > { %v1250_v17 = vpop.permute.xlu2 %1249 }
  0xe8   : > { %1072 = vmatpush.bf16.xpose.msrb.mxu0 %v1062_v48 }
  0xed   : > { %1465 = vrot.lane.b32.xlu1 %v3237_v44, %s3147_s30 }
  0xee   : > { %v1179_v52 = vpop.permute.xlu0 %1178  ;;  %v3392_v3 = vpop.permute.xlu1 %1241 }
  0xef   : > { %2595 = vmatmul.msk.bf16.gmra.mxu2 %vm387_vm0, %v3297_v53  ;;  %v3378_v53 = vpop.f32.mrf.mxu0  ;;  %v1456_v24 = vpop.permute.xlu2 %1455 }
  0xf0   : > { %1073 = vmatpush.bf16.xpose.msrb.mxu0 %v1059_v51  ;;  %1200 = vmatpush.bf16.msrb.mxu2 %v1179_v52  ;;  %v460_v60 = vsel %vm441_vm1, %v3378_v53, -inf }
  0xf4   : > { %1201 = vmatpush.bf16.msrb.mxu2 %v1177_v54 }
  0xf6   : > { %v3387_v63 = vpop.permute.xlu0 %1245  ;;  %v1256_v11 = vpop.permute.xlu1 %1255 }
  0xf7   : > { %v3383_v61 = vpop.f32.mrf.mxu0 }
  0xf8   : > { %1074 = vmatpush.bf16.xpose.msrb.mxu0 %v1056_v55  ;;  %1202 = vmatpush.bf16.msrb.mxu2 %v1175_v49  ;;  %v463_v62 = vsel %vm441_vm1, %v3383_v61, -inf }
  0xfc   : > { %1203 = vmatpush.bf16.msrb.mxu2 %v1173_v57 }
  0xfe   : > { %v3390_v1 = vpop.permute.xlu0 %1247 }
  0xff   : > { %2608 = vmatmul.msk.bf16.vlgmr.msrb.gmra.mxu0 %vm387_vm0, %v1028_v30 }
 0x100   : > { %1499 = vmatpush.bf16.xpose.msra.mxu0 %v1493_v59  ;;  %v1270_v59 = vsel %vm387_vm0, %v1250_v17, 0 }
 0x108   : > { %1500 = vmatpush.bf16.xpose.msra.mxu0 %v1490_v16 }
 0x10c   : > { %461 = vmax.xlane.f32.xlu0 %v460_v60 }
 0x10f   : > { %2609 = vmatmul.msk.bf16.gmra.mxu0 %vm387_vm0, %v1030_v29 }
 0x117   : > { %464 = vmax.xlane.f32.xlu1 %v463_v62 }
 0x11f   : > { %2610 = vmatmul.msk.bf16.gmra.mxu0 %vm387_vm0, %v1032_v42 }
 0x129   : > { %v444_v6 = vpop.xlane.xlu0 %443 }
 0x12a   : > { %v466_v10 = vsub.f32 %v3322_v7, %v444_v6  ;;  %v1279_v7 = vsel %vm387_vm0, %v1256_v11, 0 }
 0x12c   : > { %v474_v12 = vmul.f32 1.442695, %v466_v10 }
 0x12e   : > { %2859 = vpow2.f32 %v474_v12 }
 0x12f   : > { %2611 = vmatmul.msk.bf16.gmra.mxu0 %vm387_vm0, %v1034_v37 }
 0x131   : > { %v447_v14 = vpop.xlane.xlu0 %446 }
 0x132   : > { %v467_v15 = vsub.f32 %v3329_v13, %v447_v14 }
 0x134   : > { %v476_v18 = vmul.f32 1.442695, %v467_v15  ;;  %v2860_v21 = vpop.eup %2859 }
 0x135   : > { %v490_v14 = vsel %vm441_vm1, %v2860_v21, 0.0 }
 0x136   : > { %2861 = vpow2.f32 %v476_v18 }
 0x137   : > { %v450_v20 = vpop.xlane.xlu1 %449 }
 0x138   : > { %v468_v27 = vsub.f32 %v3335_v19, %v450_v20 }
 0x13a   : > { %v478_v29 = vmul.f32 1.442695, %v468_v27 }
 0x13c   : > { %v3398_v23 = vpop.eup %2861 }
 0x13d   : > { %v514_v25 = vpack.c.bf16 %v3398_v23, %v2860_v21 }
 0x13f   : > { %v453_v28 = vpop.xlane.xlu1 %452  ;;  %2588 = vmatmul.msk.bf16.vlgmr.msra.gmra.mxu1 %vm441_vm1, %v514_v25 }
 0x140   : > { %v469_v13 = vsub.f32 %v3340_v26, %v453_v28  ;;  %1285 = vmatpush.bf16.xpose.msra.mxu1 %v1279_v7 }
 0x142   : > { %v480_v30 = vmul.f32 1.442695, %v469_v13  ;;  %v3405_v32 = vpop.f32.mrf.mxu2 }
 0x143   : > { %v668_v33 = vsel %vm441_vm1, %v3405_v32, -inf }
 0x144   : > { %2863 = vpow2.f32 %v480_v30  ;;  %669 = vmax.xlane.f32.xlu0 %v668_v33  ;;  %v1252_v50 = vpop.permute.xlu0 %1251 }
 0x145   : > { %2865 = vpow2.f32 %v478_v29  ;;  %v1273_v54 = vsel %vm387_vm0, %v1252_v50, 0  ;;  %v493_v29 = vsel %vm441_vm1, %v3398_v23, 0.0 }
 0x147   : > { %v456_v34 = vpop.xlane.xlu2 %455 }
 0x148   : > { %v470_v26 = vsub.f32 %v3347_v31, %v456_v34 }
 0x14a   : > { %v3409_v37 = vpop.eup %2863  ;;  %v482_v43 = vmul.f32 1.442695, %v470_v26  ;;  %v3431_v62 = vpop.f32.mrf.mxu2 }
 0x14b   : > { %v3411_v19 = vpop.eup %2865  ;;  %v671_v25 = vsel %vm441_vm1, %v3431_v62, -inf  ;;  %v499_v23 = vsel %vm441_vm1, %v3409_v37, 0.0 }
 0x14c   : > { %v515_v40 = vpack.c.bf16 %v3409_v37, %v3411_v19  ;;  %v1464_v57 = vpop.permute.xlu0 %1463  ;;  %v496_v33 = vsel %vm441_vm1, %v3411_v19, 0.0 }
 0x14d   : > { %v1484_v58 = vsel %vm387_vm0, %v1464_v57, 0 }
 0x14f   : > { %v459_v41 = vpop.xlane.xlu2 %458  ;;  %2589 = vmatmul.msk.bf16.gmra.mxu1 %vm441_vm1, %v515_v40 }
 0x150   : > { %v471_v42 = vsub.f32 %v3354_v39, %v459_v41 }
 0x152   : > { %v484_v46 = vmul.f32 1.442695, %v471_v42  ;;  %v3440_v12 = vpop.f32.mrf.mxu2 }
 0x153   : > { %v674_v27 = vsel %vm441_vm1, %v3440_v12, -inf }
 0x154   : > { %2867 = vpow2.f32 %v484_v46  ;;  %v1458_v60 = vpop.permute.xlu0 %1457 }
 0x155   : > { %2869 = vpow2.f32 %v482_v43 }
 0x157   : > { %v1254_v48 = vpop.permute.xlu1 %1253 }
 0x158   : > { %v1276_v49 = vsel %vm387_vm0, %v1254_v48, 0 }
 0x159   : > { %1286 = vmatpush.bf16.xpose.msra.mxu1 %v1276_v49 }
 0x15a   : > { %v3419_v51 = vpop.eup %2867 }
 0x15b   : > { %v3421_v52 = vpop.eup %2869 }
 0x15c   : > { %v516_v31 = vpack.c.bf16 %v3419_v51, %v3421_v52  ;;  %v502_v50 = vsel %vm441_vm1, %v3421_v52, 0.0 }
 0x15f   : > { %2590 = vmatmul.msk.bf16.gmra.mxu1 %vm441_vm1, %v516_v31  ;;  %v1466_v39 = vpop.permute.xlu1 %1465 }
 0x160   : > { %v1487_v55 = vsel %vm387_vm0, %v1466_v39, 0 }
 0x161   : > { %1501 = vmatpush.bf16.xpose.msra.mxu0 %v1487_v55  ;;  %1287 = vmatpush.bf16.xpose.msra.mxu1 %v1273_v54  ;;  %v505_v54 = vsel %vm441_vm1, %v3419_v51, 0.0 }
 0x169   : > { %1502 = vmatpush.bf16.xpose.msra.mxu0 %v1484_v58  ;;  %1288 = vmatpush.bf16.xpose.msra.mxu1 %v1270_v59 }
 0x170   : > { %2624 = vmatmul.msk.bf16.vlgmr.msra.gmra.mxu0 %vm387_vm0, %v1456_v24 }
 0x17c   : > { %v3433_v6 = vpop.f32.mrf.mxu0 }
 0x17d   : > { %v1096_v8 = vsel %vm441_vm1, %v3433_v6, -inf }
 0x17e   : > { %1097 = vmax.xlane.f32.xlu2 %v1096_v8 }
 0x17f   : > { %v462_v10 = vpop.xlane.xlu0 %461 }
 0x180   : > { %2625 = vmatmul.msk.bf16.gmra.mxu0 %vm387_vm0, %v1458_v60  ;;  %v472_v16 = vsub.f32 %v3378_v53, %v462_v10  ;;  %v3455_v53 = vpop.f32.mrf.mxu2 }
 0x181   : > { %v677_v41 = vsel %vm441_vm1, %v3455_v53, -inf }
 0x182   : > { %v486_v17 = vmul.f32 1.442695, %v472_v16 }
 0x184   : > { %v3438_v11 = vpop.f32.mrf.mxu0  ;;  %2871 = vpow2.f32 %v486_v17 }
 0x185   : > { %v1099_v15 = vsel %vm441_vm1, %v3438_v11, -inf }
 0x186   : > { %491 = vadd.xlane.f32.xlu2 %v490_v14  ;;  %1100 = vmax.xlane.f32.xlu1 %v1099_v15 }
 0x188   : > { %v3466_v40 = vpop.f32.mrf.mxu2 }
 0x189   : > { %v680_v46 = vsel %vm441_vm1, %v3466_v40, -inf }
 0x18a   : > { %v465_v18 = vpop.xlane.xlu1 %464 }
 0x18b   : > { %v473_v20 = vsub.f32 %v3383_v61, %v465_v18  ;;  %v2872_v61 = vpop.eup %2871 }
 0x18c   : > { %v3447_v7 = vpop.f32.mrf.mxu0  ;;  %v508_v57 = vsel %vm441_vm1, %v2872_v61, 0.0 }
 0x18d   : > { %v488_v24 = vmul.f32 1.442695, %v473_v20  ;;  %v1102_v21 = vsel %vm441_vm1, %v3447_v7, -inf }
 0x18e   : > { %672 = vmax.xlane.f32.xlu2 %v671_v25  ;;  %1103 = vmax.xlane.f32.xlu0 %v1102_v21 }
 0x18f   : > { %2873 = vpow2.f32 %v488_v24  ;;  %675 = vmax.xlane.f32.xlu1 %v674_v27 }
 0x190   : > { %v3476_v19 = vpop.f32.mrf.mxu2 }
 0x191   : > { %v683_v37 = vsel %vm441_vm1, %v3476_v19, -inf }
 0x194   : > { %v3457_v28 = vpop.f32.mrf.mxu0 }
 0x195   : > { %v2874_v13 = vpop.eup %2873  ;;  %v1105_v30 = vsel %vm441_vm1, %v3457_v28, -inf }
 0x196   : > { %494 = vadd.xlane.f32.xlu0 %v493_v29  ;;  %1106 = vmax.xlane.f32.xlu2 %v1105_v30  ;;  %v517_v34 = vpack.c.bf16 %v2874_v13, %v2872_v61  ;;  %v511_v14 = vsel %vm441_vm1, %v2874_v13, 0.0 }
 0x197   : > { %497 = vadd.xlane.f32.xlu1 %v496_v33 }
 0x198   : > { %2591 = vmatmul.msk.bf16.gmra.mxu1 %vm441_vm1, %v517_v34  ;;  %v3496_v39 = vpop.f32.mrf.mxu2 }
 0x19c   : > { %v3468_v26 = vpop.f32.mrf.mxu0 }
 0x19d   : > { %v1108_v42 = vsel %vm441_vm1, %v3468_v26, -inf }
 0x19e   : > { %678 = vmax.xlane.f32.xlu0 %v677_v41  ;;  %500 = vadd.xlane.f32.xlu2 %v499_v23 }
 0x19f   : > { %1109 = vmax.xlane.f32.xlu1 %v1108_v42 }
 0x1a0   : > { %v3507_v51 = vpop.f32.mrf.mxu2 }
 0x1a1   : > { %v689_v58 = vsel %vm441_vm1, %v3507_v51, -inf }
 0x1a4   : > { %v3478_v43 = vpop.f32.mrf.mxu0 }
 0x1a5   : > { %v1111_v48 = vsel %vm441_vm1, %v3478_v43, -inf }
 0x1a6   : > { %681 = vmax.xlane.f32.xlu2 %v680_v46  ;;  %1112 = vmax.xlane.f32.xlu0 %v1111_v48 }
 0x1a7   : > { %684 = vmax.xlane.f32.xlu1 %v683_v37 }
 0x1a8   : > { %2600 = vmatmul.msk.bf16.vlgmr.msrb.gmra.mxu1 %vm387_vm0, %v3315_v2  ;;  %v686_v2 = vsel %vm441_vm1, %v3496_v39, -inf }
 0x1ac   : > { %v3488_v49 = vpop.f32.mrf.mxu0 }
 0x1ad   : > { %v1114_v31 = vsel %vm441_vm1, %v3488_v49, -inf }
 0x1ae   : > { %503 = vadd.xlane.f32.xlu0 %v502_v50  ;;  %1115 = vmax.xlane.f32.xlu2 %v1114_v31 }
 0x1af   : > { %506 = vadd.xlane.f32.xlu1 %v505_v54 }
 0x1b4   : > { %v3498_v55 = vpop.f32.mrf.mxu0 }
 0x1b5   : > { %v1117_v52 = vsel %vm441_vm1, %v3498_v55, -inf }
 0x1b6   : > { %687 = vmax.xlane.f32.xlu0 %v686_v2  ;;  %509 = vadd.xlane.f32.xlu2 %v508_v57 }
 0x1b7   : > { %1118 = vmax.xlane.f32.xlu1 %v1117_v52  ;;  %v670_v59 = vpop.xlane.xlu0 %669 }
 0x1b8   : > { %2601 = vmatmul.msk.bf16.gmra.mxu1 %vm387_vm0, %v3319_v5  ;;  %v692_v8 = vsub.f32 %v3405_v32, %v670_v59 }
 0x1ba   : > { %v700_v15 = vmul.f32 1.442695, %v692_v8 }
 0x1bc   : > { %v3523_v5 = vpop.f32.mrf.mxu1  ;;  %2875 = vpow2.f32 %v700_v15 }
 0x1bd   : > { %4421 = vst [vmem:[#allocation2_spill] sm:$0xff] %v3523_v5 }
 0x1be   : > { %690 = vmax.xlane.f32.xlu2 %v689_v58 }
 0x1c2   : > { %v2876_v24 = vpop.eup %2875 }
 0x1c8   : > { %2602 = vmatmul.msk.bf16.gmra.mxu1 %vm387_vm0, %v3326_v9  ;;  %v3527_v9 = vpop.f32.mrf.mxu1 }
 0x1c9   : > { %4422 = vst [vmem:[#allocation3_spill] sm:$0xff] %v3527_v9 }
 0x1ca   : > { %1683 = vrot.lane.b32.xlu0 %v3208_v0, %s3148_s4 }
 0x1d0   : > { %1895 = vrot.lane.b32.xlu1 %v3213_v22, %s3149_s5  ;;  %v3531_v60 = vpop.f32.mrf.mxu1 }
 0x1d1   : > { %4423 = vst [vmem:[#allocation4_spill] sm:$0xff] %v3531_v60 }
 0x1d6   : > { %1461 = vrot.lane.b32.xlu2 %v3243_v47, %s3147_s30 }
 0x1d8   : > { %1891 = vrot.lane.b32.xlu1 %v3240_v45, %s3149_s5  ;;  %2603 = vmatmul.msk.bf16.gmra.mxu1 %vm387_vm0, %v3317_v4  ;;  %v3536_v16 = vpop.f32.mrf.mxu1 }
 0x1d9   : > { %4424 = vst [vmem:[#allocation5_spill] sm:$0xff] %v3536_v16 }
 0x1de   : > { %1883 = vrot.lane.b32.xlu2 %v3217_v36, %s3149_s5 }
 0x1e0   : > { %v3548_v29 = vpop.f32.mrf.mxu1 }
 0x1e1   : > { %4426 = vst [vmem:[#allocation7_spill] sm:$0xff] %v3548_v29 }
 0x1e8   : > { %2616 = vmatmul.msk.bf16.vlgmr.msra.gmra.mxu1 %vm387_vm0, %v3392_v3  ;;  %v3565_v31 = vpop.f32.mrf.mxu1 }
 0x1e9   : > { %4429 = vst [vmem:[#allocation10_spill] sm:$0xff] %v3565_v31 }
 0x1ed   : > { %v3805_v5 = vpop.f32.mrf.mxu0 }
 0x1f1   : > { %v1098_v10 = vpop.xlane.xlu2 %1097 }
 0x1f2   : > { %v1120_v4 = vsub.f32 %v3433_v6, %v1098_v10  ;;  %v716_v6 = vsel %vm441_vm1, %v2876_v24, 0.0 }
 0x1f4   : > { %512 = vadd.xlane.f32.xlu0 %v511_v14  ;;  %v1128_v17 = vmul.f32 1.442695, %v1120_v4 }
 0x1f6   : > { %2877 = vpow2.f32 %v1128_v17 }
 0x1f8   : > { %2617 = vmatmul.msk.bf16.gmra.mxu1 %vm387_vm0, %v3374_v56 }
 0x1f9   : > { %v3540_v3 = vpop.xlane.xlu2 %491  ;;  %v1101_v18 = vpop.xlane.xlu1 %1100 }
 0x1fa   : > { %4425 = vst [vmem:[#allocation6_spill] sm:$0xff] %v3540_v3  ;;  %v1121_v20 = vsub.f32 %v3438_v11, %v1101_v18 }
 0x1fc   : > { %v1130_v32 = vmul.f32 1.442695, %v1121_v20  ;;  %v3546_v13 = vpop.eup %2877 }
 0x1fe   : > { %2879 = vpow2.f32 %v1130_v32 }
 0x201   : > { %v673_v25 = vpop.xlane.xlu2 %672  ;;  %v1104_v21 = vpop.xlane.xlu0 %1103 }
 0x202   : > { %v693_v27 = vsub.f32 %v3431_v62, %v673_v25  ;;  %v1122_v61 = vsub.f32 %v3447_v7, %v1104_v21  ;;  %717 = vadd.xlane.f32.xlu1 %v716_v6  ;;  %v676_v56 = vpop.xlane.xlu1 %675 }
 0x203   : > { %v694_v11 = vsub.f32 %v3440_v12, %v676_v56 }
 0x204   : > { %v2880_v30 = vpop.eup %2879  ;;  %v702_v33 = vmul.f32 1.442695, %v693_v27  ;;  %v1132_v34 = vmul.f32 1.442695, %v1122_v61 }
 0x205   : > { %v704_v41 = vmul.f32 1.442695, %v694_v11  ;;  %v1168_v23 = vpack.c.bf16 %v2880_v30, %v3546_v13  ;;  %v1147_v42 = vsel %vm441_vm1, %v2880_v30, 0.0 }
 0x206   : > { %2881 = vpow2.f32 %v702_v33 }
 0x207   : > { %2883 = vpow2.f32 %v1132_v34  ;;  %2612 = vmatmul.msk.bf16.vlgmr.msrb.gmra.mxu2 %vm441_vm1, %v1168_v23  ;;  %1148 = vadd.xlane.f32.xlu2 %v1147_v42 }
 0x208   : > { %2885 = vpow2.f32 %v704_v41  ;;  %2618 = vmatmul.msk.bf16.gmra.mxu1 %vm387_vm0, %v3387_v63  ;;  %1459 = vrot.lane.b32.xlu0 %v3215_v35, %s3147_s30 }
 0x209   : > { %v3558_v62 = vpop.xlane.xlu0 %494  ;;  %v1107_v12 = vpop.xlane.xlu2 %1106 }
 0x20a   : > { %4427 = vst [vmem:[#allocation8_spill] sm:$0xff] %v3558_v62  ;;  %v1123_v7 = vsub.f32 %v3457_v28, %v1107_v12  ;;  %v3561_v46 = vpop.xlane.xlu1 %497 }
 0x20b   : > { %4428 = vst [vmem:[#allocation9_spill] sm:$0xff] %v3561_v46 }
 0x20c   : > { %v3563_v48 = vpop.eup %2881  ;;  %v1134_v37 = vmul.f32 1.442695, %v1123_v7 }
 0x20d   : > { %v2884_v50 = vpop.eup %2883  ;;  %v740_v54 = vpack.c.bf16 %v3563_v48, %v2876_v24 }
 0x20e   : > { %v2886_v2 = vpop.eup %2885  ;;  %2887 = vpow2.f32 %v1134_v37  ;;  %v1150_v63 = vsel %vm441_vm1, %v2884_v50, 0.0 }
 0x20f   : > { %1151 = vadd.xlane.f32.xlu1 %v1150_v63  ;;  %2596 = vmatmul.msk.bf16.vlgmr.msra.gmra.mxu3 %vm441_vm1, %v740_v54  ;;  %v722_v57 = vsel %vm441_vm1, %v2886_v2, 0.0 }
 0x210   : > { %723 = vadd.xlane.f32.xlu2 %v722_v57  ;;  %1897 = vrot.lane.b32.xlu0 %v3208_v0, %s3149_s5 }
 0x211   : > { %v679_v28 = vpop.xlane.xlu0 %678  ;;  %v3573_v52 = vpop.xlane.xlu2 %500 }
 0x212   : > { %4430 = vst [vmem:[#allocation11_spill] sm:$0xff] %v3573_v52  ;;  %v695_v58 = vsub.f32 %v3455_v53, %v679_v28  ;;  %v1110_v59 = vpop.xlane.xlu1 %1109 }
 0x213   : > { %v1124_v4 = vsub.f32 %v3468_v26, %v1110_v59 }
 0x214   : > { %v3576_v8 = vpop.eup %2887  ;;  %v706_v10 = vmul.f32 1.442695, %v695_v58 }
 0x215   : > { %v3578_v14 = vpop.f32.mrf.mxu1  ;;  %v1169_v15 = vpack.c.bf16 %v3576_v8, %v2884_v50  ;;  %v1136_v17 = vmul.f32 1.442695, %v1124_v4 }
 0x216   : > { %4431 = vst [vmem:[#allocation12_spill] sm:$0xff] %v3578_v14  ;;  %2889 = vpow2.f32 %v706_v10 }
 0x217   : > { %2613 = vmatmul.msk.bf16.gmra.mxu2 %vm441_vm1, %v1169_v15  ;;  %2891 = vpow2.f32 %v1136_v17 }
 0x218   : > { %2619 = vmatmul.msk.bf16.gmra.mxu1 %vm387_vm0, %v3390_v1  ;;  %1681 = vrot.lane.b32.xlu0 %v3213_v22, %s3148_s4 }
 0x219   : > { %v682_v0 = vpop.xlane.xlu2 %681  ;;  %v1113_v53 = vpop.xlane.xlu0 %1112 }
 0x21a   : > { %v1125_v18 = vsub.f32 %v3478_v43, %v1113_v53  ;;  %v685_v20 = vpop.xlane.xlu1 %684  ;;  %v696_v32 = vsub.f32 %v3466_v40, %v682_v0 }
 0x21b   : > { %v697_v26 = vsub.f32 %v3476_v19, %v685_v20 }
 0x21c   : > { %v2890_v24 = vpop.eup %2889  ;;  %v1138_v25 = vmul.f32 1.442695, %v1125_v18  ;;  %v708_v22 = vmul.f32 1.442695, %v696_v32 }
 0x21d   : > { %v3590_v21 = vpop.f32.mrf.mxu1  ;;  %v725_v6 = vsel %vm441_vm1, %v2890_v24, 0.0  ;;  %v741_v1 = vpack.c.bf16 %v2890_v24, %v2886_v2  ;;  %v710_v27 = vmul.f32 1.442695, %v697_v26  ;;  %v2892_v19 = vpop.eup %2891 }
 0x21e   : > { %4432 = vst [vmem:[#allocation13_spill] sm:$0xff] %v3590_v21  ;;  %726 = vadd.xlane.f32.xlu1 %v725_v6  ;;  %2893 = vpow2.f32 %v1138_v25  ;;  %v1156_v25 = vsel %vm441_vm1, %v2892_v19, 0.0 }
 0x21f   : > { %2597 = vmatmul.msk.bf16.gmra.mxu3 %vm441_vm1, %v741_v1  ;;  %2895 = vpow2.f32 %v708_v22  ;;  %v1144_v1 = vsel %vm441_vm1, %v3546_v13, 0.0 }
 0x220   : > { %1679 = vrot.lane.b32.xlu0 %v3237_v44, %s3148_s4  ;;  %2897 = vpow2.f32 %v710_v27 }
 0x221   : > { %v3596_v40 = vpop.xlane.xlu0 %503  ;;  %v1116_v43 = vpop.xlane.xlu2 %1115 }
 0x222   : > { %4433 = vst [vmem:[#allocation14_spill] sm:$0xff] %v3596_v40  ;;  %v3598_v61 = vpop.xlane.xlu1 %506  ;;  %v1126_v11 = vsub.f32 %v3488_v49, %v1116_v43 }
 0x223   : > { %4434 = vst [vmem:[#allocation15_spill] sm:$0xff] %v3598_v61 }
 0x224   : > { %v2894_v56 = vpop.eup %2893  ;;  %v1140_v23 = vmul.f32 1.442695, %v1126_v11 }
 0x225   : > { %v3601_v30 = vpop.f32.mrf.mxu1  ;;  %v1159_v33 = vsel %vm441_vm1, %v2894_v56, 0.0  ;;  %v1170_v34 = vpack.c.bf16 %v2894_v56, %v2892_v19  ;;  %v3607_v41 = vpop.eup %2895 }
 0x226   : > { %1160 = vadd.xlane.f32.xlu1 %v1159_v33  ;;  %v2898_v49 = vpop.eup %2897  ;;  %2899 = vpow2.f32 %v1140_v23  ;;  %v882_v56 = vsel %vm441_vm1, %v3601_v30, -inf }
 0x227   : > { %2614 = vmatmul.msk.bf16.gmra.mxu2 %vm441_vm1, %v1170_v34  ;;  %v742_v57 = vpack.c.bf16 %v2898_v49, %v3607_v41  ;;  %v731_v6 = vsel %vm441_vm1, %v2898_v49, 0.0 }
 0x228   : > { %1885 = vrot.lane.b32.xlu2 %v3221_v38, %s3149_s5  ;;  %1893 = vrot.lane.b32.xlu0 %v3237_v44, %s3149_s5 }
 0x229   : > { %v688_v42 = vpop.xlane.xlu0 %687  ;;  %v3611_v12 = vpop.xlane.xlu2 %509 }
 0x22a   : > { %4435 = vst [vmem:[#allocation16_spill] sm:$0xff] %v3611_v12  ;;  %v698_v7 = vsub.f32 %v3496_v39, %v688_v42  ;;  %v1119_v37 = vpop.xlane.xlu1 %1118 }
 0x22b   : > { %v1127_v50 = vsub.f32 %v3498_v55, %v1119_v37 }
 0x22c   : > { %v712_v54 = vmul.f32 1.442695, %v698_v7  ;;  %v3622_v28 = vpop.eup %2899 }
 0x22d   : > { %v1142_v2 = vmul.f32 1.442695, %v1127_v50  ;;  %v3615_v63 = vpop.f32.mrf.mxu1 }
 0x22e   : > { %2901 = vpow2.f32 %v712_v54 }
 0x22f   : > { %2903 = vpow2.f32 %v1142_v2  ;;  %2598 = vmatmul.msk.bf16.gmra.mxu3 %vm441_vm1, %v742_v57 }
 0x230   : > { %1677 = vrot.lane.b32.xlu0 %v3240_v45, %s3148_s4 }
 0x231   : > { %v691_v44 = vpop.xlane.xlu2 %690 }
 0x232   : > { %v699_v39 = vsub.f32 %v3507_v51, %v691_v44 }
 0x234   : > { %v2902_v55 = vpop.eup %2901  ;;  %v714_v58 = vmul.f32 1.442695, %v699_v39 }
 0x235   : > { %v2904_v59 = vpop.eup %2903  ;;  %v3624_v10 = vpop.f32.mrf.mxu1  ;;  %v734_v15 = vsel %vm441_vm1, %v2902_v55, 0.0 }
 0x236   : > { %2905 = vpow2.f32 %v714_v58  ;;  %735 = vadd.xlane.f32.xlu1 %v734_v15  ;;  %v1171_v4 = vpack.c.bf16 %v2904_v59, %v3622_v28  ;;  %v888_v51 = vsel %vm441_vm1, %v3624_v10, -inf  ;;  %v1165_v27 = vsel %vm441_vm1, %v2904_v59, 0.0  ;;  %v3681_v58 = vld [vmem:[%s3227_s25 + $0x18] sm:$0xff] }
 0x238   : > { %2615 = vmatmul.msk.bf16.gmra.mxu2 %vm441_vm1, %v1171_v4 }
 0x239   : > { %v1462_v34 = vpop.permute.xlu2 %1461 }
 0x23c   : > { %v3629_v0 = vpop.eup %2905  ;;  %v1684_v45 = vpop.permute.xlu0 %1683 }
 0x23d   : > { %v3631_v53 = vpop.f32.mrf.mxu1  ;;  %v743_v17 = vpack.c.bf16 %v3629_v0, %v2902_v55  ;;  %v1707_v18 = vsel %vm387_vm0, %v1684_v45, 0 }
 0x23e   : > { %889 = vmax.xlane.f32.xlu1 %v888_v51  ;;  %1713 = vmatpush.bf16.xpose.msrb.mxu1 %v1707_v18 }
 0x23f   : > { %2599 = vmatmul.msk.bf16.gmra.mxu3 %vm441_vm1, %v743_v17 }
 0x241   : > { %v1884_v37 = vpop.permute.xlu2 %1883 }
 0x242   : > { %v1896_v33 = vpop.permute.xlu1 %1895 }
 0x243   : > { %v1918_v57 = vsel %vm387_vm0, %v1896_v33, 0 }
 0x245   : > { %v3638_v20 = vpop.f32.mrf.mxu1 }
 0x24a   : > { %v1892_v7 = vpop.permute.xlu1 %1891 }
 0x24d   : > { %v3640_v32 = vpop.f32.mrf.mxu1 }
 0x24e   : > { %v897_v24 = vsel %vm441_vm1, %v3640_v32, -inf }
 0x24f   : > { %898 = vmax.xlane.f32.xlu1 %v897_v24 }
 0x251   : > { %1157 = vadd.xlane.f32.xlu2 %v1156_v25 }
 0x255   : > { %v3645_v26 = vpop.f32.mrf.mxu1 }
 0x259   : > { %732 = vadd.xlane.f32.xlu2 %v731_v6  ;;  %v3693_v6 = vld [vmem:[%s3227_s25 + $0x8] sm:$0xff] }
 0x25a   : > { %1145 = vadd.xlane.f32.xlu0 %v1144_v1 }
 0x25d   : > { %v3650_v22 = vpop.f32.mrf.mxu1 }
 0x261   : > { %1166 = vadd.xlane.f32.xlu2 %v1165_v27 }
 0x265   : > { %v3653_v43 = vpop.f32.mrf.mxu1 }
 0x266   : > { %v1310_v19 = vsel %vm441_vm1, %v3653_v43, -inf }
 0x267   : > { %1311 = vmax.xlane.f32.xlu1 %v1310_v19  ;;  %v3663_v13 = vpop.xlane.xlu0 %512 }
 0x268   : > { %4436 = vst [vmem:[#allocation17_spill] sm:$0xff] %v3663_v13 }
 0x269   : > { %883 = vmax.xlane.f32.xlu2 %v882_v56 }
 0x26d   : > { %v3659_v11 = vpop.f32.mrf.mxu1 }
 0x26e   : > { %1669 = vrot.lane.b32.xlu0 %v3217_v36, %s3148_s4 }
 0x275   : > { %v3665_v23 = vpop.f32.mrf.mxu1  ;;  %v718_v54 = vpop.xlane.xlu1 %717 }
 0x276   : > { %v1316_v42 = vsel %vm441_vm1, %v3665_v23, -inf  ;;  %2907 = vrcp.f32 %v718_v54  ;;  %v1912_v54 = vsel %vm387_vm0, %v1892_v7, 0 }
 0x277   : > { %1317 = vmax.xlane.f32.xlu1 %v1316_v42 }
 0x27a   : > { %v1460_v49 = vpop.permute.xlu0 %1459  ;;  %v1149_v2 = vpop.xlane.xlu2 %1148 }
 0x27b   : > { %2626 = vmatmul.msk.bf16.gmra.mxu0 %vm387_vm0, %v1460_v49  ;;  %2909 = vrcp.f32 %v1149_v2  ;;  %v3705_v49 = vld [vmem:[%s3227_s25] sm:$0xff] }
 0x27c   : > { %v2908_v59 = vpop.eup %2907 }
 0x281   : > { %1887 = vrot.lane.b32.xlu2 %v3215_v35, %s3149_s5  ;;  %v2910_v4 = vpop.eup %2909 }
 0x282   : > { %v1898_v36 = vpop.permute.xlu0 %1897  ;;  %v1152_v15 = vpop.xlane.xlu1 %1151 }
 0x283   : > { %v1921_v50 = vsel %vm387_vm0, %v1898_v36, 0  ;;  %2911 = vrcp.f32 %v1152_v15  ;;  %v724_v1 = vpop.xlane.xlu2 %723 }
 0x284   : > { %1927 = vmatpush.bf16.xpose.msrb.mxu0 %v1921_v50  ;;  %2913 = vrcp.f32 %v724_v1  ;;  %v891_v1 = vsel %vm441_vm1, %v3631_v53, -inf }
 0x289   : > { %1675 = vrot.lane.b32.xlu2 %v3243_v47, %s3148_s4  ;;  %v2912_v19 = vpop.eup %2911 }
 0x28a   : > { %v3676_v44 = vpop.f32.mrf.mxu2  ;;  %v1682_v39 = vpop.permute.xlu0 %1681 }
 0x28b   : > { %v1704_v55 = vsel %vm387_vm0, %v1682_v39, 0  ;;  %2627 = vmatmul.msk.bf16.gmra.mxu0 %vm387_vm0, %v1462_v34  ;;  %v2914_v50 = vpop.eup %2913 }
 0x28c   : > { %1714 = vmatpush.bf16.xpose.msrb.mxu1 %v1704_v55  ;;  %1928 = vmatpush.bf16.xpose.msrb.mxu0 %v1918_v57 }
 0x290   : > { %1606 = vrot.lane.b32.xlu1 %v3681_v58, %s3147_s30 }
 0x291   : > { %1889 = vrot.lane.b32.xlu2 %v3243_v47, %s3149_s5  ;;  %v719_v47 = vsel %vm441_vm1, %v3563_v48, 0.0  ;;  %v1153_v48 = vsel %vm441_vm1, %v3576_v8, 0.0  ;;  %v727_v36 = vpop.xlane.xlu1 %726 }
 0x292   : > { %v777_v45 = vpop.f32.mrf.mxu3  ;;  %v1207_v51 = vpop.f32.mrf.mxu2  ;;  %2915 = vrcp.f32 %v727_v36 }
 0x293   : > { %v3687_v17 = vmul.f32 %v2908_v59, %v777_v45  ;;  %v3689_v18 = vmul.f32 %v2910_v4, %v1207_v51  ;;  %v1680_v24 = vpop.permute.xlu0 %1679  ;;  %v3720_v45 = vpop.f32.mrf.mxu1 }
 0x294   : > { %v1701_v25 = vsel %vm387_vm0, %v1680_v24, 0 }
 0x295   : > { %1715 = vmatpush.bf16.xpose.msrb.mxu1 %v1701_v25 }
 0x298   : > { %1388 = vrot.lane.b32.xlu1 %v3693_v6, %s3146_s29  ;;  %720 = vadd.xlane.f32.xlu0 %v719_v47  ;;  %v2916_v59 = vpop.eup %2915 }
 0x299   : > { %v1161_v7 = vpop.xlane.xlu1 %1160 }
 0x29a   : > { %v3699_v27 = vpop.f32.mrf.mxu3  ;;  %v1210_v56 = vpop.f32.mrf.mxu2 }
 0x29b   : > { %v1894_v33 = vpop.permute.xlu0 %1893  ;;  %v3701_v34 = vmul.f32 %v2912_v19, %v1210_v56  ;;  %v3728_v25 = vpop.f32.mrf.mxu1 }
 0x29c   : > { %v1915_v42 = vsel %vm387_vm0, %v1894_v33, 0  ;;  %v1886_v19 = vpop.permute.xlu2 %1885  ;;  %v900_v33 = vsel %vm441_vm1, %v3645_v26, -inf }
 0x29d   : > { %4437 = vst [vmem:[#allocation18_spill] sm:$0xff] %v3701_v34  ;;  %1929 = vmatpush.bf16.xpose.msrb.mxu0 %v1915_v42 }
 0x2a0   : > { %1386 = vrot.lane.b32.xlu1 %v3705_v49, %s3146_s29  ;;  %1154 = vadd.xlane.f32.xlu0 %v1153_v48 }
 0x2a2   : > { %v782_v2 = vpop.f32.mrf.mxu3  ;;  %v3724_v24 = vpop.f32.mrf.mxu2 }
 0x2a3   : > { %v3712_v57 = vmul.f32 %v2914_v50, %v782_v2  ;;  %v1678_v39 = vpop.permute.xlu0 %1677  ;;  %v3737_v48 = vpop.f32.mrf.mxu1 }
 0x2a4   : > { %v1698_v55 = vsel %vm387_vm0, %v1678_v39, 0  ;;  %v1325_v2 = vsel %vm441_vm1, %v3737_v48, -inf  ;;  %v1313_v39 = vsel %vm441_vm1, %v3659_v11, -inf }
 0x2a5   : > { %1716 = vmatpush.bf16.xpose.msrb.mxu1 %v1698_v55  ;;  %1930 = vmatpush.bf16.xpose.msrb.mxu0 %v1912_v54 }
 0x2a9   : > { %v736_v47 = vpop.xlane.xlu1 %735 }
 0x2aa   : > { %v784_v15 = vpop.f32.mrf.mxu3  ;;  %2917 = vrcp.f32 %v736_v47  ;;  %v1215_v56 = vpop.f32.mrf.mxu2 }
 0x2ab   : > { %v3715_v4 = vmul.f32 %v2916_v59, %v784_v15  ;;  %2919 = vrcp.f32 %v1161_v7  ;;  %v3745_v15 = vpop.f32.mrf.mxu1 }
 0x2ac   : > { %2640 = vmatmul.msk.bf16.vlgmr.msrb.gmra.mxu0 %vm387_vm0, %v1884_v37 }
 0x2b0   : > { %v2918_v42 = vpop.eup %2917 }
 0x2b1   : > { %v2920_v55 = vpop.eup %2919 }
 0x2b2   : > { %v3722_v51 = vpop.f32.mrf.mxu3  ;;  %v1217_v54 = vpop.f32.mrf.mxu2 }
 0x2b3   : > { %v3747_v47 = vmul.f32 %v2920_v55, %v1217_v54  ;;  %v728_v55 = vsel %vm441_vm1, %v3607_v41, 0.0  ;;  %v737_v41 = vsel %vm441_vm1, %v3629_v0, 0.0 }
 0x2b4   : > { %1671 = vrot.lane.b32.xlu0 %v3221_v38, %s3148_s4 }
 0x2ba   : > { %892 = vmax.xlane.f32.xlu2 %v891_v1  ;;  %v3732_v37 = vpop.f32.mrf.mxu3 }
 0x2bc   : > { %2641 = vmatmul.msk.bf16.gmra.mxu0 %vm387_vm0, %v1886_v19  ;;  %v1162_v19 = vsel %vm441_vm1, %v3622_v28, 0.0  ;;  %v885_v28 = vsel %vm441_vm1, %v3615_v63, -inf }
 0x2c2   : > { %901 = vmax.xlane.f32.xlu2 %v900_v33  ;;  %v792_v38 = vpop.f32.mrf.mxu3  ;;  %v1328_v33 = vsel %vm441_vm1, %v3745_v15, -inf }
 0x2c3   : > { %v3739_v36 = vmul.f32 %v2918_v42, %v792_v38  ;;  %v1322_v42 = vsel %vm441_vm1, %v3728_v25, -inf }
 0x2c4   : > { %v1158_v50 = vpop.xlane.xlu2 %1157 }
 0x2c5   : > { %2921 = vrcp.f32 %v1158_v50  ;;  %v3761_v50 = vpop.f32.mrf.mxu1 }
 0x2ca   : > { %1326 = vmax.xlane.f32.xlu1 %v1325_v2  ;;  %1314 = vmax.xlane.f32.xlu2 %v1313_v39 }
 0x2cb   : > { %v2922_v59 = vpop.eup %2921 }
 0x2cc   : > { %v3749_v1 = vmul.f32 %v2922_v59, %v1215_v56  ;;  %v3751_v7 = vpop.xlane.xlu2 %732  ;;  %v1331_v56 = vsel %vm441_vm1, %v3761_v50, -inf }
 0x2cd   : > { %v3763_v54 = vpop.xlane.xlu0 %1145 }
 0x2d2   : > { %1329 = vmax.xlane.f32.xlu1 %v1328_v33  ;;  %1323 = vmax.xlane.f32.xlu2 %v1322_v42  ;;  %v890_v42 = vpop.xlane.xlu1 %889 }
 0x2d4   : > { %v3759_v38 = vpop.xlane.xlu2 %1166 }
 0x2da   : > { %1332 = vmax.xlane.f32.xlu1 %v1331_v56  ;;  %v3777_v56 = vpop.xlane.xlu1 %898 }
 0x2dc   : > { %v884_v2 = vpop.xlane.xlu2 %883 }
 0x2dd   : > { %v906_v39 = vsub.f32 %v3601_v30, %v884_v2 }
 0x2de   : > { %729 = vadd.xlane.f32.xlu0 %v728_v55 }
 0x2df   : > { %v914_v59 = vmul.f32 1.442695, %v906_v39  ;;  %v3784_v39 = vld [vmem:[%s3227_s25 + $0x10] sm:$0xff] }
 0x2e0   : > { %v1670_v33 = vpop.permute.xlu0 %1669 }
 0x2e1   : > { %2923 = vpow2.f32 %v914_v59  ;;  %2632 = vmatmul.msk.bf16.vlgmr.msrb.gmra.mxu1 %vm387_vm0, %v1670_v33 }
 0x2e2   : > { %v1312_v2 = vpop.xlane.xlu1 %1311 }
 0x2e6   : > { %1163 = vadd.xlane.f32.xlu0 %v1162_v19  ;;  %v1888_v19 = vpop.permute.xlu2 %1887 }
 0x2e7   : > { %v3773_v8 = vpop.eup %2923  ;;  %2642 = vmatmul.msk.bf16.gmra.mxu0 %vm387_vm0, %v1888_v19 }
 0x2e8   : > { %v930_v30 = vsel %vm441_vm1, %v3773_v8, 0.0 }
 0x2e9   : > { %931 = vadd.xlane.f32.xlu1 %v930_v30 }
 0x2ea   : > { %1392 = vrot.lane.b32.xlu2 %v3681_v58, %s3146_s29  ;;  %v3791_v55 = vpop.xlane.xlu1 %1317 }
 0x2ee   : > { %738 = vadd.xlane.f32.xlu0 %v737_v41  ;;  %v3795_v0 = vpop.permute.xlu2 %1675 }
 0x2f2   : > { %1604 = vrot.lane.b32.xlu2 %v3784_v39, %s3147_s30 }
 0x2f6   : > { %886 = vmax.xlane.f32.xlu0 %v885_v28  ;;  %v1890_v33 = vpop.permute.xlu2 %1889 }
 0x2f7   : > { %2643 = vmatmul.msk.bf16.gmra.mxu0 %vm387_vm0, %v1890_v33  ;;  %v3812_v33 = vpop.f32.mrf.mxu0 }
 0x2fa   : > { %1602 = vrot.lane.b32.xlu2 %v3693_v6, %s3147_s30 }
 0x302   : > { %v1607_v59 = vpop.permute.xlu1 %1606 }
 0x303   : > { %1628 = vmatpush.bf16.msra.mxu2 %v1607_v59 }
 0x30a   : > { %1673 = vrot.lane.b32.xlu0 %v3215_v35, %s3148_s4 }
 0x30b   : > { %v721_v30 = vpop.xlane.xlu0 %720 }
 0x30c   : > { %2925 = vrcp.f32 %v721_v30 }
 0x312   : > { %v2926_v41 = vpop.eup %2925 }
 0x313   : > { %v3801_v28 = vmul.f32 %v2926_v41, %v3699_v27  ;;  %v1155_v19 = vpop.xlane.xlu0 %1154  ;;  %v908_v27 = vsub.f32 %v3624_v10, %v890_v42  ;;  %v3816_v41 = vpop.f32.mrf.mxu0 }
 0x314   : > { %2927 = vrcp.f32 %v1155_v19 }
 0x315   : > { %v918_v19 = vmul.f32 1.442695, %v908_v27  ;;  %v1334_v27 = vsub.f32 %v3653_v43, %v1312_v2 }
 0x317   : > { %2929 = vpow2.f32 %v918_v19 }
 0x31a   : > { %v2928_v59 = vpop.eup %2927 }
 0x31b   : > { %v3808_v62 = vmul.f32 %v2928_v59, %v3724_v24  ;;  %v894_v24 = vsel %vm441_vm1, %v3638_v20, -inf  ;;  %v3821_v35 = vpop.f32.mrf.mxu0 }
 0x31d   : > { %4438 = vst [vmem:[#allocation19_spill] sm:$0xff] %v3808_v62  ;;  %v3824_v31 = vpop.eup %2929 }
 0x323   : > { %v3835_v19 = vpop.f32.mrf.mxu0 }
 0x326   : > { %v1672_v30 = vpop.permute.xlu0 %1671 }
 0x327   : > { %2633 = vmatmul.msk.bf16.gmra.mxu1 %vm387_vm0, %v1672_v30 }
 0x32d   : > { %v893_v9 = vpop.xlane.xlu2 %892 }
 0x32e   : > { %v909_v3 = vsub.f32 %v3631_v53, %v893_v9  ;;  %v1342_v53 = vmul.f32 1.442695, %v1334_v27 }
 0x330   : > { %v920_v21 = vmul.f32 1.442695, %v909_v3 }
 0x332   : > { %2931 = vpow2.f32 %v920_v21  ;;  %v903_v21 = vsel %vm441_vm1, %v3650_v22, -inf }
 0x334   : > { %895 = vmax.xlane.f32.xlu0 %v894_v24 }
 0x335   : > { %v902_v59 = vpop.xlane.xlu2 %901 }
 0x336   : > { %v912_v30 = vsub.f32 %v3645_v26, %v902_v59 }
 0x338   : > { %v3826_v10 = vpop.eup %2931  ;;  %v926_v42 = vmul.f32 1.442695, %v912_v30  ;;  %v1319_v30 = vsel %vm441_vm1, %v3720_v45, -inf }
 0x339   : > { %v939_v9 = vsel %vm441_vm1, %v3826_v10, 0.0 }
 0x33a   : > { %2933 = vpow2.f32 %v926_v42  ;;  %940 = vadd.xlane.f32.xlu1 %v939_v9  ;;  %v3848_v9 = vpop.f32.mrf.mxu0 }
 0x33b   : > { %2935 = vpow2.f32 %v1342_v53  ;;  %v1524_v53 = vsel %vm441_vm1, %v3805_v5, -inf }
 0x33c   : > { %904 = vmax.xlane.f32.xlu0 %v903_v21  ;;  %v1533_v21 = vsel %vm441_vm1, %v3821_v35, -inf }
 0x33d   : > { %v1315_v26 = vpop.xlane.xlu2 %1314 }
 0x33e   : > { %v1335_v24 = vsub.f32 %v3659_v11, %v1315_v26 }
 0x340   : > { %v3838_v59 = vpop.eup %2933  ;;  %v1344_v43 = vmul.f32 1.442695, %v1335_v24 }
 0x341   : > { %v948_v2 = vsel %vm441_vm1, %v3838_v59, 0.0  ;;  %v3844_v42 = vpop.eup %2935 }
 0x342   : > { %2937 = vpow2.f32 %v1344_v43  ;;  %949 = vadd.xlane.f32.xlu1 %v948_v2  ;;  %v3856_v26 = vpop.f32.mrf.mxu0  ;;  %v1527_v2 = vsel %vm441_vm1, %v3812_v33, -inf }
 0x343   : > { %2939 = vrcp.f32 %v3751_v7  ;;  %v1542_v24 = vsel %vm441_vm1, %v3856_v26, -inf }
 0x344   : > { %1320 = vmax.xlane.f32.xlu0 %v1319_v30 }
 0x348   : > { %v3846_v27 = vpop.eup %2937 }
 0x349   : > { %v2940_v30 = vpop.eup %2939 }
 0x34a   : > { %1534 = vmax.xlane.f32.xlu1 %v1533_v21  ;;  %v1220_v21 = vpop.f32.mrf.mxu2  ;;  %v3867_v7 = vmul.f32 %v2940_v30, %v3732_v37 }
 0x34c   : > { %1525 = vmax.xlane.f32.xlu0 %v1524_v53  ;;  %v1361_v53 = vsel %vm441_vm1, %v3846_v27, 0.0 }
 0x351   : > { %v730_v43 = vpop.xlane.xlu0 %729 }
 0x352   : > { %1543 = vmax.xlane.f32.xlu1 %v1542_v24  ;;  %2941 = vrcp.f32 %v730_v43  ;;  %v1222_v16 = vpop.f32.mrf.mxu2 }
 0x353   : > { %2943 = vrcp.f32 %v3759_v38 }
 0x354   : > { %1528 = vmax.xlane.f32.xlu0 %v1527_v2 }
 0x358   : > { %v2942_v11 = vpop.eup %2941 }
 0x359   : > { %v3870_v3 = vmul.f32 %v2942_v11, %v3722_v51  ;;  %v1164_v24 = vpop.xlane.xlu0 %1163  ;;  %v2944_v2 = vpop.eup %2943 }
 0x35a   : > { %1362 = vadd.xlane.f32.xlu1 %v1361_v53  ;;  %2945 = vrcp.f32 %v1164_v24  ;;  %v3878_v13 = vmul.f32 %v2944_v2, %v1222_v16  ;;  %v794_v53 = vpop.f32.mrf.mxu3 }
 0x35e   : > { %v3874_v29 = vpop.f32.mrf.mxu1 }
 0x35f   : > { %v1738_v38 = vsel %vm441_vm1, %v3874_v29, -inf }
 0x360   : > { %v2946_v14 = vpop.eup %2945 }
 0x361   : > { %v3880_v37 = vmul.f32 %v2946_v14, %v1220_v21  ;;  %v739_v51 = vpop.xlane.xlu0 %738 }
 0x362   : > { %1739 = vmax.xlane.f32.xlu1 %v1738_v38  ;;  %2947 = vrcp.f32 %v739_v51 }
 0x368   : > { %v2948_v30 = vpop.eup %2947  ;;  %1390 = vrot.lane.b32.xlu0 %v3784_v39, %s3146_s29 }
 0x369   : > { %v3886_v24 = vmul.f32 %v2948_v30, %v794_v53  ;;  %v887_v43 = vpop.xlane.xlu0 %886  ;;  %v936_v30 = vsel %vm441_vm1, %v3824_v31, 0.0 }
 0x36a   : > { %v907_v61 = vsub.f32 %v3615_v63, %v887_v43  ;;  %v4439_v63 = vpack.c.bf16 %v3826_v10, %v3824_v31 }
 0x36c   : > { %v916_v14 = vmul.f32 1.442695, %v907_v61  ;;  %v911_v61 = vsub.f32 %v3640_v32, %v3777_v56  ;;  %v1536_v32 = vsel %vm441_vm1, %v3835_v19, -inf }
 0x36e   : > { %2949 = vpow2.f32 %v916_v14  ;;  %v924_v43 = vmul.f32 1.442695, %v911_v61 }
 0x370   : > { %1600 = vrot.lane.b32.xlu0 %v3705_v49, %s3147_s30  ;;  %2951 = vpow2.f32 %v924_v43 }
 0x374   : > { %v2950_v21 = vpop.eup %2949 }
 0x375   : > { %v933_v2 = vsel %vm441_vm1, %v2950_v21, 0.0  ;;  %v954_v38 = vpack.c.bf16 %v2950_v21, %v3773_v8  ;;  %v3905_v8 = vpop.permute.xlu1 %1388  ;;  %v1324_v21 = vpop.xlane.xlu2 %1323 }
 0x376   : > { %934 = vadd.xlane.f32.xlu2 %v933_v2  ;;  %v2952_v53 = vpop.eup %2951 }
 0x377   : > { %2604 = vmatmul.msk.bf16.vlgmr.msrb.gmra.mxu3 %vm441_vm1, %v954_v38  ;;  %v945_v14 = vsel %vm441_vm1, %v2952_v53, 0.0 }
 0x37c   : > { %v1674_v51 = vpop.permute.xlu0 %1673 }
 0x37d   : > { %2634 = vmatmul.msk.bf16.gmra.mxu1 %vm387_vm0, %v1674_v51  ;;  %v3910_v10 = vpop.permute.xlu1 %1386  ;;  %v1393_v51 = vpop.permute.xlu2 %1392 }
 0x37e   : > { %1414 = vmatpush.bf16.msra.mxu3 %v1393_v51  ;;  %v1358_v51 = vsel %vm441_vm1, %v3844_v42, 0.0 }
 0x385   : > { %v3915_v38 = vpop.xlane.xlu1 %1326 }
 0x387   : > { %2605 = vmatmul.msk.bf16.gmra.mxu3 %vm441_vm1, %v4439_v63  ;;  %v3917_v63 = vpop.f32.mrf.mxu0 }
 0x388   : > { %v1545_v43 = vsel %vm441_vm1, %v3917_v63, -inf }
 0x38d   : > { %2635 = vmatmul.msk.bf16.gmra.mxu1 %vm387_vm0, %v3795_v0 }
 0x39a   : > { %937 = vadd.xlane.f32.xlu0 %v936_v30 }
 0x3a2   : > { %946 = vadd.xlane.f32.xlu0 %v945_v14 }
 0x3a7   : > { %v896_v2 = vpop.xlane.xlu0 %895 }
 0x3a8   : > { %v910_v0 = vsub.f32 %v3638_v20, %v896_v2 }
 0x3aa   : > { %v922_v56 = vmul.f32 1.442695, %v910_v0  ;;  %1537 = vmax.xlane.f32.xlu0 %v1536_v32  ;;  %v1330_v0 = vpop.xlane.xlu1 %1329 }
 0x3ac   : > { %2953 = vpow2.f32 %v922_v56  ;;  %v1605_v56 = vpop.permute.xlu2 %1604 }
 0x3ad   : > { %1629 = vmatpush.bf16.msra.mxu2 %v1605_v56 }
 0x3af   : > { %v905_v31 = vpop.xlane.xlu0 %904 }
 0x3b0   : > { %v913_v61 = vsub.f32 %v3650_v22, %v905_v31  ;;  %v1336_v22 = vsub.f32 %v3665_v23, %v3791_v55 }
 0x3b2   : > { %v2954_v30 = vpop.eup %2953  ;;  %v928_v20 = vmul.f32 1.442695, %v913_v61  ;;  %1546 = vmax.xlane.f32.xlu0 %v1545_v43  ;;  %v1340_v43 = vsub.f32 %v3745_v15, %v1330_v0  ;;  %v1530_v15 = vsel %vm441_vm1, %v3816_v41, -inf }
 0x3b3   : > { %v942_v14 = vsel %vm441_vm1, %v2954_v30, 0.0  ;;  %v956_v2 = vpack.c.bf16 %v2952_v53, %v2954_v30 }
 0x3b4   : > { %2955 = vpow2.f32 %v928_v20  ;;  %943 = vadd.xlane.f32.xlu2 %v942_v14  ;;  %v1346_v20 = vmul.f32 1.442695, %v1336_v22  ;;  %v1354_v14 = vmul.f32 1.442695, %v1340_v43  ;;  %v1603_v23 = vpop.permute.xlu2 %1602  ;;  %v1539_v43 = vsel %vm441_vm1, %v3848_v9, -inf }
 0x3b5   : > { %2606 = vmatmul.msk.bf16.gmra.mxu3 %vm441_vm1, %v956_v2  ;;  %v3931_v2 = vpop.f32.mrf.mxu1  ;;  %1630 = vmatpush.bf16.msra.mxu2 %v1603_v23  ;;  %v1333_v23 = vpop.xlane.xlu1 %1332 }
 0x3b6   : > { %v1741_v55 = vsel %vm441_vm1, %v3931_v2, -inf }
 0x3b7   : > { %v1321_v32 = vpop.xlane.xlu0 %1320 }
 0x3b8   : > { %v1337_v31 = vsub.f32 %v3720_v45, %v1321_v32  ;;  %v1338_v45 = vsub.f32 %v3728_v25, %v1324_v21 }
 0x3ba   : > { %v2956_v61 = vpop.eup %2955  ;;  %v1348_v53 = vmul.f32 1.442695, %v1337_v31  ;;  %1359 = vadd.xlane.f32.xlu0 %v1358_v51  ;;  %v1350_v22 = vmul.f32 1.442695, %v1338_v45 }
 0x3bb   : > { %v951_v30 = vsel %vm441_vm1, %v2956_v61, 0.0  ;;  %v957_v56 = vpack.c.bf16 %v2956_v61, %v3838_v59 }
 0x3bc   : > { %2957 = vpow2.f32 %v1348_v53  ;;  %952 = vadd.xlane.f32.xlu2 %v951_v30 }
 0x3bd   : > { %2959 = vpow2.f32 %v1346_v20 }
 0x3be   : > { %2961 = vpow2.f32 %v1354_v14  ;;  %v3950_v14 = vpop.f32.mrf.mxu0 }
 0x3bf   : > { %v1526_v21 = vpop.xlane.xlu0 %1525  ;;  %2963 = vpow2.f32 %v1350_v22 }
 0x3c0   : > { %v1548_v45 = vsub.f32 %v3805_v5, %v1526_v21 }
 0x3c2   : > { %v2958_v32 = vpop.eup %2957  ;;  %1742 = vmax.xlane.f32.xlu0 %v1741_v55 }
 0x3c3   : > { %v1367_v0 = vsel %vm441_vm1, %v2958_v32, 0.0  ;;  %v2960_v25 = vpop.eup %2959 }
 0x3c4   : > { %1531 = vmax.xlane.f32.xlu2 %v1530_v15  ;;  %1368 = vadd.xlane.f32.xlu1 %v1367_v0  ;;  %v3941_v31 = vpop.eup %2961  ;;  %v1364_v51 = vsel %vm441_vm1, %v2960_v25, 0.0  ;;  %v1341_v15 = vsub.f32 %v3761_v50, %v1333_v23  ;;  %v1556_v0 = vmul.f32 1.442695, %v1548_v45 }
 0x3c5   : > { %2607 = vmatmul.msk.bf16.gmra.mxu3 %vm441_vm1, %v957_v56  ;;  %v1376_v53 = vsel %vm441_vm1, %v3941_v31, 0.0  ;;  %v2964_v59 = vpop.eup %2963  ;;  %v1952_v56 = vsel %vm441_vm1, %v3950_v14, -inf }
 0x3c6   : > { %v1370_v30 = vsel %vm441_vm1, %v2964_v59, 0.0 }
 0x3c7   : > { %v1529_v61 = vpop.xlane.xlu0 %1528 }
 0x3c8   : > { %v1549_v20 = vsub.f32 %v3812_v33, %v1529_v61  ;;  %v4440_v61 = vpack.c.bf16 %v3846_v27, %v3844_v42 }
 0x3ca   : > { %1365 = vadd.xlane.f32.xlu0 %v1364_v51  ;;  %v1558_v55 = vmul.f32 1.442695, %v1549_v20  ;;  %v1356_v51 = vmul.f32 1.442695, %v1341_v15  ;;  %v1339_v20 = vsub.f32 %v3737_v48, %v3915_v38 }
 0x3cc   : > { %1540 = vmax.xlane.f32.xlu2 %v1539_v43  ;;  %1377 = vadd.xlane.f32.xlu1 %v1376_v53  ;;  %2965 = vpow2.f32 %v1558_v55  ;;  %v3956_v43 = vpop.f32.mrf.mxu0  ;;  %v1352_v42 = vmul.f32 1.442695, %v1339_v20 }
 0x3cd   : > { %2967 = vpow2.f32 %v1556_v0  ;;  %v1955_v5 = vsel %vm441_vm1, %v3956_v43, -inf }
 0x3ce   : > { %2969 = vpow2.f32 %v1356_v51 }
 0x3d2   : > { %1371 = vadd.xlane.f32.xlu0 %v1370_v30  ;;  %v3959_v33 = vpop.eup %2965  ;;  %v1383_v30 = vpack.c.bf16 %v2958_v32, %v2960_v25 }
 0x3d3   : > { %v3963_v21 = vpop.eup %2967 }
 0x3d4   : > { %v1596_v53 = vpack.c.bf16 %v3959_v33, %v3963_v21  ;;  %v3987_v48 = vpop.f32.mrf.mxu0 }
 0x3da   : > { %v1391_v22 = vpop.permute.xlu0 %1390  ;;  %1953 = vmax.xlane.f32.xlu0 %v1952_v56  ;;  %v3993_v56 = vpop.f32.mrf.mxu1 }
 0x3db   : > { %1415 = vmatpush.bf16.msra.mxu3 %v1391_v22 }
 0x3df   : > { %1416 = vmatpush.bf16.msra.mxu3 %v3905_v8  ;;  %v2970_v8 = vpop.eup %2969 }
 0x3e2   : > { %v1601_v50 = vpop.permute.xlu0 %1600  ;;  %1956 = vmax.xlane.f32.xlu0 %v1955_v5 }
 0x3e3   : > { %1417 = vmatpush.bf16.msra.mxu3 %v3910_v10  ;;  %1631 = vmatpush.bf16.msra.mxu2 %v1601_v50  ;;  %v1379_v10 = vsel %vm441_vm1, %v2970_v8, 0.0 }
 0x3e4   : > { %1820 = vrot.lane.b32.xlu2 %v3681_v58, %s3148_s4 }
 0x3e5   : > { %2034 = vrot.lane.b32.xlu1 %v3681_v58, %s3149_s5  ;;  %v932_v58 = vpop.xlane.xlu1 %931 }
 0x3e6   : > { %2620 = vmatmul.msk.bf16.vlgmr.msra.gmra.mxu3 %vm441_vm1, %v4440_v61  ;;  %2628 = vmatmul.msk.bf16.vlgmr.msra.gmra.mxu2 %vm441_vm1, %v1596_v53  ;;  %2971 = vrcp.f32 %v932_v58  ;;  %v3999_v53 = vpop.f32.mrf.mxu0 }
 0x3e9   : > { %v935_v27 = vpop.xlane.xlu2 %934 }
 0x3ea   : > { %1380 = vadd.xlane.f32.xlu0 %v1379_v10  ;;  %2973 = vrcp.f32 %v935_v27  ;;  %v4001_v10 = vpop.f32.mrf.mxu1  ;;  %v1385_v27 = vpack.c.bf16 %v2970_v8, %v3941_v31 }
 0x3eb   : > { %2975 = vpow2.f32 %v1352_v42 }
 0x3ec   : > { %v2972_v45 = vpop.eup %2971 }
 0x3ed   : > { %2030 = vrot.lane.b32.xlu1 %v3693_v6, %s3149_s5  ;;  %v941_v51 = vpop.xlane.xlu1 %940 }
 0x3ee   : > { %2977 = vrcp.f32 %v941_v51  ;;  %v1958_v51 = vsel %vm441_vm1, %v3987_v48, -inf }
 0x3f0   : > { %v2974_v32 = vpop.eup %2973 }
 0x3f1   : > { %v2976_v55 = vpop.eup %2975 }
 0x3f2   : > { %v1384_v0 = vpack.c.bf16 %v2976_v55, %v2964_v59  ;;  %v1373_v50 = vsel %vm441_vm1, %v2976_v55, 0.0 }
 0x3f4   : > { %v2978_v59 = vpop.eup %2977 }
 0x3f5   : > { %2028 = vrot.lane.b32.xlu1 %v3705_v49, %s3149_s5  ;;  %v4005_v42 = vpop.xlane.xlu1 %949 }
 0x3f6   : > { %2621 = vmatmul.msk.bf16.gmra.mxu3 %vm441_vm1, %v1383_v30 }
 0x3fa   : > { %v991_v23 = vpop.f32.mrf.mxu3 }
 0x3fb   : > { %v3989_v38 = vmul.f32 %v2972_v45, %v991_v23  ;;  %v4008_v23 = vpop.f32.mrf.mxu0 }
 0x3fe   : > { %2032 = vrot.lane.b32.xlu0 %v3784_v39, %s3149_s5 }
 0x402   : > { %v993_v25 = vpop.f32.mrf.mxu3 }
 0x403   : > { %v3991_v15 = vmul.f32 %v2974_v32, %v993_v25  ;;  %v4013_v25 = vpop.f32.mrf.mxu1 }
 0x406   : > { %2622 = vmatmul.msk.bf16.gmra.mxu3 %vm441_vm1, %v1384_v0 }
 0x40a   : > { %v996_v5 = vpop.f32.mrf.mxu3 }
 0x40b   : > { %v4021_v31 = vpop.f32.mrf.mxu1 }
 0x40d   : > { %v938_v61 = vpop.xlane.xlu0 %937  ;;  %1374 = vadd.xlane.f32.xlu2 %v1373_v50  ;;  %v1535_v50 = vpop.xlane.xlu1 %1534 }
 0x40e   : > { %2979 = vrcp.f32 %v938_v61  ;;  %v4019_v61 = vpop.f32.mrf.mxu0 }
 0x412   : > { %v998_v30 = vpop.f32.mrf.mxu3 }
 0x413   : > { %v4003_v20 = vmul.f32 %v2978_v59, %v998_v30  ;;  %v1747_v30 = vsel %vm441_vm1, %v4001_v10, -inf }
 0x414   : > { %v2980_v58 = vpop.eup %2979 }
 0x415   : > { %v4010_v45 = vmul.f32 %v2980_v58, %v996_v5  ;;  %v947_v32 = vpop.xlane.xlu0 %946  ;;  %v1753_v5 = vsel %vm441_vm1, %v4021_v31, -inf  ;;  %v4031_v58 = vpop.xlane.xlu1 %1543 }
 0x416   : > { %2623 = vmatmul.msk.bf16.gmra.mxu3 %vm441_vm1, %v1385_v27  ;;  %v4033_v27 = vpop.f32.mrf.mxu0 }
 0x41d   : > { %v1538_v0 = vpop.xlane.xlu0 %1537  ;;  %v4046_v22 = vpop.xlane.xlu1 %1362 }
 0x41e   : > { %v4048_v55 = vpop.f32.mrf.mxu0  ;;  %v1552_v46 = vsub.f32 %v3835_v19, %v1538_v0 }
 0x41f   : > { %1959 = vmax.xlane.f32.xlu1 %v1958_v51  ;;  %v4035_v51 = vpop.f32.mrf.mxu1 }
 0x425   : > { %v4023_v8 = vpop.xlane.xlu0 %1546  ;;  %1818 = vrot.lane.b32.xlu2 %v3784_v39, %s3148_s4  ;;  %v1756_v39 = vsel %vm441_vm1, %v4035_v51, -inf  ;;  %v1740_v52 = vpop.xlane.xlu1 %1739 }
 0x427   : > { %v944_v59 = vpop.xlane.xlu2 %943  ;;  %1754 = vmax.xlane.f32.xlu1 %v1753_v5  ;;  %v1750_v5 = vsel %vm441_vm1, %v4013_v25, -inf }
 0x428   : > { %1748 = vmax.xlane.f32.xlu0 %v1747_v30  ;;  %2981 = vrcp.f32 %v944_v59  ;;  %v1551_v30 = vsub.f32 %v3821_v35, %v1535_v50  ;;  %v1967_v59 = vsel %vm441_vm1, %v4019_v61, -inf }
 0x429   : > { %2983 = vrcp.f32 %v947_v32  ;;  %v1762_v32 = vsub.f32 %v3874_v29, %v1740_v52  ;;  %v1555_v29 = vsub.f32 %v3917_v63, %v4023_v8 }
 0x42d   : > { %v4037_v11 = vpop.xlane.xlu0 %1359  ;;  %1816 = vrot.lane.b32.xlu2 %v3693_v6, %s3148_s4  ;;  %v1973_v6 = vsel %vm441_vm1, %v4048_v55, -inf }
 0x42f   : > { %v953_v16 = vpop.xlane.xlu2 %952  ;;  %1757 = vmax.xlane.f32.xlu1 %v1756_v39  ;;  %v1562_v39 = vmul.f32 1.442695, %v1551_v30 }
 0x430   : > { %1751 = vmax.xlane.f32.xlu0 %v1750_v5  ;;  %v2982_v5 = vpop.eup %2981 }
 0x431   : > { %2985 = vpow2.f32 %v1562_v39  ;;  %v2984_v34 = vpop.eup %2983 }
 0x435   : > { %1814 = vrot.lane.b32.xlu2 %v3705_v49, %s3148_s4  ;;  %v4054_v40 = vpop.xlane.xlu0 %1742 }
 0x437   : > { %v1532_v60 = vpop.xlane.xlu2 %1531  ;;  %1974 = vmax.xlane.f32.xlu1 %v1973_v6  ;;  %v1970_v6 = vsel %vm441_vm1, %v4033_v27, -inf }
 0x438   : > { %v1550_v35 = vsub.f32 %v3816_v41, %v1532_v60  ;;  %v1001_v50 = vpop.f32.mrf.mxu3  ;;  %1968 = vmax.xlane.f32.xlu0 %v1967_v59  ;;  %v4067_v59 = vpop.eup %2985 }
 0x439   : > { %v4059_v12 = vmul.f32 %v2982_v5, %v1001_v50 }
 0x43a   : > { %v1560_v49 = vmul.f32 1.442695, %v1550_v35  ;;  %v1564_v35 = vmul.f32 1.442695, %v1552_v46  ;;  %v1575_v46 = vsel %vm441_vm1, %v3959_v33, 0.0 }
 0x43c   : > { %2987 = vpow2.f32 %v1560_v49 }
 0x43d   : > { %v4064_v62 = vpop.xlane.xlu0 %1365 }
 0x43f   : > { %v1541_v30 = vpop.xlane.xlu2 %1540 }
 0x440   : > { %v1553_v60 = vsub.f32 %v3848_v9, %v1541_v30  ;;  %v1003_v41 = vpop.f32.mrf.mxu3  ;;  %1971 = vmax.xlane.f32.xlu0 %v1970_v6  ;;  %v1770_v9 = vmul.f32 1.442695, %v1762_v32  ;;  %v4076_v30 = vpop.xlane.xlu1 %1368 }
 0x441   : > { %v4070_v39 = vmul.f32 %v2984_v34, %v1003_v41 }
 0x442   : > { %v2988_v5 = vpop.eup %2987  ;;  %v1566_v19 = vmul.f32 1.442695, %v1553_v60  ;;  %v1570_v60 = vmul.f32 1.442695, %v1555_v29 }
 0x443   : > { %v2749_v0 = vpack.i.bf16 %v4070_v39, %v4059_v12  ;;  %v1578_v50 = vsel %vm441_vm1, %v2988_v5, 0.0  ;;  %v1597_v49 = vpack.c.bf16 %v4067_v59, %v2988_v5 }
 0x444   : > { %2989 = vpow2.f32 %v1566_v19  ;;  %1579 = vadd.xlane.f32.xlu1 %v1578_v50 }
 0x445   : > { %2629 = vmatmul.msk.bf16.gmra.mxu2 %vm441_vm1, %v1597_v49  ;;  %2991 = vpow2.f32 %v1564_v35  ;;  %v4084_v41 = vpop.xlane.xlu0 %1371 }
 0x446   : > { %2993 = vrcp.f32 %v4005_v42 }
 0x447   : > { %v1821_v52 = vpop.permute.xlu2 %1820  ;;  %2995 = vpow2.f32 %v1770_v9 }
 0x448   : > { %v1006_v34 = vpop.f32.mrf.mxu3  ;;  %1576 = vadd.xlane.f32.xlu0 %v1575_v46  ;;  %1842 = vmatpush.bf16.msrb.mxu3 %v1821_v52  ;;  %2997 = vrcp.f32 %v953_v16  ;;  %v4089_v33 = vpop.xlane.xlu1 %1377  ;;  %v1554_v52 = vsub.f32 %v3856_v26, %v4031_v58  ;;  %v1961_v58 = vsel %vm441_vm1, %v3999_v53, -inf }
 0x449   : > { %2999 = vpow2.f32 %v1570_v60 }
 0x44a   : > { %v2990_v6 = vpop.eup %2989 }
 0x44b   : > { %v1587_v32 = vsel %vm441_vm1, %v2990_v6, 0.0  ;;  %v2992_v5 = vpop.eup %2991 }
 0x44c   : > { %1588 = vadd.xlane.f32.xlu1 %v1587_v32  ;;  %v2994_v63 = vpop.eup %2993  ;;  %v1584_v42 = vsel %vm441_vm1, %v2992_v5, 0.0  ;;  %v1598_v29 = vpack.c.bf16 %v2990_v6, %v2992_v5 }
 0x44d   : > { %v4087_v8 = vpop.eup %2995  ;;  %v4092_v50 = vmul.f32 %v2994_v63, %v1006_v34  ;;  %v1954_v60 = vpop.xlane.xlu0 %1953  ;;  %v1568_v63 = vmul.f32 1.442695, %v1554_v52 }
 0x44e   : > { %v2998_v35 = vpop.eup %2997  ;;  %v1786_v9 = vsel %vm441_vm1, %v4087_v8, 0.0 }
 0x44f   : > { %v3000_v46 = vpop.eup %2999  ;;  %3001 = vpow2.f32 %v1568_v63 }
 0x450   : > { %v1008_v19 = vpop.f32.mrf.mxu3  ;;  %1585 = vadd.xlane.f32.xlu0 %v1584_v42  ;;  %v1593_v34 = vsel %vm441_vm1, %v3000_v46, 0.0  ;;  %v1744_v42 = vsel %vm441_vm1, %v3993_v56, -inf  ;;  %3003 = vrcp.f32 %v4037_v11 }
 0x451   : > { %v4094_v16 = vmul.f32 %v2998_v35, %v1008_v19  ;;  %3005 = vrcp.f32 %v4046_v22 }
 0x453   : > { %v2754_v49 = vpack.i.bf16 %v4094_v16, %v4092_v50 }
 0x454   : > { %1787 = vadd.xlane.f32.xlu1 %v1786_v9 }
 0x455   : > { %2630 = vmatmul.msk.bf16.gmra.mxu2 %vm441_vm1, %v1598_v29  ;;  %v1957_v35 = vpop.xlane.xlu0 %1956  ;;  %v3002_v6 = vpop.eup %3001 }
 0x456   : > { %v1599_v26 = vpack.c.bf16 %v3000_v46, %v3002_v6  ;;  %v3004_v19 = vpop.eup %3003  ;;  %v1977_v9 = vsub.f32 %v3956_v43, %v1957_v35  ;;  %v4119_v43 = vpop.f32.mrf.mxu1 }
 0x457   : > { %v2035_v32 = vpop.permute.xlu1 %2034  ;;  %v1759_v22 = vsel %vm441_vm1, %v4119_v43, -inf }
 0x458   : > { %1594 = vadd.xlane.f32.xlu0 %v1593_v34  ;;  %2056 = vmatpush.bf16.msrb.mxu2 %v2035_v32  ;;  %v1976_v34 = vsub.f32 %v3950_v14, %v1954_v60  ;;  %v1986_v46 = vmul.f32 1.442695, %v1977_v9  ;;  %v1964_v32 = vsel %vm441_vm1, %v4008_v23, -inf }
 0x45a   : > { %v1984_v63 = vmul.f32 1.442695, %v1976_v34  ;;  %3007 = vpow2.f32 %v1986_v46 }
 0x45c   : > { %3009 = vpow2.f32 %v1984_v63 }
 0x45d   : > { %v4110_v5 = vpop.xlane.xlu0 %1380  ;;  %3011 = vrcp.f32 %v4076_v30  ;;  %v1763_v30 = vsub.f32 %v3931_v2, %v4054_v40 }
 0x45e   : > { %1745 = vmax.xlane.f32.xlu2 %v1744_v42  ;;  %3013 = vrcp.f32 %v4064_v62 }
 0x45f   : > { %v2031_v11 = vpop.permute.xlu1 %2030  ;;  %3015 = vrcp.f32 %v4084_v41 }
 0x465   : > { %2631 = vmatmul.msk.bf16.gmra.mxu2 %vm441_vm1, %v1599_v26  ;;  %v3006_v26 = vpop.eup %3005 }
 0x466   : > { %1962 = vmax.xlane.f32.xlu2 %v1961_v58 }
 0x467   : > { %v2029_v60 = vpop.permute.xlu1 %2028 }
 0x469   : > { %v1419_v29 = vpop.f32.mrf.mxu3 }
 0x46a   : > { %v4113_v52 = vmul.f32 %v3004_v19, %v1419_v29  ;;  %v4127_v19 = vpop.eup %3007 }
 0x46b   : > { %v4129_v9 = vpop.eup %3009 }
 0x46c   : > { %v2024_v34 = vpack.c.bf16 %v4127_v19, %v4129_v9  ;;  %v3012_v46 = vpop.eup %3011 }
 0x46d   : > { %v3014_v63 = vpop.eup %3013 }
 0x46e   : > { %1965 = vmax.xlane.f32.xlu2 %v1964_v32 }
 0x470   : > { %v2033_v42 = vpop.permute.xlu0 %2032 }
 0x471   : > { %v1421_v58 = vpop.f32.mrf.mxu3  ;;  %2057 = vmatpush.bf16.msrb.mxu2 %v2033_v42 }
 0x472   : > { %v4121_v35 = vmul.f32 %v3006_v26, %v1421_v58 }
 0x474   : > { %v2779_v14 = vpack.i.bf16 %v4121_v35, %v4113_v52 }
 0x475   : > { %2058 = vmatpush.bf16.msrb.mxu2 %v2031_v11  ;;  %v1572_v11 = vsel %vm441_vm1, %v3963_v21, 0.0  ;;  %v1772_v21 = vmul.f32 1.442695, %v1763_v30 }
 0x476   : > { %1760 = vmax.xlane.f32.xlu2 %v1759_v22  ;;  %v1581_v22 = vsel %vm441_vm1, %v4067_v59, 0.0 }
 0x479   : > { %v1424_v29 = vpop.f32.mrf.mxu3  ;;  %2059 = vmatpush.bf16.msrb.mxu2 %v2029_v60 }
 0x47a   : > { %v4138_v26 = vmul.f32 %v3014_v63, %v1424_v29  ;;  %v1590_v29 = vsel %vm441_vm1, %v3002_v6, 0.0 }
 0x47c   : > { %2644 = vmatmul.msk.bf16.vlgmr.msrb.gmra.mxu2 %vm441_vm1, %v2024_v34 }
 0x47e   : > { %1573 = vadd.xlane.f32.xlu2 %v1572_v11  ;;  %v3016_v11 = vpop.eup %3015 }
 0x480   : > { %v1375_v32 = vpop.xlane.xlu2 %1374 }
 0x481   : > { %v1426_v42 = vpop.f32.mrf.mxu3  ;;  %3017 = vrcp.f32 %v1375_v32 }
 0x482   : > { %v4140_v58 = vmul.f32 %v3012_v46, %v1426_v42  ;;  %3019 = vpow2.f32 %v1772_v21 }
 0x483   : > { %3021 = vrcp.f32 %v4089_v33 }
 0x484   : > { %v2784_v62 = vpack.i.bf16 %v4140_v58, %v4138_v26  ;;  %3023 = vrcp.f32 %v4110_v5 }
 0x486   : > { %1582 = vadd.xlane.f32.xlu2 %v1581_v22 }
 0x487   : > { %v3018_v2 = vpop.eup %3017 }
 0x488   : > { %v1819_v60 = vpop.permute.xlu2 %1818  ;;  %v3020_v63 = vpop.eup %3019 }
 0x489   : > { %v1429_v34 = vpop.f32.mrf.mxu3  ;;  %1843 = vmatpush.bf16.msrb.mxu3 %v1819_v60  ;;  %v1789_v41 = vsel %vm441_vm1, %v3020_v63, 0.0  ;;  %v1810_v21 = vpack.c.bf16 %v3020_v63, %v4087_v8 }
 0x48a   : > { %v4150_v42 = vmul.f32 %v3016_v11, %v1429_v34 }
 0x48e   : > { %1591 = vadd.xlane.f32.xlu2 %v1590_v29 }
 0x490   : > { %v1817_v40 = vpop.permute.xlu2 %1816 }
 0x491   : > { %v1431_v46 = vpop.f32.mrf.mxu3  ;;  %1844 = vmatpush.bf16.msrb.mxu3 %v1817_v40  ;;  %v3022_v40 = vpop.eup %3021 }
 0x492   : > { %v4152_v59 = vmul.f32 %v3018_v2, %v1431_v46  ;;  %v1960_v30 = vpop.xlane.xlu1 %1959  ;;  %v3024_v2 = vpop.eup %3023 }
 0x494   : > { %v2789_v22 = vpack.i.bf16 %v4152_v59, %v4150_v42  ;;  %v4449_v42 = vld [vmem:[#allocation19_spill] sm:$0xff]  ;;  %v4450_v59 = vld [vmem:[#allocation18_spill] sm:$0xff] }
 0x496   : > { %1790 = vadd.xlane.f32.xlu2 %v1789_v41 }
 0x498   : > { %v1815_v32 = vpop.permute.xlu2 %1814 }
 0x499   : > { %v1434_v6 = vpop.f32.mrf.mxu3  ;;  %1845 = vmatpush.bf16.msrb.mxu3 %v1815_v32 }
 0x49a   : > { %v1755_v60 = vpop.xlane.xlu1 %1754  ;;  %v4162_v41 = vmul.f32 %v3022_v40, %v1434_v6 }
 0x49b   : > { %v1749_v34 = vpop.xlane.xlu0 %1748 }
 0x49c   : > { %v1765_v29 = vsub.f32 %v4001_v10, %v1749_v34  ;;  %2636 = vmatmul.msk.bf16.vlgmr.msrb.gmra.mxu3 %vm441_vm1, %v1810_v21 }
 0x49e   : > { %v1776_v11 = vmul.f32 1.442695, %v1765_v29 }
 0x4a0   : > { %3025 = vpow2.f32 %v1776_v11 }
 0x4a1   : > { %v1436_v46 = vpop.f32.mrf.mxu3 }
 0x4a2   : > { %v4164_v32 = vmul.f32 %v3024_v2, %v1436_v46  ;;  %v1758_v8 = vpop.xlane.xlu1 %1757 }
 0x4a3   : > { %v1768_v33 = vsub.f32 %v4035_v51, %v1758_v8  ;;  %v1752_v63 = vpop.xlane.xlu0 %1751 }
 0x4a4   : > { %v1766_v10 = vsub.f32 %v4013_v25, %v1752_v63  ;;  %v2003_v25 = vsel %vm441_vm1, %v4127_v19, 0.0 }
 0x4a5   : > { %v1782_v34 = vmul.f32 1.442695, %v1768_v33  ;;  %v1767_v33 = vsub.f32 %v4021_v31, %v1755_v60 }
 0x4a6   : > { %v3026_v21 = vpop.eup %3025  ;;  %v1778_v29 = vmul.f32 1.442695, %v1766_v10  ;;  %v1978_v10 = vsub.f32 %v3987_v48, %v1960_v30 }
 0x4a7   : > { %3027 = vpow2.f32 %v1782_v34  ;;  %v1795_v11 = vsel %vm441_vm1, %v3026_v21, 0.0  ;;  %v1780_v34 = vmul.f32 1.442695, %v1767_v33 }
 0x4a8   : > { %3029 = vpow2.f32 %v1778_v29  ;;  %1796 = vadd.xlane.f32.xlu1 %v1795_v11  ;;  %v1988_v29 = vmul.f32 1.442695, %v1978_v10 }
 0x4aa   : > { %v1975_v31 = vpop.xlane.xlu1 %1974 }
 0x4ad   : > { %v4171_v6 = vpop.eup %3027 }
 0x4ae   : > { %v3030_v40 = vpop.eup %3029  ;;  %v1804_v51 = vsel %vm441_vm1, %v4171_v6, 0.0 }
 0x4af   : > { %v1798_v2 = vsel %vm441_vm1, %v3030_v40, 0.0 }
 0x4b0   : > { %1799 = vadd.xlane.f32.xlu2 %v1798_v2  ;;  %1805 = vadd.xlane.f32.xlu1 %v1804_v51 }
 0x4b8   : > { %2004 = vadd.xlane.f32.xlu1 %v2003_v25 }
 0x4d1   : > { %v1746_v46 = vpop.xlane.xlu2 %1745 }
 0x4d2   : > { %v1764_v8 = vsub.f32 %v3993_v56, %v1746_v46  ;;  %v1969_v56 = vpop.xlane.xlu0 %1968 }
 0x4d4   : > { %v1774_v63 = vmul.f32 1.442695, %v1764_v8 }
 0x4d6   : > { %3031 = vpow2.f32 %v1774_v63 }
 0x4d7   : > { %3033 = vpow2.f32 %v1780_v34 }
 0x4d8   : > { %3035 = vpow2.f32 %v1988_v29 }
 0x4d9   : > { %v1963_v11 = vpop.xlane.xlu2 %1962 }
 0x4da   : > { %v1979_v5 = vsub.f32 %v3999_v53, %v1963_v11  ;;  %v1983_v53 = vsub.f32 %v4048_v55, %v1975_v31  ;;  %v1972_v29 = vpop.xlane.xlu0 %1971 }
 0x4db   : > { %v1982_v55 = vsub.f32 %v4033_v27, %v1972_v29  ;;  %v4442_v29 = vpack.i.bf16 %v3715_v4, %v3712_v57  ;;  %v4445_v57 = vpack.i.bf16 %v3801_v28, %v3687_v17  ;;  %v4447_v17 = vpack.i.bf16 %v3878_v13, %v3880_v37 }
 0x4dc   : > { %v3032_v2 = vpop.eup %3031  ;;  %v1990_v51 = vmul.f32 1.442695, %v1979_v5  ;;  %v1981_v5 = vsub.f32 %v4019_v61, %v1969_v56  ;;  %v1998_v10 = vmul.f32 1.442695, %v1983_v53  ;;  %v2000_v61 = vsel %vm441_vm1, %v4129_v9, 0.0 }
 0x4dd   : > { %v1792_v19 = vsel %vm441_vm1, %v3032_v2, 0.0  ;;  %v1811_v25 = vpack.c.bf16 %v3026_v21, %v3032_v2  ;;  %v3034_v30 = vpop.eup %3033  ;;  %v1996_v56 = vmul.f32 1.442695, %v1982_v55  ;;  %v4448_v28 = vpack.i.bf16 %v3747_v47, %v3749_v1 }
 0x4de   : > { %3037 = vpow2.f32 %v1990_v51  ;;  %1793 = vadd.xlane.f32.xlu0 %v1792_v19  ;;  %v3036_v46 = vpop.eup %3035  ;;  %v1801_v63 = vsel %vm441_vm1, %v3034_v30, 0.0  ;;  %v1994_v34 = vmul.f32 1.442695, %v1981_v5 }
 0x4df   : > { %2637 = vmatmul.msk.bf16.gmra.mxu3 %vm441_vm1, %v1811_v25  ;;  %v1812_v25 = vpack.c.bf16 %v3034_v30, %v3030_v40  ;;  %v4198_v40 = vpop.f32.mrf.mxu2 }
 0x4e1   : > { %v1966_v48 = vpop.xlane.xlu2 %1965 }
 0x4e2   : > { %v1980_v60 = vsub.f32 %v4008_v23, %v1966_v48 }
 0x4e4   : > { %v3038_v8 = vpop.eup %3037  ;;  %v1992_v33 = vmul.f32 1.442695, %v1980_v60 }
 0x4e5   : > { %v2025_v21 = vpack.c.bf16 %v3038_v8, %v3036_v46  ;;  %v2009_v60 = vsel %vm441_vm1, %v3038_v8, 0.0 }
 0x4e6   : > { %3039 = vpow2.f32 %v1992_v33  ;;  %1802 = vadd.xlane.f32.xlu0 %v1801_v63  ;;  %v2006_v33 = vsel %vm441_vm1, %v3036_v46, 0.0  ;;  %v4441_v46 = vpack.i.bf16 %v3867_v7, %v3870_v3  ;;  %v4444_v3 = vpack.i.bf16 %v3991_v15, %v3989_v38 }
 0x4e7   : > { %2645 = vmatmul.msk.bf16.gmra.mxu2 %vm441_vm1, %v2025_v21  ;;  %3041 = vpow2.f32 %v1998_v10  ;;  %v1635_v8 = vpop.f32.mrf.mxu2  ;;  %v4446_v38 = vpack.i.bf16 %v3886_v24, %v3739_v36 }
 0x4e8   : > { %3043 = vpow2.f32 %v1994_v34 }
 0x4e9   : > { %v1761_v11 = vpop.xlane.xlu2 %1760 }
 0x4ea   : > { %v1769_v23 = vsub.f32 %v4119_v43, %v1761_v11 }
 0x4ec   : > { %v3040_v2 = vpop.eup %3039  ;;  %v1784_v51 = vmul.f32 1.442695, %v1769_v23 }
 0x4ed   : > { %v2012_v19 = vsel %vm441_vm1, %v3040_v2, 0.0  ;;  %v3042_v31 = vpop.eup %3041 }
 0x4ee   : > { %3045 = vpow2.f32 %v1784_v51  ;;  %2001 = vadd.xlane.f32.xlu0 %v2000_v61  ;;  %2013 = vadd.xlane.f32.xlu1 %v2012_v19  ;;  %v3044_v43 = vpop.eup %3043  ;;  %v2021_v9 = vsel %vm441_vm1, %v3042_v31, 0.0  ;;  %v1580_v51 = vpop.xlane.xlu1 %1579 }
 0x4ef   : > { %2638 = vmatmul.msk.bf16.gmra.mxu3 %vm441_vm1, %v1812_v25  ;;  %3047 = vpow2.f32 %v1996_v56  ;;  %v2026_v53 = vpack.c.bf16 %v3044_v43, %v3040_v2  ;;  %v2015_v21 = vsel %vm441_vm1, %v3044_v43, 0.0  ;;  %v1638_v34 = vpop.f32.mrf.mxu2  ;;  %v4443_v2 = vpack.i.bf16 %v4003_v20, %v4010_v45  ;;  %v1577_v61 = vpop.xlane.xlu0 %1576 }
 0x4f0   : > { %3049 = vrcp.f32 %v3763_v54 }
 0x4f4   : > { %v3046_v48 = vpop.eup %3045 }
 0x4f5   : > { %v1807_v27 = vsel %vm441_vm1, %v3046_v48, 0.0  ;;  %v3048_v30 = vpop.eup %3047  ;;  %v1813_v63 = vpack.c.bf16 %v3046_v48, %v4171_v6  ;;  %v1574_v6 = vpop.xlane.xlu2 %1573 }
 0x4f6   : > { %1808 = vadd.xlane.f32.xlu2 %v1807_v27  ;;  %2010 = vadd.xlane.f32.xlu0 %v2009_v60  ;;  %v2018_v5 = vsel %vm441_vm1, %v3048_v30, 0.0  ;;  %v2027_v10 = vpack.c.bf16 %v3042_v31, %v3048_v30  ;;  %v3050_v23 = vpop.eup %3049  ;;  %v1589_v20 = vpop.xlane.xlu1 %1588  ;;  %v4452_v30 = vpack.i.bf16 %v4164_v32, %v4162_v41 }
 0x4f7   : > { %2022 = vadd.xlane.f32.xlu1 %v2021_v9  ;;  %2646 = vmatmul.msk.bf16.gmra.mxu2 %vm441_vm1, %v2026_v53  ;;  %v1640_v11 = vpop.f32.mrf.mxu2  ;;  %v1233_v55 = vmul.f32 %v3050_v23, %v3676_v44 }
 0x4f9   : > { %v2759_v4 = vpack.i.bf16 %v3689_v18, %v1233_v55  ;;  %v1586_v18 = vpop.xlane.xlu0 %1585 }
 0x4fd   : > { %v1583_v7 = vpop.xlane.xlu2 %1582 }
 0x4fe   : > { %2007 = vadd.xlane.f32.xlu2 %v2006_v33  ;;  %2019 = vadd.xlane.f32.xlu0 %v2018_v5  ;;  %3051 = vrcp.f32 %v1583_v7  ;;  %v1788_v1 = vpop.xlane.xlu1 %1787 }
 0x4ff   : > { %2639 = vmatmul.msk.bf16.gmra.mxu3 %vm441_vm1, %v1813_v63  ;;  %v4221_v54 = vpop.f32.mrf.mxu2  ;;  %3053 = vrcp.f32 %v1574_v6 }
 0x500   : > { %3055 = vrcp.f32 %v1580_v51 }
 0x501   : > { %3057 = vrcp.f32 %v1577_v61 }
 0x504   : > { %v3052_v36 = vpop.eup %3051 }
 0x505   : > { %v1592_v44 = vpop.xlane.xlu2 %1591  ;;  %v3054_v13 = vpop.eup %3053  ;;  %v1664_v50 = vmul.f32 %v3052_v36, %v1640_v11 }
 0x506   : > { %2016 = vadd.xlane.f32.xlu2 %v2015_v21  ;;  %v3056_v47 = vpop.eup %3055  ;;  %3059 = vrcp.f32 %v1592_v44  ;;  %v1661_v16 = vmul.f32 %v3054_v13, %v4198_v40 }
 0x507   : > { %2647 = vmatmul.msk.bf16.gmra.mxu2 %vm441_vm1, %v2027_v10  ;;  %v1645_v15 = vpop.f32.mrf.mxu2  ;;  %v3058_v12 = vpop.eup %3057  ;;  %v1663_v39 = vmul.f32 %v3056_v47, %v1638_v34  ;;  %v4453_v47 = vld [vmem:[#allocation9_spill] sm:$0xff] }
 0x509   : > { %v2804_v19 = vpack.i.bf16 %v1664_v50, %v1663_v39 }
 0x50c   : > { %v3060_v56 = vpop.eup %3059 }
 0x50d   : > { %v1791_v24 = vpop.xlane.xlu2 %1790 }
 0x50e   : > { %3061 = vrcp.f32 %v1791_v24 }
 0x50f   : > { %v1648_v37 = vpop.f32.mrf.mxu2  ;;  %3063 = vrcp.f32 %v1788_v1 }
 0x510   : > { %2730 = vrot.lane.b32.xlu1 %v4441_v46, %s3150_s6  ;;  %v1667_v48 = vmul.f32 %v3060_v56, %v1648_v37 }
 0x512   : > { %2725 = vrot.lane.b32.xlu0 %v4442_v29, %s3150_s6 }
 0x514   : > { %v3062_v58 = vpop.eup %3061 }
 0x515   : > { %v3064_v31 = vpop.eup %3063 }
 0x517   : > { %v1650_v43 = vpop.f32.mrf.mxu2 }
 0x518   : > { %2745 = vrot.lane.b32.xlu1 %v4443_v2, %s3151_s7 }
 0x51a   : > { %2740 = vrot.lane.b32.xlu0 %v4444_v3, %s3151_s7 }
 0x51b   : > { %v1797_v35 = vpop.xlane.xlu1 %1796 }
 0x51e   : > { %2720 = vrot.lane.b32.xlu2 %v4445_v57, %s3150_s6 }
 0x51f   : > { %v1847_v45 = vpop.f32.mrf.mxu3 }
 0x520   : > { %2760 = vrot.lane.b32.xlu1 %v2759_v4, %s3152_s8  ;;  %v1875_v27 = vmul.f32 %v3064_v31, %v1847_v45 }
 0x522   : > { %2755 = vrot.lane.b32.xlu0 %v2754_v49, %s3151_s7  ;;  %v1662_v49 = vmul.f32 %v3058_v12, %v1635_v8 }
 0x523   : > { %v1806_v34 = vpop.xlane.xlu1 %1805  ;;  %v1800_v46 = vpop.xlane.xlu2 %1799 }
 0x524   : > { %v2799_v26 = vpack.i.bf16 %v1662_v49, %v1661_v16  ;;  %v4454_v49 = vld [vmem:[#allocation11_spill] sm:$0xff] }
 0x526   : > { %2735 = vrot.lane.b32.xlu2 %v4446_v38, %s3150_s6 }
 0x527   : > { %v1849_v25 = vpop.f32.mrf.mxu3 }
 0x528   : > { %2775 = vrot.lane.b32.xlu1 %v4447_v17, %s3152_s8 }
 0x52a   : > { %2770 = vrot.lane.b32.xlu0 %v4448_v28, %s3152_s8 }
 0x52b   : > { %v2005_v41 = vpop.xlane.xlu1 %2004 }
 0x52e   : > { %2750 = vrot.lane.b32.xlu2 %v2749_v0, %s3151_s7  ;;  %v1595_v0 = vpop.xlane.xlu0 %1594 }
 0x52f   : > { %3065 = vrcp.f32 %v1595_v0 }
 0x530   : > { %2790 = vrot.lane.b32.xlu1 %v2789_v22, %s3153_s9  ;;  %v4451_v22 = vpack.i.bf16 %v4449_v42, %v4450_v59  ;;  %3067 = vrcp.f32 %v1589_v20  ;;  %v4455_v59 = vld [vmem:[#allocation16_spill] sm:$0xff] }
 0x531   : > { %3069 = vrcp.f32 %v1586_v18 }
 0x532   : > { %2785 = vrot.lane.b32.xlu0 %v2784_v62, %s3153_s9  ;;  %v1876_v62 = vmul.f32 %v3062_v58, %v1849_v25  ;;  %3071 = vrcp.f32 %v1797_v35 }
 0x534   : > { %v2819_v9 = vpack.i.bf16 %v1876_v62, %v1875_v27 }
 0x535   : > { %v3066_v60 = vpop.eup %3065 }
 0x536   : > { %2765 = vrot.lane.b32.xlu2 %v4451_v22, %s3152_s8  ;;  %v1668_v53 = vmul.f32 %v3066_v60, %v1650_v43  ;;  %v3068_v33 = vpop.eup %3067  ;;  %v4456_v43 = vld [vmem:[#allocation4_spill] sm:$0xff] }
 0x537   : > { %v1666_v5 = vmul.f32 %v3068_v33, %v1645_v15  ;;  %v3070_v63 = vpop.eup %3069 }
 0x538   : > { %2805 = vrot.lane.b32.xlu1 %v2804_v19, %s3154_s10  ;;  %v2814_v40 = vpack.i.bf16 %v1668_v53, %v1667_v48  ;;  %v1665_v8 = vmul.f32 %v3070_v63, %v4221_v54  ;;  %v3072_v32 = vpop.eup %3071 }
 0x53a   : > { %2800 = vrot.lane.b32.xlu0 %v2799_v26, %s3154_s10  ;;  %v2809_v21 = vpack.i.bf16 %v1666_v5, %v1665_v8  ;;  %v4459_v5 = vld [vmem:[#allocation17_spill] sm:$0xff] }
 0x53e   : > { %2780 = vrot.lane.b32.xlu2 %v2779_v14, %s3153_s9  ;;  %v2061_v14 = vpop.f32.mrf.mxu2 }
 0x540   : > { %2820 = vrot.lane.b32.xlu1 %v2819_v9, %s3155_s11  ;;  %v4457_v9 = vld [vmem:[#allocation14_spill] sm:$0xff] }
 0x542   : > { %2815 = vrot.lane.b32.xlu0 %v2814_v40, %s3154_s10 }
 0x546   : > { %2795 = vrot.lane.b32.xlu2 %v4452_v30, %s3153_s9  ;;  %v2063_v29 = vpop.f32.mrf.mxu2  ;;  %v4458_v30 = vld [vmem:[#allocation15_spill] sm:$0xff] }
 0x54e   : > { %2810 = vrot.lane.b32.xlu2 %v2809_v21, %s3154_s10  ;;  %v4460_v21 = vld [vmem:[#allocation5_spill] sm:$0xff] }
 0x551   : > { %v1794_v52 = vpop.xlane.xlu0 %1793 }
 0x552   : > { %3073 = vrcp.f32 %v1794_v52 }
 0x558   : > { %v3074_v2 = vpop.eup %3073 }
 0x559   : > { %v1803_v10 = vpop.xlane.xlu0 %1802 }
 0x561   : > { %v2002_v11 = vpop.xlane.xlu0 %2001  ;;  %v2014_v61 = vpop.xlane.xlu1 %2013 }
 0x562   : > { %v1852_v6 = vpop.f32.mrf.mxu3  ;;  %3075 = vrcp.f32 %v2002_v11 }
 0x563   : > { %3077 = vrcp.f32 %v2005_v41  ;;  %v1877_v3 = vmul.f32 %v3074_v2, %v1852_v6 }
 0x564   : > { %3079 = vrcp.f32 %v1800_v46 }
 0x565   : > { %3081 = vrcp.f32 %v1803_v10  ;;  %v4461_v10 = vld [vmem:[#allocation12_spill] sm:$0xff] }
 0x568   : > { %v3076_v57 = vpop.eup %3075 }
 0x569   : > { %v1809_v23 = vpop.xlane.xlu2 %1808  ;;  %v3078_v4 = vpop.eup %3077  ;;  %v2089_v44 = vmul.f32 %v3076_v57, %v2061_v14 }
 0x56a   : > { %v1854_v55 = vpop.f32.mrf.mxu3  ;;  %v2066_v54 = vpop.f32.mrf.mxu2  ;;  %v2090_v17 = vmul.f32 %v3078_v4, %v2063_v29 }
 0x56b   : > { %v1878_v7 = vmul.f32 %v3072_v32, %v1854_v55  ;;  %v2011_v15 = vpop.xlane.xlu0 %2010  ;;  %v3080_v45 = vpop.eup %3079 }
 0x56c   : > { %v2839_v28 = vpack.i.bf16 %v2090_v17, %v2089_v44  ;;  %v3082_v24 = vpop.eup %3081  ;;  %v2023_v13 = vpop.xlane.xlu1 %2022 }
 0x56d   : > { %v2824_v51 = vpack.i.bf16 %v1878_v7, %v1877_v3 }
 0x56f   : > { %2825 = vrot.lane.b32.xlu2 %v2824_v51, %s3155_s11 }
 0x571   : > { %v2008_v38 = vpop.xlane.xlu2 %2007 }
 0x572   : > { %v1857_v20 = vpop.f32.mrf.mxu3  ;;  %v2068_v18 = vpop.f32.mrf.mxu2  ;;  %3083 = vrcp.f32 %v2008_v38 }
 0x573   : > { %3085 = vrcp.f32 %v4453_v47  ;;  %v1879_v1 = vmul.f32 %v3080_v45, %v1857_v20  ;;  %v2020_v39 = vpop.xlane.xlu0 %2019  ;;  %v4463_v45 = vld [vmem:[#allocation10_spill] sm:$0xff] }
 0x574   : > { %3087 = vrcp.f32 %v2011_v15 }
 0x575   : > { %3089 = vrcp.f32 %v4454_v49 }
 0x576   : > { %3091 = vrcp.f32 %v4455_v59 }
 0x577   : > { %2840 = vrot.lane.b32.xlu2 %v2839_v28, %s3156_s12  ;;  %3093 = vrcp.f32 %v1806_v34 }
 0x578   : > { %v3084_v16 = vpop.eup %3083  ;;  %3095 = vrcp.f32 %v1809_v23 }
 0x579   : > { %v2017_v36 = vpop.xlane.xlu2 %2016  ;;  %v3086_v42 = vpop.eup %3085  ;;  %v2091_v22 = vmul.f32 %v3084_v16, %v2066_v54  ;;  %3097 = vrcp.f32 %v4457_v9  ;;  %v4464_v16 = vld [vmem:[#allocation13_spill] sm:$0xff] }
 0x57a   : > { %v1859_v37 = vpop.f32.mrf.mxu3  ;;  %v4271_v12 = vpop.f32.mrf.mxu2  ;;  %v593_v48 = vmul.f32 %v3086_v42, %v4456_v43  ;;  %3099 = vrcp.f32 %v4458_v30 }
 0x57b   : > { %v1880_v50 = vmul.f32 %v3082_v24, %v1859_v37  ;;  %v3088_v25 = vpop.eup %3087  ;;  %3101 = vrcp.f32 %v4459_v5 }
 0x57c   : > { %v2092_v58 = vmul.f32 %v3088_v25, %v2068_v18  ;;  %v3090_v53 = vpop.eup %3089  ;;  %3103 = vrcp.f32 %v2014_v61  ;;  %v4462_v18 = vld [vmem:[#allocation7_spill] sm:$0xff] }
 0x57d   : > { %v2829_v0 = vpack.i.bf16 %v1880_v50, %v1879_v1  ;;  %v3092_v40 = vpop.eup %3091  ;;  %v594_v52 = vmul.f32 %v3090_v53, %v4460_v21  ;;  %3105 = vrcp.f32 %v2017_v36 }
 0x57e   : > { %v2844_v27 = vpack.i.bf16 %v2092_v58, %v2091_v22  ;;  %v3094_v8 = vpop.eup %3093  ;;  %v597_v34 = vmul.f32 %v3092_v40, %v4461_v10  ;;  %3107 = vrcp.f32 %v2023_v13 }
 0x57f   : > { %2830 = vrot.lane.b32.xlu0 %v2829_v0, %s3155_s11  ;;  %v3096_v14 = vpop.eup %3095  ;;  %3109 = vrcp.f32 %v2020_v39 }
 0x580   : > { %v3098_v55 = vpop.eup %3097 }
 0x581   : > { %v4276_v19 = vpop.permute.xlu2 %2720  ;;  %v3100_v51 = vpop.eup %3099  ;;  %v595_v28 = vmul.f32 %v3098_v55, %v4462_v18  ;;  %v4465_v18 = vld [vmem:[#allocation6_spill] sm:$0xff] }
 0x582   : > { %v4278_v56 = vpop.permute.xlu1 %2730  ;;  %v1862_v26 = vpop.f32.mrf.mxu3  ;;  %v596_v36 = vmul.f32 %v3100_v51, %v4463_v45  ;;  %3111 = vrcp.f32 %v4465_v18  ;;  %v4466_v45 = vld [vmem:[#allocation8_spill] sm:$0xff] }
 0x583   : > { %v2073_v62 = vpop.f32.mrf.mxu2  ;;  %v1881_v11 = vmul.f32 %v3094_v8, %v1862_v26  ;;  %v3102_v44 = vpop.eup %3101  ;;  %v2733_v15 = vunpack.i.h.bf16 %v4278_v56  ;;  %v2732_v20 = vunpack.i.l.bf16 %v4278_v56  ;;  %3113 = vrcp.f32 %v4466_v45 }
 0x584   : > { %v2726_v31 = vpop.permute.xlu0 %2725  ;;  %v3104_v38 = vpop.eup %3103  ;;  %v598_v49 = vmul.f32 %v3102_v44, %v4464_v16  ;;  %v4467_v16 = vld [vmem:[#allocation2_spill] sm:$0xff] }
 0x585   : > { %v2727_v60 = vunpack.i.l.bf16 %v2726_v31  ;;  %v2728_v63 = vunpack.i.h.bf16 %v2726_v31  ;;  %v3106_v17 = vpop.eup %3105  ;;  %v2093_v42 = vmul.f32 %v3104_v38, %v4271_v12  ;;  %v2326_v59 = vsel %vm387_vm0, %v596_v36, %v2733_v15 }
 0x586   : > { %v2094_v24 = vmul.f32 %v3106_v17, %v2073_v62  ;;  %v3108_v37 = vpop.eup %3107  ;;  %v2325_v22 = vsel %vm387_vm0, %v595_v28, %v2732_v20 }
 0x587   : > { %v2323_v33 = vsel %vm387_vm0, %v593_v48, %v2727_v60  ;;  %2845 = vrot.lane.b32.xlu0 %v2844_v27, %s3156_s12  ;;  %v2324_v3 = vsel %vm387_vm0, %v594_v52, %v2728_v63  ;;  %v3110_v0 = vpop.eup %3109 }
 0x588   : > { %v2849_v43 = vpack.i.bf16 %v2094_v24, %v2093_v42  ;;  %v3112_v36 = vpop.eup %3111  ;;  %v4468_v42 = vld [vmem:[#allocation3_spill] sm:$0xff] }
 0x589   : > { %v2736_v35 = vpop.permute.xlu2 %2735  ;;  %v3114_v24 = vpop.eup %3113 }
 0x58a   : > { %v2737_v46 = vunpack.i.l.bf16 %v2736_v35  ;;  %v2746_v6 = vpop.permute.xlu1 %2745  ;;  %v1864_v29 = vpop.f32.mrf.mxu3  ;;  %v2738_v47 = vunpack.i.h.bf16 %v2736_v35 }
 0x58b   : > { %v2748_v41 = vunpack.i.h.bf16 %v2746_v6  ;;  %v2747_v32 = vunpack.i.l.bf16 %v2746_v6  ;;  %v1882_v23 = vmul.f32 %v3096_v14, %v1864_v29  ;;  %v2076_v2 = vpop.f32.mrf.mxu2 }
 0x58c   : > { %v2327_v7 = vsel %vm387_vm0, %v597_v34, %v2737_v46  ;;  %v4290_v54 = vpop.permute.xlu0 %2740  ;;  %v2095_v56 = vmul.f32 %v3110_v0, %v2076_v2  ;;  %v2328_v60 = vsel %vm387_vm0, %v598_v49, %v2738_v47  ;;  %v2722_v47 = vunpack.i.l.bf16 %v4276_v19 }
 0x58d   : > { %v2333_v57 = vsel %vm2329_vm2, %v2324_v3, %v2748_v41  ;;  %v2332_v4 = vsel %vm2329_vm2, %v2323_v33, %v2747_v32  ;;  %v2834_v61 = vpack.i.bf16 %v1882_v23, %v1881_v11  ;;  %v591_v49 = vmul.f32 %v3112_v36, %v4467_v16 }
 0x58f   : > { %2835 = vrot.lane.b32.xlu1 %v2834_v61, %s3155_s11 }
 0x591   : > { %v2751_v13 = vpop.permute.xlu2 %2750 }
 0x592   : > { %v2753_v1 = vunpack.i.h.bf16 %v2751_v13  ;;  %v2752_v50 = vunpack.i.l.bf16 %v2751_v13  ;;  %v4299_v39 = vpop.permute.xlu1 %2760 }
 0x593   : > { %v2078_v25 = vpop.f32.mrf.mxu2 }
 0x594   : > { %v2334_v26 = vsel %vm2329_vm2, %v2325_v22, %v2752_v50  ;;  %v2335_v58 = vsel %vm2329_vm2, %v2326_v59, %v2753_v1  ;;  %v2096_v62 = vmul.f32 %v3108_v37, %v2078_v25  ;;  %v2756_v31 = vpop.permute.xlu0 %2755  ;;  %v2723_v37 = vunpack.i.h.bf16 %v4276_v19 }
 0x595   : > { %v2758_v48 = vunpack.i.h.bf16 %v2756_v31  ;;  %v2757_v27 = vunpack.i.l.bf16 %v2756_v31  ;;  %v2743_v1 = vunpack.i.h.bf16 %v4290_v54  ;;  %v2742_v50 = vunpack.i.l.bf16 %v4290_v54 }
 0x596   : > { %v2854_v53 = vpack.i.bf16 %v2096_v62, %v2095_v56  ;;  %v592_v59 = vmul.f32 %v3114_v24, %v4468_v42  ;;  %v2763_v22 = vunpack.i.h.bf16 %v4299_v39  ;;  %v2762_v25 = vunpack.i.l.bf16 %v4299_v39 }
 0x597   : > { %v2337_v12 = vsel %vm2329_vm2, %v2328_v60, %v2758_v48  ;;  %v2336_v9 = vsel %vm2329_vm2, %v2327_v7, %v2757_v27  ;;  %2850 = vrot.lane.b32.xlu1 %v2849_v43, %s3156_s12  ;;  %v2321_v19 = vsel %vm387_vm0, %v591_v49, %v2722_v47 }
 0x598   : > { %2855 = vrot.lane.b32.xlu2 %v2854_v53, %s3156_s12  ;;  %v2322_v62 = vsel %vm387_vm0, %v592_v59, %v2723_v37  ;;  %v2330_v48 = vsel %vm2329_vm2, %v2321_v19, %v2742_v50 }
 0x599   : > { %v2766_v40 = vpop.permute.xlu2 %2765  ;;  %v2331_v54 = vsel %vm2329_vm2, %v2322_v62, %v2743_v1  ;;  %v2339_v39 = vsel %vm2338_vm3, %v2330_v48, %v2762_v25 }
 0x59a   : > { %v2768_v30 = vunpack.i.h.bf16 %v2766_v40  ;;  %v2767_v33 = vunpack.i.l.bf16 %v2766_v40  ;;  %v2776_v5 = vpop.permute.xlu1 %2775  ;;  %v2340_v53 = vsel %vm2338_vm3, %v2331_v54, %v2763_v22 }
 0x59b   : > { %v2778_v63 = vunpack.i.h.bf16 %v2776_v5  ;;  %v2777_v8 = vunpack.i.l.bf16 %v2776_v5 }
 0x59c   : > { %v4313_v21 = vsel %vm2338_vm3, %v2332_v4, %v2767_v33  ;;  %v4316_v52 = vsel %vm2338_vm3, %v2333_v57, %v2768_v30  ;;  %v2771_v35 = vpop.permute.xlu0 %2770 }
 0x59d   : > { %v2346_v14 = vsel %vm2338_vm3, %v2337_v12, %v2778_v63  ;;  %v2345_v10 = vsel %vm2338_vm3, %v2336_v9, %v2777_v8  ;;  %v2773_v34 = vunpack.i.h.bf16 %v2771_v35  ;;  %v2772_v46 = vunpack.i.l.bf16 %v2771_v35 }
 0x59f   : > { %v2343_v6 = vsel %vm2338_vm3, %v2334_v26, %v2772_v46  ;;  %v2344_v29 = vsel %vm2338_vm3, %v2335_v58, %v2773_v34 }
 0x5a1   : > { %v2781_v11 = vpop.permute.xlu2 %2780 }
 0x5a2   : > { %v2791_v41 = vpop.permute.xlu1 %2790  ;;  %v2783_v26 = vunpack.i.h.bf16 %v2781_v11  ;;  %v2782_v58 = vunpack.i.l.bf16 %v2781_v11 }
 0x5a3   : > { %v2793_v32 = vunpack.i.h.bf16 %v2791_v41  ;;  %v2792_v23 = vunpack.i.l.bf16 %v2791_v41 }
 0x5a4   : > { %v2786_v17 = vpop.permute.xlu0 %2785  ;;  %v2348_v12 = vsel %vm2347_vm4, %v2339_v39, %v2782_v58  ;;  %v2349_v9 = vsel %vm2347_vm4, %v2340_v53, %v2783_v26 }
 0x5a5   : > { %v2352_v2 = vsel %vm2347_vm4, %v2343_v6, %v2792_v23  ;;  %v2353_v55 = vsel %vm2347_vm4, %v2344_v29, %v2793_v32  ;;  %v2788_v11 = vunpack.i.h.bf16 %v2786_v17  ;;  %v2787_v41 = vunpack.i.l.bf16 %v2786_v17 }
 0x5a9   : > { %v2796_v3 = vpop.permute.xlu2 %2795 }
 0x5aa   : > { %v2798_v7 = vunpack.i.h.bf16 %v2796_v3  ;;  %v2797_v51 = vunpack.i.l.bf16 %v2796_v3  ;;  %v2806_v28 = vpop.permute.xlu1 %2805  ;;  %v2350_v3 = vsel %vm2347_vm4, %v4313_v21, %v2787_v41 }
 0x5ab   : > { %v2808_v32 = vunpack.i.h.bf16 %v2806_v28  ;;  %v2807_v23 = vunpack.i.l.bf16 %v2806_v28 }
 0x5ac   : > { %v4325_v57 = vsel %vm2347_vm4, %v2345_v10, %v2797_v51  ;;  %v4328_v4 = vsel %vm2347_vm4, %v2346_v14, %v2798_v7  ;;  %v2801_v0 = vpop.permute.xlu0 %2800  ;;  %v2351_v7 = vsel %vm2347_vm4, %v4316_v52, %v2788_v11 }
 0x5ad   : > { %v2803_v31 = vunpack.i.h.bf16 %v2801_v0  ;;  %v2802_v43 = vunpack.i.l.bf16 %v2801_v0 }
 0x5af   : > { %v2357_v30 = vsel %vm2356_vm5, %v2348_v12, %v2802_v43  ;;  %v2358_v33 = vsel %vm2356_vm5, %v2349_v9, %v2803_v31 }
 0x5b1   : > { %v2811_v61 = vpop.permute.xlu2 %2810 }
 0x5b2   : > { %v2813_v44 = vunpack.i.h.bf16 %v2811_v61  ;;  %v2812_v38 = vunpack.i.l.bf16 %v2811_v61  ;;  %v2821_v56 = vpop.permute.xlu1 %2820  ;;  %v2359_v61 = vsel %vm2356_vm5, %v2350_v3, %v2807_v23 }
 0x5b3   : > { %v2823_v27 = vunpack.i.h.bf16 %v2821_v56  ;;  %v2822_v60 = vunpack.i.l.bf16 %v2821_v56 }
 0x5b4   : > { %v4331_v15 = vsel %vm2356_vm5, %v2352_v2, %v2812_v38  ;;  %v4334_v20 = vsel %vm2356_vm5, %v2353_v55, %v2813_v44  ;;  %v2816_v6 = vpop.permute.xlu0 %2815  ;;  %v2360_v44 = vsel %vm2356_vm5, %v2351_v7, %v2808_v32 }
 0x5b5   : > { %v2366_v8 = vsel %vm2365_vm6, %v2357_v30, %v2822_v60  ;;  %v2367_v35 = vsel %vm2365_vm6, %v2358_v33, %v2823_v27  ;;  %v2817_v52 = vunpack.i.l.bf16 %v2816_v6 }
 0x5b7   : > { %v2363_v0 = vsel %vm2356_vm5, %v4325_v57, %v2817_v52 }
 0x5c9   : > { %v2826_v13 = vpop.permute.xlu2 %2825 }
 0x5ca   : > { %v2828_v2 = vunpack.i.h.bf16 %v2826_v13  ;;  %v2827_v55 = vunpack.i.l.bf16 %v2826_v13  ;;  %v2818_v13 = vunpack.i.h.bf16 %v2816_v6 }
 0x5cc   : > { %v2368_v17 = vsel %vm2365_vm6, %v2359_v61, %v2827_v55  ;;  %v2369_v28 = vsel %vm2365_vm6, %v2360_v44, %v2828_v2  ;;  %v2364_v16 = vsel %vm2356_vm5, %v4328_v4, %v2818_v13 }
 0x5d1   : > { %v2841_v40 = vpop.permute.xlu2 %2840 }
 0x5d2   : > { %v2843_v5 = vunpack.i.h.bf16 %v2841_v40  ;;  %v2842_v63 = vunpack.i.l.bf16 %v2841_v40 }
 0x5d4   : > { %v2375_v14 = vsel %vm2374_vm7, %v2366_v8, %v2842_v63  ;;  %v2376_v10 = vsel %vm2374_vm7, %v2367_v35, %v2843_v5 }
 0x5d5   : > { %v2383_v34 = vpack.c.bf16 %v2375_v14, %v2375_v14  ;;  %v2384_v46 = vpack.c.bf16 %v2376_v10, %v2376_v10 }
 0x5d7   : > { %2392 = vst.msk [vmem:[%s4362_s19] sm:$0xf] %vm2391_vm8, %v2383_v34 }
 0x5d8   : > { %2393 = vst.msk [vmem:[%s4362_s19 + $0x4] sm:$0xf] %vm2391_vm8, %v2384_v46 }
 0x5f1   : > { %v2831_v29 = vpop.permute.xlu0 %2830 }
 0x5f2   : > { %v2856_v37 = vpop.permute.xlu2 %2855  ;;  %v2833_v62 = vunpack.i.h.bf16 %v2831_v29  ;;  %v2832_v19 = vunpack.i.l.bf16 %v2831_v29 }
 0x5f3   : > { %v2858_v49 = vunpack.i.h.bf16 %v2856_v37  ;;  %v2857_v42 = vunpack.i.l.bf16 %v2856_v37 }
 0x5f4   : > { %v2370_v43 = vsel %vm2365_vm6, %v4331_v15, %v2832_v19  ;;  %v2371_v54 = vsel %vm2365_vm6, %v4334_v20, %v2833_v62 }
 0x5f9   : > { %v2846_v51 = vpop.permute.xlu0 %2845 }
 0x5fa   : > { %v2848_v38 = vunpack.i.h.bf16 %v2846_v51  ;;  %v2847_v18 = vunpack.i.l.bf16 %v2846_v51 }
 0x5fc   : > { %v2377_v45 = vsel %vm2374_vm7, %v2368_v17, %v2847_v18  ;;  %v2378_v36 = vsel %vm2374_vm7, %v2369_v28, %v2848_v38 }
 0x5fd   : > { %v2385_v21 = vpack.c.bf16 %v2377_v45, %v2377_v45  ;;  %v2386_v24 = vpack.c.bf16 %v2378_v36, %v2378_v36 }
 0x5ff   : > { %2394 = vst.msk [vmem:[%s4362_s19 + $0x8] sm:$0xf] %vm2391_vm8, %v2385_v21 }
 0x600   : > { %2395 = vst.msk [vmem:[%s4362_s19 + $0xc] sm:$0xf] %vm2391_vm8, %v2386_v24 }
 0x601   : > { %v2836_v47 = vpop.permute.xlu1 %2835 }
 0x602   : > { %v2838_v1 = vunpack.i.h.bf16 %v2836_v47  ;;  %v2837_v50 = vunpack.i.l.bf16 %v2836_v47 }
 0x604   : > { %v2372_v59 = vsel %vm2365_vm6, %v2363_v0, %v2837_v50  ;;  %v2373_v22 = vsel %vm2365_vm6, %v2364_v16, %v2838_v1 }
 0x605   : > { %v2381_v25 = vsel %vm2374_vm7, %v2372_v59, %v2857_v42  ;;  %v2382_v56 = vsel %vm2374_vm7, %v2373_v22, %v2858_v49 }
 0x606   : > { %v2389_v26 = vpack.c.bf16 %v2381_v25, %v2381_v25  ;;  %v2390_v58 = vpack.c.bf16 %v2382_v56, %v2382_v56 }
 0x608   : > { %2398 = vst.msk [vmem:[%s4362_s19 + $0x18] sm:$0xf] %vm2391_vm8, %v2389_v26 }
 0x609   : > { %2399 = vst.msk [vmem:[%s4362_s19 + $0x1c] sm:$0xf] %vm2391_vm8, %v2390_v58  ;;  %v2851_v57 = vpop.permute.xlu1 %2850 }
 0x60a   : > { %v2853_v4 = vunpack.i.h.bf16 %v2851_v57  ;;  %v2852_v31 = vunpack.i.l.bf16 %v2851_v57 }
 0x60c   : > { %v2379_v48 = vsel %vm2374_vm7, %v2370_v43, %v2852_v31  ;;  %v2380_v27 = vsel %vm2374_vm7, %v2371_v54, %v2853_v4 }
 0x60d   : > { %v2387_v60 = vpack.c.bf16 %v2379_v48, %v2379_v48  ;;  %v2388_v53 = vpack.c.bf16 %v2380_v27, %v2380_v27 }
 0x60f   : > { %2396 = vst.msk [vmem:[%s4362_s19 + $0x10] sm:$0xf] %vm2391_vm8, %v2387_v60 }
 0x610   : > { %2397 = vst.msk [vmem:[%s4362_s19 + $0x14] sm:$0xf] %vm2391_vm8, %v2388_v53 }
 0x611 PF: > { %s13_s14 = sadd.s32 1, %s3141_s14   ;;  %s4469_s12 = smov %s3137_s13 }
 0x612   : > { %p10_p5 = scmp.ge.s32.totalorder %s13_s14, 4   ;;  %s4470_s13 = smov %s4472_s15 }
 0x614   :  { %12 = sbr.rel (!%p10_p5) target bundleno = 2 (0x2), region = 68 }

</bundles_post_ra>
